<compile_context>
chip_gen: v7x
topology: tpu7x:2x2x1
jax: 0.10.0
libtpu: 0.0.40
codegen_flags: <defaults>
</compile_context>

<pallas_src>
import functools
import math

import jax
import jax.numpy as jnp
import numpy as np
from jax.experimental import pallas as pl
from jax.experimental.pallas import tpu as pltpu


# ----------------------------- configuration -------------------------------
B = 2          # batch
DIM = 32       # input channels (dim)
HEADS = 4
DIM_HEAD = 16
INNER = HEADS * DIM_HEAD          # 64
H = W = 8
HW = H * W                        # 64
POOL_SIZES = (1, 3, 5)
NPOOL = sum(s * s for s in POOL_SIZES)     # 35
NPAD = ((NPOOL + 7) // 8) * 8              # 40 (sublane aligned)
SCALE = DIM_HEAD ** (-0.5)


# --------------------------- PPM pooling matrix -----------------------------
def build_pool_matrix(h, w, sizes=POOL_SIZES):
    """Rows reproduce nn.AdaptiveAvgPool2d((s,s)).view(b,c,-1) concatenated
    over `sizes` (PyTorch adaptive-pool region convention)."""
    rows = []
    for s in sizes:
        for i in range(s):
            r0 = (i * h) // s
            r1 = math.ceil((i + 1) * h / s)
            for j in range(s):
                c0 = (j * w) // s
                c1 = math.ceil((j + 1) * w / s)
                m = np.zeros((h, w), np.float32)
                m[r0:r1, c0:c1] = 1.0 / ((r1 - r0) * (c1 - c0))
                rows.append(m.reshape(-1))
    return np.stack(rows, axis=0)  # (NPOOL, h*w)


# ------------------------------- kernel -------------------------------------
def esa_kernel(x_ref, wqkv_t_ref, poolw_ref, wout_t_ref, bout_ref, o_ref):
    # x_ref:      (bb, HW, DIM)      bb batch elements handled this grid step
    # wqkv_t_ref: (DIM, 3*INNER)     to_qkv 1x1-conv weight, pre-transposed
    # poolw_ref:  (NPAD, HW)         PPM pooling matrix (rows >= NPOOL are zero)
    # wout_t_ref: (INNER, DIM)       to_out Linear weight, pre-transposed
    # bout_ref:   (1, DIM)           to_out Linear bias
    # o_ref:      (bb, HW, DIM)
    bb = x_ref.shape[0]
    xf = x_ref[...].reshape(bb * HW, DIM)                        # (bb*HW, DIM)

    # fused 1x1-conv QKV projection over the whole batch block (one MXU call)
    qkv = jnp.dot(xf, wqkv_t_ref[...],
                  preferred_element_type=jnp.float32)            # (bb*HW, 3*INNER)
    q_all = qkv[:, 0:INNER]                                      # (bb*HW, INNER)
    kv_all = qkv[:, INNER:3 * INNER]                             # (bb*HW, 2*INNER)

    poolw = poolw_ref[...]                                       # (NPAD, HW)
    wout_t = wout_t_ref[...]                                     # (INNER, DIM)

    # additive mask for padded pool rows (hoisted; computed once per step)
    col = jax.lax.broadcasted_iota(jnp.int32, (HW, NPAD), 1)
    pad_mask = jnp.where(col < NPOOL, 0.0, -1e30).astype(jnp.float32)

    outs = []
    for b in range(bb):                                          # unrolled (bb <= 2)
        q_b = q_all[b * HW:(b + 1) * HW, :]                      # (HW, INNER)
        kv_b = kv_all[b * HW:(b + 1) * HW, :]                    # (HW, 2*INNER)

        # PPM adaptive avg pooling of K and V in a single matmul
        kv_p = jnp.dot(poolw, kv_b,
                       preferred_element_type=jnp.float32)       # (NPAD, 2*INNER)
        k_p = kv_p[:, 0:INNER]                                   # (NPAD, INNER)
        v_p = kv_p[:, INNER:2 * INNER]                           # (NPAD, INNER)
        k_pT = k_p.T                                             # (INNER, NPAD) one transpose

        head_outs = []
        for hd in range(HEADS):                                  # 'b (head d)' split
            sl = slice(hd * DIM_HEAD, (hd + 1) * DIM_HEAD)
            dots = jnp.dot(q_b[:, sl], k_pT[sl, :],
                           preferred_element_type=jnp.float32)   # (HW, NPAD)
            dots = dots * SCALE + pad_mask
            m = jnp.max(dots, axis=-1, keepdims=True)
            e = jnp.exp(dots - m)                                # padded cols -> 0
            denom = jnp.sum(e, axis=-1, keepdims=True)
            pv = jnp.dot(e, v_p[:, sl],
                         preferred_element_type=jnp.float32)     # (HW, DH)
            # normalize after PV; approximate reciprocal runs on the EUP slot
            head_outs.append(pv * pl.reciprocal(denom, approx=True))
        outs.append(jnp.concatenate(head_outs, axis=-1))         # (HW, INNER)

    out_all = outs[0] if bb == 1 else jnp.concatenate(outs, axis=0)  # (bb*HW, INNER)

    # fused output projection + bias (one MXU call, one VPU add)
    y = jnp.dot(out_all, wout_t, preferred_element_type=jnp.float32)
    y = y + jnp.broadcast_to(bout_ref[...], (bb * HW, DIM))
    o_ref[...] = y.reshape(bb, HW, DIM).astype(o_ref.dtype)
    # TODO(synk): nn.Dropout(p=0.0) is identity in the forward pass; omitted.


# ------------------------------ wrapper --------------------------------------
def _batch_block_size():
    """Batch elements per grid step: whole batch on single-TC chips (v5e/v6e),
    one per step on dual-TC / megacore chips so both cores get work."""
    try:
        kind = jax.devices()[0].device_kind.lower()
    except Exception:
        kind = ""
    if any(tag in kind for tag in ("v7", "7x", "v4", "v5p")):
        return 1
    return B


@functools.partial(jax.jit, static_argnames=("bb",))
def esa_layer(x_nchw, w_qkv, w_out, b_out, pool_w_pad, *, bb):
    # x_nchw: (B, DIM, H, W) -> (B, HW, DIM)  (channels on lanes)
    x = jnp.transpose(x_nchw, (0, 2, 3, 1)).reshape(B, HW, DIM)
    wqkv_t = w_qkv.T                 # (DIM, 3*INNER)
    wout_t = w_out.T                 # (INNER, DIM)
    bout2d = b_out.reshape(1, DIM)

    out = pl.pallas_call(
        esa_kernel,
        out_shape=jax.ShapeDtypeStruct((B, HW, DIM), jnp.float32),
        grid_spec=pltpu.PrefetchScalarGridSpec(
            num_scalar_prefetch=0,
            grid=(B // bb,),
            in_specs=[
                pl.BlockSpec((bb, HW, DIM), lambda i: (i, 0, 0)),
                pl.BlockSpec((DIM, 3 * INNER), lambda i: (0, 0)),
                pl.BlockSpec((NPAD, HW), lambda i: (0, 0)),
                pl.BlockSpec((INNER, DIM), lambda i: (0, 0)),
                pl.BlockSpec((1, DIM), lambda i: (0, 0)),
            ],
            out_specs=pl.BlockSpec((bb, HW, DIM), lambda i: (i, 0, 0)),
        ),
        compiler_params=pltpu.CompilerParams(
            dimension_semantics=("parallel",)),
    )(x, wqkv_t, pool_w_pad, wout_t, bout2d)
    return out  # (B, HW, DIM)


# ------------------------- pure-JAX reference (check) -------------------------
def esa_reference(x_nchw, w_qkv, w_out, b_out, pool_w):
    x = jnp.transpose(x_nchw, (0, 2, 3, 1)).reshape(B, HW, DIM)
    qkv = jnp.einsum('bnc,oc->bno', x, w_qkv)               # (B, HW, 3*INNER)
    q, k, v = jnp.split(qkv, 3, axis=-1)
    k_p = jnp.einsum('ph,bhc->bpc', pool_w, k)              # (B, NPOOL, INNER)
    v_p = jnp.einsum('ph,bhc->bpc', pool_w, v)
    qh = q.reshape(B, HW, HEADS, DIM_HEAD).transpose(0, 2, 1, 3)
    kh = k_p.reshape(B, NPOOL, HEADS, DIM_HEAD).transpose(0, 2, 1, 3)
    vh = v_p.reshape(B, NPOOL, HEADS, DIM_HEAD).transpose(0, 2, 1, 3)
    dots = jnp.einsum('bhqd,bhkd->bhqk', qh, kh) * SCALE
    attn = jax.nn.softmax(dots, axis=-1)
    out = jnp.einsum('bhqk,bhkd->bhqd', attn, vh)
    out = out.transpose(0, 2, 1, 3).reshape(B, HW, INNER)
    return jnp.einsum('bni,oi->bno', out, w_out) + b_out[None, None, :]


# -------------------------------- main ----------------------------------------
if __name__ == "__main__":
    key = jax.random.PRNGKey(0)
    k1, k2, k3, k4 = jax.random.split(key, 4)

    x = jax.random.normal(k1, (B, DIM, H, W), dtype=jnp.float32)
    # deterministic synthetic parameters (conv1x1 weight has no bias)
    w_qkv = 0.05 * jax.random.normal(k2, (3 * INNER, DIM), dtype=jnp.float32)
    w_out = 0.05 * jax.random.normal(k3, (DIM, INNER), dtype=jnp.float32)
    b_out = 0.01 * jax.random.normal(k4, (DIM,), dtype=jnp.float32)

    pool_np = build_pool_matrix(H, W)                              # (NPOOL, HW)
    pool_pad_np = np.concatenate(
        [pool_np, np.zeros((NPAD - NPOOL, HW), np.float32)], axis=0)
    pool_w = jnp.asarray(pool_np)
    pool_w_pad = jnp.asarray(pool_pad_np)                          # (NPAD, HW)

    bb = _batch_block_size()
    y = jax.block_until_ready(esa_layer(x, w_qkv, w_out, b_out, pool_w_pad, bb=bb))

    y_ref = jax.block_until_ready(esa_reference(x, w_qkv, w_out, b_out, pool_w))
    # tolerance widened slightly because of pl.reciprocal(approx=True) in softmax
    np.testing.assert_allclose(np.asarray(y), np.asarray(y_ref),
                               rtol=5e-3, atol=5e-3)
    assert y.shape == (B, HW, DIM)
    print("KERNEL_OK")
</pallas_src>

<mosaic_0001>
module attributes {stable_mosaic.version = 11 : i64} {
  func.func @esa_kernel(%arg0: i32, %arg1: memref<2x64x32xf32, #tpu.memory_space<vmem>>, %arg2: memref<32x192xf32, #tpu.memory_space<vmem>>, %arg3: memref<40x64xf32, #tpu.memory_space<vmem>>, %arg4: memref<64x32xf32, #tpu.memory_space<vmem>>, %arg5: memref<1x32xf32, #tpu.memory_space<vmem>>, %arg6: memref<2x64x32xf32, #tpu.memory_space<vmem>>) attributes {dimension_semantics = [#tpu.dimension_semantics<parallel>], iteration_bounds = array<i64: 1>, scalar_prefetch = 0 : i64, scratch_operands = 0 : i64, tpu.core_type = #tpu.core_type<tc>, window_params = [{transform_indices = @transform_0, window_bounds = array<i64: 2, 64, 32>}, {pipeline_mode = #tpu.pipeline_mode<synchronous>, transform_indices = @transform_1, window_bounds = array<i64: 32, 192>}, {pipeline_mode = #tpu.pipeline_mode<synchronous>, transform_indices = @transform_2, window_bounds = array<i64: 40, 64>}, {pipeline_mode = #tpu.pipeline_mode<synchronous>, transform_indices = @transform_3, window_bounds = array<i64: 64, 32>}, {pipeline_mode = #tpu.pipeline_mode<synchronous>, transform_indices = @transform_4, window_bounds = array<i64: 1, 32>}, {transform_indices = @transform_5, window_bounds = array<i64: 2, 64, 32>}]} {
    %c0 = arith.constant 0 : index
    %c0_0 = arith.constant 0 : index
    %c0_1 = arith.constant 0 : index
    %0 = vector.load %arg1[%c0, %c0_0, %c0_1] : memref<2x64x32xf32, #tpu.memory_space<vmem>>, vector<2x64x32xf32>
    %1 = vector.shape_cast %0 : vector<2x64x32xf32> to vector<128x32xf32>
    %c0_2 = arith.constant 0 : index
    %c0_3 = arith.constant 0 : index
    %2 = vector.load %arg2[%c0_2, %c0_3] : memref<32x192xf32, #tpu.memory_space<vmem>>, vector<32x192xf32>
    %cst = arith.constant dense<0.000000e+00> : vector<128x192xf32>
    %3 = tpu.matmul %1, %2, %cst {dimension_numbers = #tpu.dot_dimension_numbers<[1], [0], [0], [1], [0, 0, 1, 1], [], []>} : vector<128x32xf32>, vector<32x192xf32>, vector<128x192xf32> -> vector<128x192xf32>
    %4 = vector.extract_strided_slice %3 {offsets = [0, 0], sizes = [128, 64], strides = [1, 1]} : vector<128x192xf32> to vector<128x64xf32>
    %5 = vector.extract_strided_slice %3 {offsets = [0, 64], sizes = [128, 128], strides = [1, 1]} : vector<128x192xf32> to vector<128x128xf32>
    %c0_4 = arith.constant 0 : index
    %c0_5 = arith.constant 0 : index
    %6 = vector.load %arg3[%c0_4, %c0_5] : memref<40x64xf32, #tpu.memory_space<vmem>>, vector<40x64xf32>
    %c0_6 = arith.constant 0 : index
    %c0_7 = arith.constant 0 : index
    %7 = vector.load %arg4[%c0_6, %c0_7] : memref<64x32xf32, #tpu.memory_space<vmem>>, vector<64x32xf32>
    %8 = tpu.iota {dimensions = array<i32: 1>} : vector<64x40xi32>
    %c35_i32 = arith.constant 35 : i32
    %9 = vector.broadcast %c35_i32 : i32 to vector<64x40xi32>
    %10 = arith.cmpi slt, %8, %9 : vector<64x40xi32>
    %cst_8 = arith.constant 0.000000e+00 : f32
    %cst_9 = arith.constant -1.000000e+30 : f32
    %11 = vector.broadcast %cst_8 : f32 to vector<64x40xf32>
    %12 = vector.broadcast %cst_9 : f32 to vector<64x40xf32>
    %13 = arith.select %10, %11, %12 : vector<64x40xi1>, vector<64x40xf32>
    %14 = vector.extract_strided_slice %4 {offsets = [0, 0], sizes = [64, 64], strides = [1, 1]} : vector<128x64xf32> to vector<64x64xf32>
    %15 = vector.extract_strided_slice %5 {offsets = [0, 0], sizes = [64, 128], strides = [1, 1]} : vector<128x128xf32> to vector<64x128xf32>
    %cst_10 = arith.constant dense<0.000000e+00> : vector<40x128xf32>
    %16 = tpu.matmul %6, %15, %cst_10 {dimension_numbers = #tpu.dot_dimension_numbers<[1], [0], [0], [1], [0, 0, 1, 1], [], []>} : vector<40x64xf32>, vector<64x128xf32>, vector<40x128xf32> -> vector<40x128xf32>
    %17 = vector.extract_strided_slice %16 {offsets = [0, 0], sizes = [40, 64], strides = [1, 1]} : vector<40x128xf32> to vector<40x64xf32>
    %18 = vector.extract_strided_slice %16 {offsets = [0, 64], sizes = [40, 64], strides = [1, 1]} : vector<40x128xf32> to vector<40x64xf32>
    %19 = tpu.transpose %17, [1, 0] : vector<40x64xf32> -> vector<64x40xf32>
    %20 = vector.extract_strided_slice %14 {offsets = [0, 0], sizes = [64, 16], strides = [1, 1]} : vector<64x64xf32> to vector<64x16xf32>
    %21 = vector.extract_strided_slice %19 {offsets = [0, 0], sizes = [16, 40], strides = [1, 1]} : vector<64x40xf32> to vector<16x40xf32>
    %cst_11 = arith.constant dense<0.000000e+00> : vector<64x40xf32>
    %22 = tpu.matmul %20, %21, %cst_11 {dimension_numbers = #tpu.dot_dimension_numbers<[1], [0], [0], [1], [0, 0, 1, 1], [], []>} : vector<64x16xf32>, vector<16x40xf32>, vector<64x40xf32> -> vector<64x40xf32>
    %cst_12 = arith.constant 2.500000e-01 : f32
    %23 = vector.broadcast %cst_12 : f32 to vector<64x40xf32>
    %24 = arith.mulf %22, %23 : vector<64x40xf32>
    %25 = arith.addf %24, %13 : vector<64x40xf32>
    %cst_13 = arith.constant dense<0xFF800000> : vector<64xf32>
    %26 = vector.multi_reduction <maximumf>, %25, %cst_13 [1] : vector<64x40xf32> to vector<64xf32>
    %27 = vector.shape_cast %26 : vector<64xf32> to vector<64x1xf32>
    %28 = vector.broadcast %27 : vector<64x1xf32> to vector<64x40xf32>
    %29 = arith.subf %25, %28 : vector<64x40xf32>
    %30 = math.exp %29 : vector<64x40xf32>
    %cst_14 = arith.constant dense<0.000000e+00> : vector<64xf32>
    %31 = vector.multi_reduction <add>, %30, %cst_14 [1] : vector<64x40xf32> to vector<64xf32>
    %32 = vector.shape_cast %31 : vector<64xf32> to vector<64x1xf32>
    %33 = vector.extract_strided_slice %18 {offsets = [0, 0], sizes = [40, 16], strides = [1, 1]} : vector<40x64xf32> to vector<40x16xf32>
    %cst_15 = arith.constant dense<0.000000e+00> : vector<64x16xf32>
    %34 = tpu.matmul %30, %33, %cst_15 {dimension_numbers = #tpu.dot_dimension_numbers<[1], [0], [0], [1], [0, 0, 1, 1], [], []>} : vector<64x40xf32>, vector<40x16xf32>, vector<64x16xf32> -> vector<64x16xf32>
    %35 = tpu.reciprocal %32 {approx = true} : vector<64x1xf32> -> vector<64x1xf32>
    %36 = vector.broadcast %35 : vector<64x1xf32> to vector<64x16xf32>
    %37 = arith.mulf %34, %36 : vector<64x16xf32>
    %38 = vector.extract_strided_slice %14 {offsets = [0, 16], sizes = [64, 16], strides = [1, 1]} : vector<64x64xf32> to vector<64x16xf32>
    %39 = vector.extract_strided_slice %19 {offsets = [16, 0], sizes = [16, 40], strides = [1, 1]} : vector<64x40xf32> to vector<16x40xf32>
    %cst_16 = arith.constant dense<0.000000e+00> : vector<64x40xf32>
    %40 = tpu.matmul %38, %39, %cst_16 {dimension_numbers = #tpu.dot_dimension_numbers<[1], [0], [0], [1], [0, 0, 1, 1], [], []>} : vector<64x16xf32>, vector<16x40xf32>, vector<64x40xf32> -> vector<64x40xf32>
    %cst_17 = arith.constant 2.500000e-01 : f32
    %41 = vector.broadcast %cst_17 : f32 to vector<64x40xf32>
    %42 = arith.mulf %40, %41 : vector<64x40xf32>
    %43 = arith.addf %42, %13 : vector<64x40xf32>
    %cst_18 = arith.constant dense<0xFF800000> : vector<64xf32>
    %44 = vector.multi_reduction <maximumf>, %43, %cst_18 [1] : vector<64x40xf32> to vector<64xf32>
    %45 = vector.shape_cast %44 : vector<64xf32> to vector<64x1xf32>
    %46 = vector.broadcast %45 : vector<64x1xf32> to vector<64x40xf32>
    %47 = arith.subf %43, %46 : vector<64x40xf32>
    %48 = math.exp %47 : vector<64x40xf32>
    %cst_19 = arith.constant dense<0.000000e+00> : vector<64xf32>
    %49 = vector.multi_reduction <add>, %48, %cst_19 [1] : vector<64x40xf32> to vector<64xf32>
    %50 = vector.shape_cast %49 : vector<64xf32> to vector<64x1xf32>
    %51 = vector.extract_strided_slice %18 {offsets = [0, 16], sizes = [40, 16], strides = [1, 1]} : vector<40x64xf32> to vector<40x16xf32>
    %cst_20 = arith.constant dense<0.000000e+00> : vector<64x16xf32>
    %52 = tpu.matmul %48, %51, %cst_20 {dimension_numbers = #tpu.dot_dimension_numbers<[1], [0], [0], [1], [0, 0, 1, 1], [], []>} : vector<64x40xf32>, vector<40x16xf32>, vector<64x16xf32> -> vector<64x16xf32>
    %53 = tpu.reciprocal %50 {approx = true} : vector<64x1xf32> -> vector<64x1xf32>
    %54 = vector.broadcast %53 : vector<64x1xf32> to vector<64x16xf32>
    %55 = arith.mulf %52, %54 : vector<64x16xf32>
    %56 = vector.extract_strided_slice %14 {offsets = [0, 32], sizes = [64, 16], strides = [1, 1]} : vector<64x64xf32> to vector<64x16xf32>
    %57 = vector.extract_strided_slice %19 {offsets = [32, 0], sizes = [16, 40], strides = [1, 1]} : vector<64x40xf32> to vector<16x40xf32>
    %cst_21 = arith.constant dense<0.000000e+00> : vector<64x40xf32>
    %58 = tpu.matmul %56, %57, %cst_21 {dimension_numbers = #tpu.dot_dimension_numbers<[1], [0], [0], [1], [0, 0, 1, 1], [], []>} : vector<64x16xf32>, vector<16x40xf32>, vector<64x40xf32> -> vector<64x40xf32>
    %cst_22 = arith.constant 2.500000e-01 : f32
    %59 = vector.broadcast %cst_22 : f32 to vector<64x40xf32>
    %60 = arith.mulf %58, %59 : vector<64x40xf32>
    %61 = arith.addf %60, %13 : vector<64x40xf32>
    %cst_23 = arith.constant dense<0xFF800000> : vector<64xf32>
    %62 = vector.multi_reduction <maximumf>, %61, %cst_23 [1] : vector<64x40xf32> to vector<64xf32>
    %63 = vector.shape_cast %62 : vector<64xf32> to vector<64x1xf32>
    %64 = vector.broadcast %63 : vector<64x1xf32> to vector<64x40xf32>
    %65 = arith.subf %61, %64 : vector<64x40xf32>
    %66 = math.exp %65 : vector<64x40xf32>
    %cst_24 = arith.constant dense<0.000000e+00> : vector<64xf32>
    %67 = vector.multi_reduction <add>, %66, %cst_24 [1] : vector<64x40xf32> to vector<64xf32>
    %68 = vector.shape_cast %67 : vector<64xf32> to vector<64x1xf32>
    %69 = vector.extract_strided_slice %18 {offsets = [0, 32], sizes = [40, 16], strides = [1, 1]} : vector<40x64xf32> to vector<40x16xf32>
    %cst_25 = arith.constant dense<0.000000e+00> : vector<64x16xf32>
    %70 = tpu.matmul %66, %69, %cst_25 {dimension_numbers = #tpu.dot_dimension_numbers<[1], [0], [0], [1], [0, 0, 1, 1], [], []>} : vector<64x40xf32>, vector<40x16xf32>, vector<64x16xf32> -> vector<64x16xf32>
    %71 = tpu.reciprocal %68 {approx = true} : vector<64x1xf32> -> vector<64x1xf32>
    %72 = vector.broadcast %71 : vector<64x1xf32> to vector<64x16xf32>
    %73 = arith.mulf %70, %72 : vector<64x16xf32>
    %74 = vector.extract_strided_slice %14 {offsets = [0, 48], sizes = [64, 16], strides = [1, 1]} : vector<64x64xf32> to vector<64x16xf32>
    %75 = vector.extract_strided_slice %19 {offsets = [48, 0], sizes = [16, 40], strides = [1, 1]} : vector<64x40xf32> to vector<16x40xf32>
    %cst_26 = arith.constant dense<0.000000e+00> : vector<64x40xf32>
    %76 = tpu.matmul %74, %75, %cst_26 {dimension_numbers = #tpu.dot_dimension_numbers<[1], [0], [0], [1], [0, 0, 1, 1], [], []>} : vector<64x16xf32>, vector<16x40xf32>, vector<64x40xf32> -> vector<64x40xf32>
    %cst_27 = arith.constant 2.500000e-01 : f32
    %77 = vector.broadcast %cst_27 : f32 to vector<64x40xf32>
    %78 = arith.mulf %76, %77 : vector<64x40xf32>
    %79 = arith.addf %78, %13 : vector<64x40xf32>
    %cst_28 = arith.constant dense<0xFF800000> : vector<64xf32>
    %80 = vector.multi_reduction <maximumf>, %79, %cst_28 [1] : vector<64x40xf32> to vector<64xf32>
    %81 = vector.shape_cast %80 : vector<64xf32> to vector<64x1xf32>
    %82 = vector.broadcast %81 : vector<64x1xf32> to vector<64x40xf32>
    %83 = arith.subf %79, %82 : vector<64x40xf32>
    %84 = math.exp %83 : vector<64x40xf32>
    %cst_29 = arith.constant dense<0.000000e+00> : vector<64xf32>
    %85 = vector.multi_reduction <add>, %84, %cst_29 [1] : vector<64x40xf32> to vector<64xf32>
    %86 = vector.shape_cast %85 : vector<64xf32> to vector<64x1xf32>
    %87 = vector.extract_strided_slice %18 {offsets = [0, 48], sizes = [40, 16], strides = [1, 1]} : vector<40x64xf32> to vector<40x16xf32>
    %cst_30 = arith.constant dense<0.000000e+00> : vector<64x16xf32>
    %88 = tpu.matmul %84, %87, %cst_30 {dimension_numbers = #tpu.dot_dimension_numbers<[1], [0], [0], [1], [0, 0, 1, 1], [], []>} : vector<64x40xf32>, vector<40x16xf32>, vector<64x16xf32> -> vector<64x16xf32>
    %89 = tpu.reciprocal %86 {approx = true} : vector<64x1xf32> -> vector<64x1xf32>
    %90 = vector.broadcast %89 : vector<64x1xf32> to vector<64x16xf32>
    %91 = arith.mulf %88, %90 : vector<64x16xf32>
    %92 = tpu.concatenate %37, %55, %73, %91 in 1 : vector<64x16xf32>, vector<64x16xf32>, vector<64x16xf32>, vector<64x16xf32> -> vector<64x64xf32>
    %93 = vector.extract_strided_slice %4 {offsets = [64, 0], sizes = [64, 64], strides = [1, 1]} : vector<128x64xf32> to vector<64x64xf32>
    %94 = vector.extract_strided_slice %5 {offsets = [64, 0], sizes = [64, 128], strides = [1, 1]} : vector<128x128xf32> to vector<64x128xf32>
    %cst_31 = arith.constant dense<0.000000e+00> : vector<40x128xf32>
    %95 = tpu.matmul %6, %94, %cst_31 {dimension_numbers = #tpu.dot_dimension_numbers<[1], [0], [0], [1], [0, 0, 1, 1], [], []>} : vector<40x64xf32>, vector<64x128xf32>, vector<40x128xf32> -> vector<40x128xf32>
    %96 = vector.extract_strided_slice %95 {offsets = [0, 0], sizes = [40, 64], strides = [1, 1]} : vector<40x128xf32> to vector<40x64xf32>
    %97 = vector.extract_strided_slice %95 {offsets = [0, 64], sizes = [40, 64], strides = [1, 1]} : vector<40x128xf32> to vector<40x64xf32>
    %98 = tpu.transpose %96, [1, 0] : vector<40x64xf32> -> vector<64x40xf32>
    %99 = vector.extract_strided_slice %93 {offsets = [0, 0], sizes = [64, 16], strides = [1, 1]} : vector<64x64xf32> to vector<64x16xf32>
    %100 = vector.extract_strided_slice %98 {offsets = [0, 0], sizes = [16, 40], strides = [1, 1]} : vector<64x40xf32> to vector<16x40xf32>
    %cst_32 = arith.constant dense<0.000000e+00> : vector<64x40xf32>
    %101 = tpu.matmul %99, %100, %cst_32 {dimension_numbers = #tpu.dot_dimension_numbers<[1], [0], [0], [1], [0, 0, 1, 1], [], []>} : vector<64x16xf32>, vector<16x40xf32>, vector<64x40xf32> -> vector<64x40xf32>
    %cst_33 = arith.constant 2.500000e-01 : f32
    %102 = vector.broadcast %cst_33 : f32 to vector<64x40xf32>
    %103 = arith.mulf %101, %102 : vector<64x40xf32>
    %104 = arith.addf %103, %13 : vector<64x40xf32>
    %cst_34 = arith.constant dense<0xFF800000> : vector<64xf32>
    %105 = vector.multi_reduction <maximumf>, %104, %cst_34 [1] : vector<64x40xf32> to vector<64xf32>
    %106 = vector.shape_cast %105 : vector<64xf32> to vector<64x1xf32>
    %107 = vector.broadcast %106 : vector<64x1xf32> to vector<64x40xf32>
    %108 = arith.subf %104, %107 : vector<64x40xf32>
    %109 = math.exp %108 : vector<64x40xf32>
    %cst_35 = arith.constant dense<0.000000e+00> : vector<64xf32>
    %110 = vector.multi_reduction <add>, %109, %cst_35 [1] : vector<64x40xf32> to vector<64xf32>
    %111 = vector.shape_cast %110 : vector<64xf32> to vector<64x1xf32>
    %112 = vector.extract_strided_slice %97 {offsets = [0, 0], sizes = [40, 16], strides = [1, 1]} : vector<40x64xf32> to vector<40x16xf32>
    %cst_36 = arith.constant dense<0.000000e+00> : vector<64x16xf32>
    %113 = tpu.matmul %109, %112, %cst_36 {dimension_numbers = #tpu.dot_dimension_numbers<[1], [0], [0], [1], [0, 0, 1, 1], [], []>} : vector<64x40xf32>, vector<40x16xf32>, vector<64x16xf32> -> vector<64x16xf32>
    %114 = tpu.reciprocal %111 {approx = true} : vector<64x1xf32> -> vector<64x1xf32>
    %115 = vector.broadcast %114 : vector<64x1xf32> to vector<64x16xf32>
    %116 = arith.mulf %113, %115 : vector<64x16xf32>
    %117 = vector.extract_strided_slice %93 {offsets = [0, 16], sizes = [64, 16], strides = [1, 1]} : vector<64x64xf32> to vector<64x16xf32>
    %118 = vector.extract_strided_slice %98 {offsets = [16, 0], sizes = [16, 40], strides = [1, 1]} : vector<64x40xf32> to vector<16x40xf32>
    %cst_37 = arith.constant dense<0.000000e+00> : vector<64x40xf32>
    %119 = tpu.matmul %117, %118, %cst_37 {dimension_numbers = #tpu.dot_dimension_numbers<[1], [0], [0], [1], [0, 0, 1, 1], [], []>} : vector<64x16xf32>, vector<16x40xf32>, vector<64x40xf32> -> vector<64x40xf32>
    %cst_38 = arith.constant 2.500000e-01 : f32
    %120 = vector.broadcast %cst_38 : f32 to vector<64x40xf32>
    %121 = arith.mulf %119, %120 : vector<64x40xf32>
    %122 = arith.addf %121, %13 : vector<64x40xf32>
    %cst_39 = arith.constant dense<0xFF800000> : vector<64xf32>
    %123 = vector.multi_reduction <maximumf>, %122, %cst_39 [1] : vector<64x40xf32> to vector<64xf32>
    %124 = vector.shape_cast %123 : vector<64xf32> to vector<64x1xf32>
    %125 = vector.broadcast %124 : vector<64x1xf32> to vector<64x40xf32>
    %126 = arith.subf %122, %125 : vector<64x40xf32>
    %127 = math.exp %126 : vector<64x40xf32>
    %cst_40 = arith.constant dense<0.000000e+00> : vector<64xf32>
    %128 = vector.multi_reduction <add>, %127, %cst_40 [1] : vector<64x40xf32> to vector<64xf32>
    %129 = vector.shape_cast %128 : vector<64xf32> to vector<64x1xf32>
    %130 = vector.extract_strided_slice %97 {offsets = [0, 16], sizes = [40, 16], strides = [1, 1]} : vector<40x64xf32> to vector<40x16xf32>
    %cst_41 = arith.constant dense<0.000000e+00> : vector<64x16xf32>
    %131 = tpu.matmul %127, %130, %cst_41 {dimension_numbers = #tpu.dot_dimension_numbers<[1], [0], [0], [1], [0, 0, 1, 1], [], []>} : vector<64x40xf32>, vector<40x16xf32>, vector<64x16xf32> -> vector<64x16xf32>
    %132 = tpu.reciprocal %129 {approx = true} : vector<64x1xf32> -> vector<64x1xf32>
    %133 = vector.broadcast %132 : vector<64x1xf32> to vector<64x16xf32>
    %134 = arith.mulf %131, %133 : vector<64x16xf32>
    %135 = vector.extract_strided_slice %93 {offsets = [0, 32], sizes = [64, 16], strides = [1, 1]} : vector<64x64xf32> to vector<64x16xf32>
    %136 = vector.extract_strided_slice %98 {offsets = [32, 0], sizes = [16, 40], strides = [1, 1]} : vector<64x40xf32> to vector<16x40xf32>
    %cst_42 = arith.constant dense<0.000000e+00> : vector<64x40xf32>
    %137 = tpu.matmul %135, %136, %cst_42 {dimension_numbers = #tpu.dot_dimension_numbers<[1], [0], [0], [1], [0, 0, 1, 1], [], []>} : vector<64x16xf32>, vector<16x40xf32>, vector<64x40xf32> -> vector<64x40xf32>
    %cst_43 = arith.constant 2.500000e-01 : f32
    %138 = vector.broadcast %cst_43 : f32 to vector<64x40xf32>
    %139 = arith.mulf %137, %138 : vector<64x40xf32>
    %140 = arith.addf %139, %13 : vector<64x40xf32>
    %cst_44 = arith.constant dense<0xFF800000> : vector<64xf32>
    %141 = vector.multi_reduction <maximumf>, %140, %cst_44 [1] : vector<64x40xf32> to vector<64xf32>
    %142 = vector.shape_cast %141 : vector<64xf32> to vector<64x1xf32>
    %143 = vector.broadcast %142 : vector<64x1xf32> to vector<64x40xf32>
    %144 = arith.subf %140, %143 : vector<64x40xf32>
    %145 = math.exp %144 : vector<64x40xf32>
    %cst_45 = arith.constant dense<0.000000e+00> : vector<64xf32>
    %146 = vector.multi_reduction <add>, %145, %cst_45 [1] : vector<64x40xf32> to vector<64xf32>
    %147 = vector.shape_cast %146 : vector<64xf32> to vector<64x1xf32>
    %148 = vector.extract_strided_slice %97 {offsets = [0, 32], sizes = [40, 16], strides = [1, 1]} : vector<40x64xf32> to vector<40x16xf32>
    %cst_46 = arith.constant dense<0.000000e+00> : vector<64x16xf32>
    %149 = tpu.matmul %145, %148, %cst_46 {dimension_numbers = #tpu.dot_dimension_numbers<[1], [0], [0], [1], [0, 0, 1, 1], [], []>} : vector<64x40xf32>, vector<40x16xf32>, vector<64x16xf32> -> vector<64x16xf32>
    %150 = tpu.reciprocal %147 {approx = true} : vector<64x1xf32> -> vector<64x1xf32>
    %151 = vector.broadcast %150 : vector<64x1xf32> to vector<64x16xf32>
    %152 = arith.mulf %149, %151 : vector<64x16xf32>
    %153 = vector.extract_strided_slice %93 {offsets = [0, 48], sizes = [64, 16], strides = [1, 1]} : vector<64x64xf32> to vector<64x16xf32>
    %154 = vector.extract_strided_slice %98 {offsets = [48, 0], sizes = [16, 40], strides = [1, 1]} : vector<64x40xf32> to vector<16x40xf32>
    %cst_47 = arith.constant dense<0.000000e+00> : vector<64x40xf32>
    %155 = tpu.matmul %153, %154, %cst_47 {dimension_numbers = #tpu.dot_dimension_numbers<[1], [0], [0], [1], [0, 0, 1, 1], [], []>} : vector<64x16xf32>, vector<16x40xf32>, vector<64x40xf32> -> vector<64x40xf32>
    %cst_48 = arith.constant 2.500000e-01 : f32
    %156 = vector.broadcast %cst_48 : f32 to vector<64x40xf32>
    %157 = arith.mulf %155, %156 : vector<64x40xf32>
    %158 = arith.addf %157, %13 : vector<64x40xf32>
    %cst_49 = arith.constant dense<0xFF800000> : vector<64xf32>
    %159 = vector.multi_reduction <maximumf>, %158, %cst_49 [1] : vector<64x40xf32> to vector<64xf32>
    %160 = vector.shape_cast %159 : vector<64xf32> to vector<64x1xf32>
    %161 = vector.broadcast %160 : vector<64x1xf32> to vector<64x40xf32>
    %162 = arith.subf %158, %161 : vector<64x40xf32>
    %163 = math.exp %162 : vector<64x40xf32>
    %cst_50 = arith.constant dense<0.000000e+00> : vector<64xf32>
    %164 = vector.multi_reduction <add>, %163, %cst_50 [1] : vector<64x40xf32> to vector<64xf32>
    %165 = vector.shape_cast %164 : vector<64xf32> to vector<64x1xf32>
    %166 = vector.extract_strided_slice %97 {offsets = [0, 48], sizes = [40, 16], strides = [1, 1]} : vector<40x64xf32> to vector<40x16xf32>
    %cst_51 = arith.constant dense<0.000000e+00> : vector<64x16xf32>
    %167 = tpu.matmul %163, %166, %cst_51 {dimension_numbers = #tpu.dot_dimension_numbers<[1], [0], [0], [1], [0, 0, 1, 1], [], []>} : vector<64x40xf32>, vector<40x16xf32>, vector<64x16xf32> -> vector<64x16xf32>
    %168 = tpu.reciprocal %165 {approx = true} : vector<64x1xf32> -> vector<64x1xf32>
    %169 = vector.broadcast %168 : vector<64x1xf32> to vector<64x16xf32>
    %170 = arith.mulf %167, %169 : vector<64x16xf32>
    %171 = tpu.concatenate %116, %134, %152, %170 in 1 : vector<64x16xf32>, vector<64x16xf32>, vector<64x16xf32>, vector<64x16xf32> -> vector<64x64xf32>
    %172 = tpu.concatenate %92, %171 in 0 : vector<64x64xf32>, vector<64x64xf32> -> vector<128x64xf32>
    %cst_52 = arith.constant dense<0.000000e+00> : vector<128x32xf32>
    %173 = tpu.matmul %172, %7, %cst_52 {dimension_numbers = #tpu.dot_dimension_numbers<[1], [0], [0], [1], [0, 0, 1, 1], [], []>} : vector<128x64xf32>, vector<64x32xf32>, vector<128x32xf32> -> vector<128x32xf32>
    %c0_53 = arith.constant 0 : index
    %c0_54 = arith.constant 0 : index
    %174 = vector.load %arg5[%c0_53, %c0_54] : memref<1x32xf32, #tpu.memory_space<vmem>>, vector<1x32xf32>
    %175 = vector.shape_cast %174 : vector<1x32xf32> to vector<1x32xf32>
    %176 = vector.broadcast %175 : vector<1x32xf32> to vector<128x32xf32>
    %177 = arith.addf %173, %176 : vector<128x32xf32>
    %178 = vector.shape_cast %177 : vector<128x32xf32> to vector<2x64x32xf32>
    %c0_55 = arith.constant 0 : index
    %c0_56 = arith.constant 0 : index
    %c0_57 = arith.constant 0 : index
    %179 = vector.load %arg6[%c0_55, %c0_56, %c0_57] : memref<2x64x32xf32, #tpu.memory_space<vmem>>, vector<2x64x32xf32>
    tpu.vector_store %arg6[%c0_55, %c0_56, %c0_57], %178 {strides = array<i32>} : memref<2x64x32xf32, #tpu.memory_space<vmem>>, vector<2x64x32xf32>,
    return
  }
  func.func @transform_0(%arg0: i32) -> (i32, i32, i32) {
    %c0_i32 = arith.constant 0 : i32
    %c0_i32_0 = arith.constant 0 : i32
    %c0_i32_1 = arith.constant 0 : i32
    return %arg0, %c0_i32, %c0_i32_0 : i32, i32, i32
  }
  func.func @transform_1(%arg0: i32) -> (i32, i32) {
    %c0_i32 = arith.constant 0 : i32
    %c0_i32_0 = arith.constant 0 : i32
    %c0_i32_1 = arith.constant 0 : i32
    return %c0_i32, %c0_i32_0 : i32, i32
  }
  func.func @transform_2(%arg0: i32) -> (i32, i32) {
    %c0_i32 = arith.constant 0 : i32
    %c0_i32_0 = arith.constant 0 : i32
    %c0_i32_1 = arith.constant 0 : i32
    return %c0_i32, %c0_i32_0 : i32, i32
  }
  func.func @transform_3(%arg0: i32) -> (i32, i32) {
    %c0_i32 = arith.constant 0 : i32
    %c0_i32_0 = arith.constant 0 : i32
    %c0_i32_1 = arith.constant 0 : i32
    return %c0_i32, %c0_i32_0 : i32, i32
  }
  func.func @transform_4(%arg0: i32) -> (i32, i32) {
    %c0_i32 = arith.constant 0 : i32
    %c0_i32_0 = arith.constant 0 : i32
    %c0_i32_1 = arith.constant 0 : i32
    return %c0_i32, %c0_i32_0 : i32, i32
  }
  func.func @transform_5(%arg0: i32) -> (i32, i32, i32) {
    %c0_i32 = arith.constant 0 : i32
    %c0_i32_0 = arith.constant 0 : i32
    %c0_i32_1 = arith.constant 0 : i32
    return %arg0, %c0_i32, %c0_i32_0 : i32, i32, i32
  }
}

</mosaic_0001>

<bundles_post_ra>
// kernel: esa_layer.1
= control target key start
LH: loop header
LB: loop body
LE: loop exit
PB: predicated region body
PF: predicated region fallthrough
CT: control target
= control target key end

     0   :  { %10 = vsyncpa [#allocation3], 0  ;;  %s5925_s18 = smov [#allocation2]   ;;  %s7863_s0 = inlined_call_operand.hbm [shape: f32[2,64,32], index: 0, kind: input, shape index: {}]   ;;  %s7864_s1 = inlined_call_operand.vmem [shape: f32[32,192], index: 1, kind: input, shape index: {}]   ;;  %s7865_s2 = inlined_call_operand.vmem [shape: f32[40,64], index: 2, kind: input, shape index: {}]   ;;  %s7866_s3 = inlined_call_operand.vmem [shape: f32[64,32], index: 3, kind: input, shape index: {}]   ;;  %s7867_s4 = inlined_call_operand.vmem [shape: f32[1,32], index: 4, kind: input, shape index: {}]   ;;  %s7868_s5 = inlined_call_operand.vmem [shape: f32[2,64,32], index: 5, kind: output, shape index: {}]  }
   0x1   :  { %s16_s19 = sshll.u32 %s5925_s18, 4  ;;  %s5901_s22 = scalar_lea.hbm %s7863_s0, 2048  ;;  %s17_s19 = int_to_ptr.vmem [resolvable:$true] %s16_s19 }
   0x2   :  { %p5902_p0 = scmp.ne.s32.totalorder %s7863_s0, %s5901_s22  ;;  %p5905_p1 = scmp.lt.u32.totalorder %s5901_s22, %s7863_s0 }
   0x4   :  { %p5907_p2 = pnand %p5905_p1, %p5902_p0 }
   0x6   :  { %5910 = shalt.err (!%p5907_p2)
}
   0x7   :  { %s5911_s27 = scalar_lea.vmem %s17_s19, 2048  ;;  %p5916_p4 = scmp.lt.s32.totalorder %s17_s19, %s17_s19 }
   0x8   :  { %p5912_p3 = scmp.ne.s32.totalorder %s17_s19, %s5911_s27  ;;  %p5917_p5 = scmp.lt.s32.totalorder %s5911_s27, %s5911_s27 }
   0xa   :  { %p5918_p6 = por %p5917_p5, %p5916_p4 }
   0xc   :  { %p5919_p7 = pnand %p5918_p6, %p5912_p3 }
   0xe   :  { %5922 = shalt.err (!%p5919_p7)
}
   0xf   :  { %s5926_s28 = smov 128   ;;  %s5927_s29 = smov 8  }
  0x10   :  { %22 = dma.hbm_to_vmem [thread:$0]  %s7863_s0, 2048, %s17_s19, [#allocation3], %s5926_s28, %s5926_s28, %s5927_s29  }
  0x11   :  { %5923 = dma.done.wait [#allocation3], 2048  }
  0x12   :  { %5924 = vsyncadd [#allocation3], 4294965248  ;;  %v7869_v0 = vmov 0.0   ;;  %v51_v1 = vld [vmem:[%s7864_s1 + $0x8] sm:$0xff]  ;;  %v53_v2 = vld [vmem:[%s7864_s1 + $0x18] sm:$0xff]  ;;  %vm58_vm0 = vcmask 261120  }
  0x13   :  { %171 = vmatprep.mubr.f32.mxu0 %v7869_v0  ;;  %237 = vmatprep.mubr.f32.mxu1 %v7869_v0  ;;  %v50_v3 = vld [vmem:[%s7864_s1] sm:$0xff]  ;;  %v5194_v4 = vpack.c.bf16 %v53_v2, %v51_v1  ;;  %v52_v5 = vld [vmem:[%s7864_s1 + $0x10] sm:$0xff]  ;;  %v55_v6 = vld [vmem:[%s7864_s1 + $0x28] sm:$0xff]  ;;  %v7871_v21 = vmov 0.0|0.0   ;;  %vm5931_vm1 = vmmov 0   ;;  %vm333_vm2 = vcmask 523264  }
  0x14   :  { %v57_v7 = vld [vmem:[%s7864_s1 + $0x38] sm:$0xff]  ;;  %v5196_v8 = vpack.c.bf16 %v52_v5, %v50_v3  ;;  %v54_v10 = vld [vmem:[%s7864_s1 + $0x20] sm:$0xff]  ;;  %v56_v11 = vld [vmem:[%s7864_s1 + $0x30] sm:$0xff]  ;;  %s5930_s1 = smov 64   ;;  %vm455_vm3 = vcmask 130048   ;;  %s5932_s7 = smov 112  }
  0x15   :  { %v5198_v9 = vpack.c.bf16 %v57_v7, %v55_v6  ;;  %5195 = vmatprep.subr.bf16.mxu0 %v5194_v4  ;;  %5402 = vmatprep.subr.bf16.mxu1 %v5194_v4  ;;  %v5200_v12 = vpack.c.bf16 %v56_v11, %v54_v10  ;;  %v34_v13 = vld [vmem:[#allocation2] sm:$0xff]  ;;  %v35_v14 = vld [vmem:[#allocation2 + $0x8] sm:$0xff]  ;;  %v36_v15 = vld [vmem:[#allocation2 + $0x10] sm:$0xff]  ;;  %s5933_s8 = smov 48   ;;  %vm608_vm6 = vcmask 326656   ;;  %s5935_s9 = smov 96  }
  0x16   :  { %5197 = vmatpush1.bf16.msra.mxu0 %v5196_v8  ;;  %5404 = vmatpush1.bf16.msra.mxu1 %v5196_v8  ;;  %v37_v16 = vld [vmem:[#allocation2 + $0x18] sm:$0xff]  ;;  %v38_v17 = vld [vmem:[#allocation2 + $0x20] sm:$0xff]  ;;  %v39_v18 = vld [vmem:[#allocation2 + $0x28] sm:$0xff]  ;;  %s5936_s10 = smov 32   ;;  %s5937_s11 = smov 80   ;;  %vm2168_vm7 = vcmask 392192  }
  0x17   :  { %5199 = vmatprep.subr.bf16.mxu0 %v5198_v9  ;;  %5403 = vmatprep.subr.bf16.mxu1 %v5198_v9  ;;  %v40_v19 = vld [vmem:[#allocation2 + $0x30] sm:$0xff]  ;;  %v41_v20 = vld [vmem:[#allocation2 + $0x38] sm:$0xff]  ;;  %v46_v31 = vld [vmem:[#allocation2 + $0x60] sm:$0xff]  ;;  %s5938_s12 = smov 16  }
  0x18   :  { %v45_v22 = vld [vmem:[#allocation2 + $0x58] sm:$0xff]  ;;  %v47_v35 = vld [vmem:[#allocation2 + $0x68] sm:$0xff]  ;;  %v48_v39 = vld [vmem:[#allocation2 + $0x70] sm:$0xff] }
  0x19   :  { %v49_v43 = vld [vmem:[#allocation2 + $0x78] sm:$0xff]  ;;  %vm6144_vm4 = vmpackc.low %vm455_vm3, %vm455_vm3 }
  0x1a   :  { %5201 = vmatpush1.bf16.msra.mxu0 %v5200_v12  ;;  %5405 = vmatpush1.bf16.msra.mxu1 %v5200_v12 }
  0x1b   :  { %5202 = vmatprep.subr.bf16.mxu1 %v7871_v21 }
  0x1d   :  { %4271 = vmatmul.mubr.msk.f32.vlgmr.msra.gmra.mrb[0].mxu0 %vm58_vm0, %v34_v13  ;;  %4282 = vmatmul.mubr.msk.f32.vlgmr.msra.gmra.mrb[0].mxu1 %vm58_vm0, %v45_v22 }
  0x1e   :  { %177 = vmatprep.mubr.f32.mxu0 %v7869_v0  ;;  %243 = vmatprep.mubr.f32.mxu1 %v7869_v0 }
  0x21   :  { %4272 = vmatmul.mubr.msk.f32.gmra.mrb[2].mxu0 %vm58_vm0, %v35_v14  ;;  %4283 = vmatmul.mubr.msk.f32.gmra.mrb[2].mxu1 %vm58_vm0, %v46_v31  ;;  %v271_v31 = vld [vmem:[%s7865_s2 + $0x18] sm:$0xff] }
  0x22   :  { %183 = vmatprep.mubr.f32.mxu0 %v7869_v0  ;;  %249 = vmatprep.mubr.f32.mxu1 %v7869_v0 }
  0x25   :  { %4273 = vmatmul.mubr.msk.f32.gmra.mrb[4].mxu0 %vm58_vm0, %v36_v15  ;;  %4284 = vmatmul.mubr.msk.f32.gmra.mrb[4].mxu1 %vm58_vm0, %v47_v35 }
  0x26   :  { %189 = vmatprep.mubr.f32.mxu0 %v7869_v0  ;;  %255 = vmatprep.mubr.f32.mxu1 %v7869_v0 }
  0x29   :  { %4274 = vmatmul.mubr.msk.f32.gmra.mrb[6].mxu0 %vm58_vm0, %v37_v16  ;;  %4285 = vmatmul.mubr.msk.f32.gmra.mrb[6].mxu1 %vm58_vm0, %v48_v39 }
  0x2a   :  { %195 = vmatprep.mubr.f32.mxu0 %v7869_v0  ;;  %261 = vmatprep.mubr.f32.mxu1 %v7869_v0 }
  0x2d   :  { %4275 = vmatmul.mubr.msk.f32.gmra.mrb[8].mxu0 %vm58_vm0, %v38_v17  ;;  %4286 = vmatmul.mubr.msk.f32.gmra.mrb[8].mxu1 %vm58_vm0, %v49_v43 }
  0x2e   :  { %201 = vmatprep.mubr.f32.mxu0 %v7869_v0  ;;  %4756 = vmatprep.mubr.msk.f32.mxu1 %vm5931_vm1, %v7869_v0 }
  0x31   :  { %4276 = vmatmul.mubr.msk.f32.gmra.mrb[10].mxu0 %vm58_vm0, %v39_v18 }
  0x32   :  { %207 = vmatprep.mubr.f32.mxu0 %v7869_v0 }
  0x35   :  { %4277 = vmatmul.mubr.msk.f32.gmra.mrb[12].mxu0 %vm58_vm0, %v40_v19 }
  0x36   :  { %213 = vmatprep.mubr.f32.mxu0 %v7869_v0 }
  0x39   :  { %4278 = vmatmul.mubr.msk.f32.gmra.mrb[14].mxu0 %vm58_vm0, %v41_v20 }
  0x3a   :  { %219 = vmatprep.mubr.f32.mxu0 %v7869_v0 }
  0xf0   :  { %v6024_v23 = vpop.f32.mrb[0].mxu0 }
  0xf1   :  { %v175_v24 = vpop.f32.mrb[1].mxu0 }
  0xf2   :  { %v5420_v25 = vpack.i.bf16 %v175_v24, %v6024_v23 }
  0xf4   :  { %5421 = vrot.lane.b32.xlu0 %v5420_v25, %s5930_s1  ;;  %v6030_v26 = vpop.f32.mrb[2].mxu0 }
  0xf5   :  { %v181_v27 = vpop.f32.mrb[3].mxu0 }
  0xf6   :  { %v5425_v28 = vpack.i.bf16 %v181_v27, %v6030_v26  ;;  %v268_v27 = vld [vmem:[%s7865_s2] sm:$0xff] }
  0xf8   :  { %5426 = vrot.lane.b32.xlu0 %v5425_v28, %s5930_s1  ;;  %v6034_v29 = vpop.f32.mrb[4].mxu0  ;;  %v269_v28 = vld [vmem:[%s7865_s2 + $0x8] sm:$0xff] }
  0xf9   :  { %v187_v30 = vpop.f32.mrb[5].mxu0 }
  0xfa   :  { %v5430_v32 = vpack.i.bf16 %v187_v30, %v6034_v29  ;;  %v270_v30 = vld [vmem:[%s7865_s2 + $0x10] sm:$0xff] }
  0xfc   :  { %5431 = vrot.lane.b32.xlu1 %v5430_v32, %s5930_s1  ;;  %v6040_v33 = vpop.f32.mrb[6].mxu0  ;;  %v272_v32 = vld [vmem:[%s7865_s2 + $0x20] sm:$0xff] }
  0xfd   :  { %v193_v34 = vpop.f32.mrb[7].mxu0 }
  0xfe   :  { %v5435_v36 = vpack.i.bf16 %v193_v34, %v6040_v33  ;;  %v6108_v34 = vpop.f32.mrb[0].mxu1 }
  0xff   :  { %v6110_v35 = vpop.f32.mrb[1].mxu1 }
 0x100   :  { %5436 = vrot.lane.b32.xlu1 %v5435_v36, %s5930_s1  ;;  %v6046_v37 = vpop.f32.mrb[8].mxu0 }
 0x101   :  { %v199_v38 = vpop.f32.mrb[9].mxu0 }
 0x102   :  { %v5440_v40 = vpack.i.bf16 %v199_v38, %v6046_v37  ;;  %v6114_v38 = vpop.f32.mrb[2].mxu1 }
 0x103   :  { %v6116_v39 = vpop.f32.mrb[3].mxu1 }
 0x104   :  { %5441 = vrot.lane.b32.xlu0 %v5440_v40, %s5930_s1  ;;  %v6052_v41 = vpop.f32.mrb[10].mxu0 }
 0x105   :  { %v205_v42 = vpop.f32.mrb[11].mxu0 }
 0x106   :  { %v5445_v44 = vpack.i.bf16 %v205_v42, %v6052_v41  ;;  %v6120_v42 = vpop.f32.mrb[4].mxu1 }
 0x107   :  { %v6122_v43 = vpop.f32.mrb[5].mxu1 }
 0x108   :  { %5446 = vrot.lane.b32.xlu1 %v5445_v44, %s5930_s1  ;;  %v6057_v45 = vpop.f32.mrb[12].mxu0 }
 0x109   :  { %v211_v46 = vpop.f32.mrb[13].mxu0 }
 0x10a   :  { %v5450_v47 = vpack.i.bf16 %v211_v46, %v6057_v45  ;;  %v6126_v46 = vpop.f32.mrb[6].mxu1 }
 0x10c   :  { %5451 = vrot.lane.b32.xlu0 %v5450_v47, %s5930_s1  ;;  %v6063_v48 = vpop.f32.mrb[14].mxu0  ;;  %v6128_v47 = vpop.f32.mrb[7].mxu1 }
 0x10d   :  { %v217_v49 = vpop.f32.mrb[15].mxu0 }
 0x10e   :  { %v5455_v50 = vpack.i.bf16 %v217_v49, %v6063_v48 }
 0x110   :  { %5456 = vrot.lane.b32.xlu1 %v5455_v50, %s5930_s1  ;;  %v6132_v50 = vpop.f32.mrb[8].mxu1 }
 0x166   :  { %v5422_v51 = vpop.permute.xlu0 %5421 }
 0x167   :  { %v5424_v52 = vunpack.i.h.bf16 %v5422_v51  ;;  %v5423_v53 = vunpack.i.l.bf16 %v5422_v51  ;;  %v6134_v51 = vpop.f32.mrb[9].mxu1 }
 0x169   :  { %v334_v57 = vsel %vm333_vm2, %v5423_v53, %v5424_v52  ;;  %v42_v53 = vld [vmem:[#allocation2 + $0x40] sm:$0xff] }
 0x16a   :  { %v5427_v54 = vpop.permute.xlu0 %5426  ;;  %4279 = vmatmul.mubr.msk.f32.gmra.mrb[16].mxu0 %vm58_vm0, %v42_v53 }
 0x16b   :  { %v5429_v55 = vunpack.i.h.bf16 %v5427_v54  ;;  %v5428_v56 = vunpack.i.l.bf16 %v5427_v54  ;;  %225 = vmatprep.mubr.f32.mxu0 %v7869_v0  ;;  %v43_v54 = vld [vmem:[#allocation2 + $0x48] sm:$0xff] }
 0x16d   :  { %v335_v58 = vsel %vm333_vm2, %v5428_v56, %v5429_v55 }
 0x16e   :  { %v5432_v59 = vpop.permute.xlu1 %5431  ;;  %v5203_v60 = vpack.c.bf16 %v335_v58, %v334_v57  ;;  %4280 = vmatmul.mubr.msk.f32.gmra.mrb[18].mxu0 %vm58_vm0, %v43_v54 }
 0x16f   :  { %v5434_v61 = vunpack.i.h.bf16 %v5432_v59  ;;  %v5433_v62 = vunpack.i.l.bf16 %v5432_v59  ;;  %231 = vmatprep.mubr.f32.mxu0 %v7869_v0  ;;  %v44_v59 = vld [vmem:[#allocation2 + $0x50] sm:$0xff] }
 0x170   :  { %5204 = vmatpush3.bf16.msra.mxu1 %v5203_v60 }
 0x171   :  { %5205 = vmatprep.subr.bf16.mxu1 %v7871_v21  ;;  %v336_v3 = vsel %vm333_vm2, %v5433_v62, %v5434_v61 }
 0x172   :  { %v5437_v63 = vpop.permute.xlu1 %5436  ;;  %4281 = vmatmul.mubr.msk.f32.gmra.mrb[20].mxu0 %vm58_vm0, %v44_v59 }
 0x173   :  { %v5439_v1 = vunpack.i.h.bf16 %v5437_v63  ;;  %v5438_v2 = vunpack.i.l.bf16 %v5437_v63 }
 0x175   :  { %v337_v4 = vsel %vm333_vm2, %v5438_v2, %v5439_v1 }
 0x176   :  { %v5442_v5 = vpop.permute.xlu0 %5441  ;;  %v5206_v6 = vpack.c.bf16 %v337_v4, %v336_v3 }
 0x177   :  { %v5444_v7 = vunpack.i.h.bf16 %v5442_v5  ;;  %v5443_v8 = vunpack.i.l.bf16 %v5442_v5 }
 0x178   :  { %5207 = vmatpush3.bf16.msra.mxu1 %v5206_v6 }
 0x179   :  { %5208 = vmatprep.subr.bf16.mxu1 %v7871_v21  ;;  %v338_v12 = vsel %vm333_vm2, %v5443_v8, %v5444_v7 }
 0x17a   :  { %v5447_v9 = vpop.permute.xlu1 %5446 }
 0x17b   :  { %v5449_v10 = vunpack.i.h.bf16 %v5447_v9  ;;  %v5448_v11 = vunpack.i.l.bf16 %v5447_v9 }
 0x17d   :  { %v339_v13 = vsel %vm333_vm2, %v5448_v11, %v5449_v10 }
 0x17e   :  { %v5452_v14 = vpop.permute.xlu0 %5451  ;;  %v5209_v15 = vpack.c.bf16 %v339_v13, %v338_v12 }
 0x17f   :  { %v5454_v16 = vunpack.i.h.bf16 %v5452_v14  ;;  %v5453_v17 = vunpack.i.l.bf16 %v5452_v14 }
 0x180   :  { %5210 = vmatpush3.bf16.msra.mxu1 %v5209_v15 }
 0x181   :  { %5211 = vmatprep.subr.bf16.mxu1 %v7871_v21  ;;  %v340_v22 = vsel %vm333_vm2, %v5453_v17, %v5454_v16 }
 0x182   :  { %v5457_v18 = vpop.permute.xlu1 %5456 }
 0x183   :  { %v5459_v19 = vunpack.i.h.bf16 %v5457_v18  ;;  %v5458_v20 = vunpack.i.l.bf16 %v5457_v18 }
 0x185   :  { %v341_v24 = vsel %vm333_vm2, %v5458_v20, %v5459_v19 }
 0x186   :  { %v5212_v25 = vpack.c.bf16 %v341_v24, %v340_v22 }
 0x188   :  { %5213 = vmatpush3.bf16.msra.mxu1 %v5212_v25 }
 0x18b   :  { %4757 = vmatmul.mubr.msk.f32.vlgmr.msra.gmra.mrb[10].mxu1 %vm333_vm2, %v268_v27 }
 0x18c   :  { %4759 = vmatprep.mubr.msk.f32.mxu1 %vm5931_vm1, %v7869_v0 }
 0x18f   :  { %4760 = vmatmul.mubr.msk.f32.gmra.mrb[12].mxu1 %vm333_vm2, %v269_v28 }
 0x190   :  { %4762 = vmatprep.mubr.msk.f32.mxu1 %vm5931_vm1, %v7869_v0 }
 0x193   :  { %4763 = vmatmul.mubr.msk.f32.gmra.mrb[14].mxu1 %vm333_vm2, %v270_v30 }
 0x194   :  { %4765 = vmatprep.mubr.msk.f32.mxu1 %vm5931_vm1, %v7869_v0 }
 0x197   :  { %4766 = vmatmul.mubr.msk.f32.gmra.mrb[16].mxu1 %vm333_vm2, %v271_v31 }
 0x198   :  { %4768 = vmatprep.mubr.msk.f32.mxu1 %vm5931_vm1, %v7869_v0 }
 0x19b   :  { %4769 = vmatmul.mubr.msk.f32.gmra.mrb[18].mxu1 %vm333_vm2, %v272_v32 }
 0x19c   :  { %4781 = vmatprep.mubr.msk.f32.mxu1 %vm455_vm3, %v6024_v23 }
 0x25e   :  { %v431_v55 = vpop.f32.mrb[10].mxu1 }
 0x25f   :  { %v4758_v56 = vpop.f32.mrb[11].mxu1 }
 0x262   :  { %v436_v57 = vpop.f32.mrb[12].mxu1 }
 0x263   :  { %v4761_v60 = vpop.f32.mrb[13].mxu1  ;;  %v6148_v61 = vpack.i.bf16 %v436_v57, %v431_v55  ;;  %v5214_v62 = vpack.c.bf16 %v436_v57, %v431_v55 }
 0x265   :  { %5461 = vrot.lane.b32.xlu0 %v6148_v61, %s5932_s7  ;;  %5216 = vmatprep.subr.msk.bf16.mxu1 %vm6144_vm4, %v5214_v62 }
 0x266   :  { %5219 = vmatpush3.bf16.xpose.msk.msra.mxu1 %vm6144_vm4, %v5214_v62  ;;  %v441_v63 = vpop.f32.mrb[14].mxu1 }
 0x267   :  { %v4764_v1 = vpop.f32.mrb[15].mxu1 }
 0x26a   :  { %v446_v2 = vpop.f32.mrb[16].mxu1 }
 0x26b   :  { %v6157_v3 = vpack.i.bf16 %v446_v2, %v441_v63  ;;  %v4767_v4 = vpop.f32.mrb[17].mxu1  ;;  %v5220_v5 = vpack.c.bf16 %v446_v2, %v441_v63  ;;  %v6236_v2 = vpop.f32.mrb[16].mxu0 }
 0x26c   :  { %v6238_v4 = vpop.f32.mrb[17].mxu0 }
 0x26d   :  { %5466 = vrot.lane.b32.xlu1 %v6157_v3, %s5932_s7  ;;  %5222 = vmatprep.subr.msk.bf16.mxu1 %vm6144_vm4, %v5220_v5 }
 0x26e   :  { %v6163_v6 = vpop.f32.mrb[18].mxu1  ;;  %5225 = vmatpush3.bf16.xpose.msk.msra.mxu1 %vm6144_vm4, %v5220_v5 }
 0x26f   :  { %865 = vrot.lane.b32.xlu0 %v6163_v6, %s5932_s7  ;;  %4779 = vmatprep.subr.msk.mxu1 %vm455_vm3, %v6163_v6  ;;  %v4770_v7 = vpop.f32.mrb[19].mxu1 }
 0x270   :  { %v6242_v7 = vpop.f32.mrb[18].mxu0 }
 0x271   :  { %841 = vrot.lane.b32.xlu1 %v6024_v23, %s5932_s7 }
 0x273   :  { %843 = vrot.lane.b32.xlu0 %v6030_v26, %s5932_s7 }
 0x275   :  { %845 = vrot.lane.b32.xlu1 %v6034_v29, %s5932_s7 }
 0x276   :  { %4780 = vmatpush3.xpose.msk.msra.mxu1 %vm455_vm3, %v6163_v6 }
 0x277   :  { %847 = vrot.lane.b32.xlu0 %v6040_v33, %s5932_s7 }
 0x279   :  { %849 = vrot.lane.b32.xlu1 %v6046_v37, %s5932_s7  ;;  %4782 = vmatmul.mubr.msk.f32.vlgmr.msra.gmra.mrb[20].mxu1 %vm455_vm3, %v6030_v26 }
 0x27a   :  { %4784 = vmatprep.mubr.msk.f32.mxu1 %vm455_vm3, %v6034_v29 }
 0x27b   :  { %851 = vrot.lane.b32.xlu0 %v6052_v41, %s5932_s7 }
 0x27d   :  { %853 = vrot.lane.b32.xlu1 %v6057_v45, %s5932_s7  ;;  %4785 = vmatmul.mubr.msk.f32.gmra.mrb[22].mxu1 %vm455_vm3, %v6040_v33 }
 0x27e   :  { %4787 = vmatprep.mubr.msk.f32.mxu1 %vm455_vm3, %v6046_v37 }
 0x27f   :  { %855 = vrot.lane.b32.xlu0 %v6063_v48, %s5932_s7 }
 0x281   :  { %5476 = vrot.lane.b32.xlu1 %v6157_v3, %s5930_s1  ;;  %4788 = vmatmul.mubr.msk.f32.gmra.mrb[24].mxu1 %vm455_vm3, %v6052_v41 }
 0x282   :  { %4790 = vmatprep.mubr.msk.f32.mxu1 %vm455_vm3, %v6057_v45 }
 0x283   :  { %5471 = vrot.lane.b32.xlu0 %v6148_v61, %s5930_s1 }
 0x285   :  { %5486 = vrot.lane.b32.xlu1 %v6157_v3, %s5933_s8  ;;  %4791 = vmatmul.mubr.msk.f32.gmra.mrb[26].mxu1 %vm455_vm3, %v6063_v48 }
 0x287   :  { %5481 = vrot.lane.b32.xlu0 %v6148_v61, %s5933_s8 }
 0x289   :  { %689 = vrot.lane.b32.xlu1 %v6163_v6, %s5930_s1 }
 0x2d7   :  { %v5462_v8 = vpop.permute.xlu0 %5461 }
 0x2d8   :  { %v5464_v9 = vunpack.i.h.bf16 %v5462_v8  ;;  %v5463_v10 = vunpack.i.l.bf16 %v5462_v8  ;;  %v6244_v8 = vpop.f32.mrb[19].mxu0 }
 0x2da   :  { %v5234_v11 = vpack.c.bf16 %v5464_v9, %v5463_v10  ;;  %v6248_v10 = vpop.f32.mrb[20].mxu0 }
 0x2dc   :  { %5236 = vmatprep.subr.msk.bf16.mxu0 %vm6144_vm4, %v5234_v11 }
 0x2dd   :  { %5239 = vmatpush3.bf16.xpose.msk.msra.mxu0 %vm6144_vm4, %v5234_v11  ;;  %v6250_v11 = vpop.f32.mrb[21].mxu0 }
 0x2df   :  { %v5467_v12 = vpop.permute.xlu1 %5466 }
 0x2e0   :  { %v5469_v13 = vunpack.i.h.bf16 %v5467_v12  ;;  %v5468_v14 = vunpack.i.l.bf16 %v5467_v12 }
 0x2e1   :  { %v866_v15 = vpop.permute.xlu0 %865 }
 0x2e2   :  { %v5240_v16 = vpack.c.bf16 %v5469_v13, %v5468_v14  ;;  %v281_v13 = vlaneseq }
 0x2e3   :  { %v842_v17 = vpop.permute.xlu1 %841 }
 0x2e4   :  { %5242 = vmatprep.subr.msk.bf16.mxu0 %vm6144_vm4, %v5240_v16  ;;  %4825 = vmatprep.mubr.msk.f32.mxu0 %vm455_vm3, %v842_v17  ;;  %v282_v14 = vand.u32 127, %v281_v13 }
 0x2e5   :  { %5245 = vmatpush3.bf16.xpose.msk.msra.mxu0 %vm6144_vm4, %v5240_v16  ;;  %v844_v18 = vpop.permute.xlu0 %843  ;;  %v5934_v16 = vmov -1e+30  }
 0x2e6   :  { %4823 = vmatprep.subr.msk.mxu0 %vm455_vm3, %v866_v15  ;;  %vm283_vm5 = vcmp.lt.s32.totalorder %v282_v14, 35 }
 0x2e7   :  { %v846_v19 = vpop.permute.xlu1 %845  ;;  %v6254_v17 = vsel %vm283_vm5, 0.0, %v5934_v16 }
 0x2e9   :  { %v848_v20 = vpop.permute.xlu0 %847 }
 0x2eb   :  { %v850_v22 = vpop.permute.xlu1 %849 }
 0x2ed   :  { %4824 = vmatpush3.xpose.msk.msra.mxu0 %vm455_vm3, %v866_v15  ;;  %v852_v24 = vpop.permute.xlu0 %851 }
 0x2ef   :  { %v854_v25 = vpop.permute.xlu1 %853 }
 0x2f0   :  { %4826 = vmatmul.mubr.msk.f32.vlgmr.msra.gmra.mrb[22].mxu0 %vm455_vm3, %v844_v18 }
 0x2f1   :  { %4828 = vmatprep.mubr.msk.f32.mxu0 %vm455_vm3, %v846_v19  ;;  %v856_v27 = vpop.permute.xlu0 %855 }
 0x2f3   :  { %v5477_v28 = vpop.permute.xlu1 %5476 }
 0x2f4   :  { %4829 = vmatmul.mubr.msk.f32.gmra.mrb[24].mxu0 %vm455_vm3, %v848_v20  ;;  %v5479_v31 = vunpack.i.h.bf16 %v5477_v28  ;;  %v5478_v32 = vunpack.i.l.bf16 %v5477_v28 }
 0x2f5   :  { %4831 = vmatprep.mubr.msk.f32.mxu0 %vm455_vm3, %v850_v22  ;;  %v5472_v30 = vpop.permute.xlu0 %5471 }
 0x2f6   :  { %v5474_v53 = vunpack.i.h.bf16 %v5472_v30  ;;  %v5473_v54 = vunpack.i.l.bf16 %v5472_v30  ;;  %v5230_v57 = vpack.c.bf16 %v5479_v31, %v5478_v32 }
 0x2f7   :  { %v6229_v56 = vpop.permute.xlu1 %5486 }
 0x2f8   :  { %4832 = vmatmul.mubr.msk.f32.gmra.mrb[26].mxu0 %vm455_vm3, %v852_v24  ;;  %v5226_v55 = vpack.c.bf16 %v5474_v53, %v5473_v54 }
 0x2f9   :  { %4834 = vmatprep.mubr.msk.f32.mxu0 %vm455_vm3, %v854_v25  ;;  %v5482_v59 = vpop.permute.xlu0 %5481 }
 0x2fa   :  { %5227 = vmatprep.subr.bf16.mxu1 %v5226_v55  ;;  %v5484_v60 = vunpack.i.h.bf16 %v5482_v59  ;;  %v5483_v62 = vunpack.i.l.bf16 %v5482_v59 }
 0x2fb   :  { %5229 = vmatpush3.bf16.msra.mxu1 %v5226_v55  ;;  %v690_v63 = vpop.permute.xlu1 %689 }
 0x2fc   :  { %5231 = vmatprep.subr.bf16.mxu1 %v5230_v57  ;;  %4835 = vmatmul.mubr.msk.f32.gmra.mrb[28].mxu0 %vm455_vm3, %v856_v27  ;;  %v6233_v1 = vpack.c.bf16 %v5484_v60, %v5483_v62 }
 0x2ff   :  { %5233 = vmatpush3.bf16.msra.mxu1 %v5230_v57 }
 0x300   :  { %4801 = vmatprep.subr.mxu1 %v690_v63 }
 0x303   :  { %4802 = vmatpush3.msra.mxu1 %v690_v63 }
 0x304   :  { %5247 = vmatprep.subr.bf16.mxu1 %v6233_v1 }
 0x34c   :  { %v4783_v15 = vpop.f32.mrb[20].mxu1 }
 0x34d   :  { %v593_v18 = vmul.f32 0.25, %v4783_v15  ;;  %v553_v19 = vpop.f32.mrb[21].mxu1 }
 0x34e   :  { %v592_v20 = vmul.f32 0.25, %v553_v19 }
 0x34f   :  { %v6257_v22 = vadd.f32 %v593_v18, %v6254_v17 }
 0x350   :  { %v4786_v24 = vpop.f32.mrb[22].mxu1  ;;  %v6260_v25 = vadd.f32 %v592_v20, %v6254_v17 }
 0x351   :  { %v595_v27 = vmul.f32 0.25, %v4786_v24  ;;  %v563_v28 = vpop.f32.mrb[23].mxu1  ;;  %v612_v30 = vsel %vm608_vm6, %v6257_v22, -inf }
 0x352   :  { %v594_v31 = vmul.f32 0.25, %v563_v28  ;;  %613 = vmax.xlane.f32.xlu0 %v612_v30  ;;  %v609_v32 = vsel %vm608_vm6, %v6260_v25, -inf }
 0x353   :  { %610 = vmax.xlane.f32.xlu1 %v609_v32  ;;  %v6267_v53 = vadd.f32 %v595_v27, %v6254_v17 }
 0x354   :  { %v4789_v54 = vpop.f32.mrb[24].mxu1  ;;  %v6270_v55 = vadd.f32 %v594_v31, %v6254_v17 }
 0x355   :  { %v597_v57 = vmul.f32 0.25, %v4789_v54  ;;  %v573_v59 = vpop.f32.mrb[25].mxu1  ;;  %v618_v60 = vsel %vm608_vm6, %v6267_v53, -inf }
 0x356   :  { %v596_v62 = vmul.f32 0.25, %v573_v59  ;;  %v615_v63 = vsel %vm608_vm6, %v6270_v55, -inf }
 0x357   :  { %619 = vmax.xlane.f32.xlu1 %v618_v60  ;;  %616 = vmax.xlane.f32.xlu0 %v615_v63  ;;  %v6277_v13 = vadd.f32 %v597_v57, %v6254_v17 }
 0x358   :  { %v4792_v14 = vpop.f32.mrb[26].mxu1  ;;  %v6280_v15 = vadd.f32 %v596_v62, %v6254_v17 }
 0x359   :  { %v599_v16 = vmul.f32 0.25, %v4792_v14  ;;  %v583_v18 = vpop.f32.mrb[27].mxu1  ;;  %v624_v19 = vsel %vm608_vm6, %v6277_v13, -inf }
 0x35a   :  { %v598_v20 = vmul.f32 0.25, %v583_v18  ;;  %v621_v24 = vsel %vm608_vm6, %v6280_v15, -inf }
 0x35b   :  { %625 = vmax.xlane.f32.xlu1 %v624_v19  ;;  %622 = vmax.xlane.f32.xlu0 %v621_v24  ;;  %v6287_v27 = vadd.f32 %v599_v16, %v6254_v17 }
 0x35c   :  { %v6290_v28 = vadd.f32 %v598_v20, %v6254_v17 }
 0x35d   :  { %v630_v30 = vsel %vm608_vm6, %v6287_v27, -inf }
 0x35e   :  { %v627_v31 = vsel %vm608_vm6, %v6290_v28, -inf }
 0x35f   :  { %631 = vmax.xlane.f32.xlu1 %v630_v30  ;;  %628 = vmax.xlane.f32.xlu0 %v627_v31 }
 0x3c3   :  { %v4827_v32 = vpop.f32.mrb[22].mxu0 }
 0x3c4   :  { %v999_v54 = vmul.f32 0.25, %v4827_v32  ;;  %v959_v57 = vpop.f32.mrb[23].mxu0 }
 0x3c5   :  { %v998_v59 = vmul.f32 0.25, %v959_v57 }
 0x3c6   :  { %v6297_v60 = vadd.f32 %v999_v54, %v6254_v17 }
 0x3c7   :  { %v4830_v62 = vpop.f32.mrb[24].mxu0  ;;  %v6300_v63 = vadd.f32 %v998_v59, %v6254_v17 }
 0x3c8   :  { %v1001_v14 = vmul.f32 0.25, %v4830_v62  ;;  %v969_v16 = vpop.f32.mrb[25].mxu0  ;;  %v1017_v18 = vsel %vm608_vm6, %v6297_v60, -inf }
 0x3c9   :  { %v1000_v19 = vmul.f32 0.25, %v969_v16  ;;  %1018 = vmax.xlane.f32.xlu1 %v1017_v18  ;;  %v1014_v20 = vsel %vm608_vm6, %v6300_v63, -inf }
 0x3ca   :  { %1015 = vmax.xlane.f32.xlu0 %v1014_v20  ;;  %v6307_v24 = vadd.f32 %v1001_v14, %v6254_v17 }
 0x3cb   :  { %v4833_v30 = vpop.f32.mrb[26].mxu0  ;;  %v6310_v31 = vadd.f32 %v1000_v19, %v6254_v17 }
 0x3cc   :  { %v1003_v32 = vmul.f32 0.25, %v4833_v30  ;;  %v979_v54 = vpop.f32.mrb[27].mxu0  ;;  %v1023_v57 = vsel %vm608_vm6, %v6307_v24, -inf }
 0x3cd   :  { %v1002_v59 = vmul.f32 0.25, %v979_v54  ;;  %v1020_v62 = vsel %vm608_vm6, %v6310_v31, -inf }
 0x3ce   :  { %1024 = vmax.xlane.f32.xlu0 %v1023_v57  ;;  %1021 = vmax.xlane.f32.xlu1 %v1020_v62  ;;  %v6317_v16 = vadd.f32 %v1003_v32, %v6254_v17 }
 0x3cf   :  { %v4836_v14 = vpop.f32.mrb[28].mxu0  ;;  %v6324_v30 = vadd.f32 %v1002_v59, %v6254_v17 }
 0x3d0   :  { %v6319_v18 = vpop.f32.mrb[29].mxu0  ;;  %v1029_v19 = vsel %vm608_vm6, %v6317_v16, -inf  ;;  %v1005_v20 = vmul.f32 0.25, %v4836_v14 }
 0x3d1   :  { %v1026_v54 = vsel %vm608_vm6, %v6324_v30, -inf }
 0x3d2   :  { %1030 = vmax.xlane.f32.xlu0 %v1029_v19  ;;  %v6329_v57 = vadd.f32 %v1005_v20, %v6254_v17 }
 0x3d4   :  { %v1035_v32 = vsel %vm608_vm6, %v6329_v57, -inf }
 0x3d6   :  { %1027 = vmax.xlane.f32.xlu0 %v1026_v54 }
 0x3da   :  { %1036 = vmax.xlane.f32.xlu0 %v1035_v32 }
 0x3df   :  { %v614_v62 = vpop.xlane.xlu0 %613  ;;  %5491 = vrot.lane.b32.xlu1 %v6148_v61, %s5935_s9 }
 0x3e0   :  { %v634_v59 = vsub.f32 %v6257_v22, %v614_v62  ;;  %v611_v14 = vpop.xlane.xlu1 %610 }
 0x3e1   :  { %v633_v19 = vsub.f32 %v6260_v25, %v611_v14 }
 0x3e2   :  { %v643_v0 = vmul.f32 1.442695, %v634_v59 }
 0x3e3   :  { %v641_v52 = vmul.f32 1.442695, %v633_v19  ;;  %5496 = vrot.lane.b32.xlu1 %v6157_v3, %s5935_s9 }
 0x3e4   :  { %v620_v20 = vpop.xlane.xlu1 %619  ;;  %v617_v54 = vpop.xlane.xlu0 %616 }
 0x3e5   :  { %5640 = vpow2.f32 %v641_v52  ;;  %v636_v32 = vsub.f32 %v6267_v53, %v620_v20  ;;  %v635_v49 = vsub.f32 %v6270_v55, %v617_v54  ;;  %v5489_v53 = vunpack.i.h.bf16 %v6229_v56 }
 0x3e6   :  { %5642 = vpow2.f32 %v643_v0  ;;  %v5488_v0 = vunpack.i.l.bf16 %v6229_v56 }
 0x3e7   :  { %v647_v21 = vmul.f32 1.442695, %v636_v32  ;;  %v645_v44 = vmul.f32 1.442695, %v635_v49  ;;  %1270 = vrot.lane.b32.xlu1 %v6163_v6, %s5935_s9 }
 0x3e8   :  { %v626_v22 = vpop.xlane.xlu1 %625  ;;  %v623_v25 = vpop.xlane.xlu0 %622 }
 0x3e9   :  { %5644 = vpow2.f32 %v647_v21  ;;  %v638_v62 = vsub.f32 %v6277_v13, %v626_v22  ;;  %v637_v59 = vsub.f32 %v6280_v15, %v623_v25  ;;  %v1004_v25 = vmul.f32 0.25, %v6319_v18 }
 0x3ea   :  { %5646 = vpow2.f32 %v645_v44  ;;  %v5250_v44 = vpack.c.bf16 %v5489_v53, %v5488_v0 }
 0x3eb   :  { %v651_v14 = vmul.f32 1.442695, %v638_v62  ;;  %v649_v52 = vmul.f32 1.442695, %v637_v59  ;;  %v6394_v62 = vadd.f32 %v1004_v25, %v6254_v17 }
 0x3ec   :  { %v632_v19 = vpop.xlane.xlu1 %631  ;;  %v629_v55 = vpop.xlane.xlu0 %628 }
 0x3ed   :  { %5648 = vpow2.f32 %v651_v14  ;;  %v640_v49 = vsub.f32 %v6287_v27, %v632_v19  ;;  %v639_v20 = vsub.f32 %v6290_v28, %v629_v55  ;;  %v1032_v59 = vsel %vm608_vm6, %v6394_v62, -inf }
 0x3ee   :  { %5650 = vpow2.f32 %v649_v52 }
 0x3ef   :  { %v6349_v21 = vpop.eup %5640  ;;  %v655_v13 = vmul.f32 1.442695, %v640_v49  ;;  %v653_v54 = vmul.f32 1.442695, %v639_v20 }
 0x3f0   :  { %7891 = vst [vmem:[#allocation5_spill] sm:$0xff] %v6349_v21  ;;  %v6351_v15 = vpop.eup %5642  ;;  %4803 = vmatprep.mubr.msk.f32.mxu1 %vm608_vm6, %v6349_v21  ;;  %1094 = vrot.lane.b32.xlu0 %v6163_v6, %s5933_s8 }
 0x3f1   :  { %5652 = vpow2.f32 %v655_v13  ;;  %4804 = vmatmul.mubr.msk.f32.vlgmr.msra.gmra.mrb[28].mxu1 %vm608_vm6, %v6351_v15 }
 0x3f2   :  { %5654 = vpow2.f32 %v653_v54  ;;  %5249 = vmatpush3.bf16.msra.mxu1 %v6233_v1 }
 0x3f3   :  { %v6360_v56 = vpop.eup %5644  ;;  %5251 = vmatprep.subr.bf16.mxu1 %v5250_v44 }
 0x3f4   :  { %7892 = vst [vmem:[#allocation6_spill] sm:$0xff] %v6360_v56  ;;  %v6362_v27 = vpop.eup %5646  ;;  %1246 = vrot.lane.b32.xlu0 %v6024_v23, %s5935_s9 }
 0x3f5   :  { %7893 = vst [vmem:[#allocation7_spill] sm:$0xff] %v6362_v27  ;;  %4806 = vmatprep.mubr.msk.f32.mxu1 %vm608_vm6, %v6362_v27 }
 0x3f6   :  { %4807 = vmatmul.mubr.msk.f32.gmra.mrb[30].mxu1 %vm608_vm6, %v6360_v56 }
 0x3f7   :  { %v6370_v28 = vpop.eup %5648  ;;  %5253 = vmatpush3.bf16.msra.mxu1 %v5250_v44 }
 0x3f8   :  { %7894 = vst [vmem:[#allocation8_spill] sm:$0xff] %v6370_v28  ;;  %v6372_v32 = vpop.eup %5650  ;;  %1250 = vrot.lane.b32.xlu0 %v6034_v29, %s5935_s9 }
 0x3f9   :  { %7895 = vst [vmem:[#allocation9_spill] sm:$0xff] %v6372_v32  ;;  %4809 = vmatprep.mubr.msk.f32.mxu1 %vm608_vm6, %v6372_v32 }
 0x3fa   :  { %4810 = vmatmul.mubr.msk.f32.gmra.mrb[32].mxu1 %vm608_vm6, %v6370_v28 }
 0x3fb   :  { %v6380_v1 = vpop.eup %5652 }
 0x3fc   :  { %7896 = vst [vmem:[#allocation10_spill] sm:$0xff] %v6380_v1  ;;  %v6382_v22 = vpop.eup %5654  ;;  %1254 = vrot.lane.b32.xlu0 %v6046_v37, %s5935_s9 }
 0x3fd   :  { %7897 = vst [vmem:[#allocation11_spill] sm:$0xff] %v6382_v22  ;;  %4812 = vmatprep.mubr.msk.f32.mxu1 %vm608_vm6, %v6382_v22 }
 0x3fe   :  { %4813 = vmatmul.mubr.msk.f32.gmra.mrb[34].mxu1 %vm608_vm6, %v6380_v1 }
 0x400   :  { %1258 = vrot.lane.b32.xlu0 %v6057_v45, %s5935_s9 }
 0x40b   :  { %1033 = vmax.xlane.f32.xlu1 %v1032_v59 }
 0x41c   :  { %1248 = vrot.lane.b32.xlu1 %v6030_v26, %s5935_s9 }
 0x420   :  { %1252 = vrot.lane.b32.xlu1 %v6040_v33, %s5935_s9 }
 0x424   :  { %1256 = vrot.lane.b32.xlu1 %v6052_v41, %s5935_s9 }
 0x428   :  { %1260 = vrot.lane.b32.xlu1 %v6063_v48, %s5935_s9 }
 0x42c   :  { %5501 = vrot.lane.b32.xlu1 %v6148_v61, %s5936_s10 }
 0x456   :  { %v1019_v18 = vpop.xlane.xlu1 %1018 }
 0x457   :  { %v1016_v14 = vpop.xlane.xlu0 %1015  ;;  %v1039_v19 = vsub.f32 %v6297_v60, %v1019_v18 }
 0x458   :  { %v1038_v52 = vsub.f32 %v6300_v63, %v1016_v14 }
 0x459   :  { %v1048_v20 = vmul.f32 1.442695, %v1039_v19 }
 0x45a   :  { %v1046_v53 = vmul.f32 1.442695, %v1038_v52 }
 0x45b   :  { %v1025_v55 = vpop.xlane.xlu0 %1024  ;;  %v1022_v0 = vpop.xlane.xlu1 %1021 }
 0x45c   :  { %5656 = vpow2.f32 %v1046_v53  ;;  %v1040_v49 = vsub.f32 %v6310_v31, %v1022_v0  ;;  %v1041_v13 = vsub.f32 %v6307_v24, %v1025_v55 }
 0x45d   :  { %5658 = vpow2.f32 %v1048_v20 }
 0x45e   :  { %v1050_v44 = vmul.f32 1.442695, %v1040_v49  ;;  %v1052_v25 = vmul.f32 1.442695, %v1041_v13 }
 0x45f   :  { %v1031_v54 = vpop.xlane.xlu0 %1030  ;;  %v5492_v14 = vpop.permute.xlu1 %5491 }
 0x460   :  { %v1043_v59 = vsub.f32 %v6317_v16, %v1031_v54  ;;  %5660 = vpow2.f32 %v1050_v44  ;;  %v5494_v31 = vunpack.i.h.bf16 %v5492_v14  ;;  %v5493_v53 = vunpack.i.l.bf16 %v5492_v14 }
 0x461   :  { %5662 = vpow2.f32 %v1052_v25 }
 0x462   :  { %v1056_v52 = vmul.f32 1.442695, %v1043_v59  ;;  %v5254_v16 = vpack.c.bf16 %v5494_v31, %v5493_v53 }
 0x463   :  { %v1028_v40 = vpop.xlane.xlu0 %1027  ;;  %v5497_v55 = vpop.permute.xlu1 %5496 }
 0x464   :  { %v1042_v63 = vsub.f32 %v6324_v30, %v1028_v40  ;;  %v5499_v30 = vunpack.i.h.bf16 %v5497_v55  ;;  %v5498_v49 = vunpack.i.l.bf16 %v5497_v55 }
 0x466   :  { %v6414_v60 = vpop.eup %5656  ;;  %v1054_v18 = vmul.f32 1.442695, %v1042_v63  ;;  %v5260_v54 = vpack.c.bf16 %v5499_v30, %v5498_v49 }
 0x467   :  { %4847 = vmatprep.mubr.msk.f32.mxu1 %vm608_vm6, %v6414_v60  ;;  %v1037_v24 = vpop.xlane.xlu0 %1036  ;;  %v6418_v0 = vpop.eup %5658 }
 0x468   :  { %5664 = vpow2.f32 %v1054_v18  ;;  %v1271_v25 = vpop.permute.xlu1 %1270  ;;  %v1045_v59 = vsub.f32 %v6329_v57, %v1037_v24 }
 0x469   :  { %5666 = vpow2.f32 %v1056_v52 }
 0x46a   :  { %v6420_v40 = vpop.eup %5660  ;;  %v1060_v18 = vmul.f32 1.442695, %v1045_v59 }
 0x46b   :  { %v1095_v19 = vpop.permute.xlu0 %1094  ;;  %v6428_v20 = vpop.eup %5662 }
 0x46c   :  { %4845 = vmatprep.subr.mxu1 %v1095_v19 }
 0x46d   :  { %4846 = vmatpush3.msra.mxu1 %v1095_v19 }
 0x46e   :  { %4848 = vmatmul.mubr.msk.f32.vlgmr.msra.gmra.mrb[36].mxu1 %vm608_vm6, %v6418_v0  ;;  %5256 = vmatprep.subr.msk.bf16.mxu1 %vm6144_vm4, %v5254_v16 }
 0x46f   :  { %4850 = vmatprep.mubr.msk.f32.mxu1 %vm608_vm6, %v6420_v40  ;;  %v1247_v19 = vpop.permute.xlu0 %1246 }
 0x472   :  { %v6430_v13 = vpop.eup %5664  ;;  %4851 = vmatmul.mubr.msk.f32.gmra.mrb[38].mxu1 %vm608_vm6, %v6428_v20 }
 0x473   :  { %4853 = vmatprep.mubr.msk.f32.mxu1 %vm608_vm6, %v6430_v13  ;;  %v6438_v44 = vpop.eup %5666  ;;  %v1251_v57 = vpop.permute.xlu0 %1250 }
 0x474   :  { %5259 = vmatpush3.bf16.xpose.msk.msra.mxu1 %vm6144_vm4, %v5254_v16 }
 0x475   :  { %5262 = vmatprep.subr.msk.bf16.mxu1 %vm6144_vm4, %v5260_v54 }
 0x476   :  { %4854 = vmatmul.mubr.msk.f32.gmra.mrb[40].mxu1 %vm608_vm6, %v6438_v44 }
 0x47c   :  { %5265 = vmatpush3.bf16.xpose.msk.msra.mxu1 %vm6144_vm4, %v5260_v54 }
 0x47d   :  { %4867 = vmatprep.subr.msk.mxu1 %vm455_vm3, %v1271_v25 }
 0x484   :  { %4868 = vmatpush3.xpose.msk.msra.mxu1 %vm455_vm3, %v1271_v25  ;;  %v1255_v25 = vpop.permute.xlu0 %1254 }
 0x498   :  { %v1034_v63 = vpop.xlane.xlu1 %1033 }
 0x499   :  { %v1044_v14 = vsub.f32 %v6394_v62, %v1034_v63  ;;  %v1259_v63 = vpop.permute.xlu0 %1258 }
 0x49b   :  { %v1058_v52 = vmul.f32 1.442695, %v1044_v14 }
 0x49c   :  { %v1249_v31 = vpop.permute.xlu1 %1248 }
 0x49d   :  { %5668 = vpow2.f32 %v1058_v52 }
 0x49e   :  { %5670 = vpow2.f32 %v1060_v18 }
 0x4a0   :  { %v1253_v53 = vpop.permute.xlu1 %1252 }
 0x4a4   :  { %v1257_v16 = vpop.permute.xlu1 %1256 }
 0x4a7   :  { %v6450_v55 = vpop.eup %5668 }
 0x4a8   :  { %v6452_v30 = vpop.eup %5670  ;;  %4856 = vmatprep.mubr.msk.f32.mxu1 %vm608_vm6, %v6450_v55  ;;  %v1261_v49 = vpop.permute.xlu1 %1260 }
 0x4a9   :  { %4857 = vmatmul.mubr.msk.f32.gmra.mrb[42].mxu1 %vm608_vm6, %v6452_v30 }
 0x4aa   :  { %4869 = vmatprep.mubr.msk.f32.mxu1 %vm455_vm3, %v1247_v19 }
 0x4ac   :  { %v5502_v62 = vpop.permute.xlu1 %5501 }
 0x4ad   :  { %v5504_v24 = vunpack.i.h.bf16 %v5502_v62  ;;  %v5503_v54 = vunpack.i.l.bf16 %v5502_v62  ;;  %4870 = vmatmul.mubr.msk.f32.vlgmr.msra.gmra.mrb[44].mxu1 %vm455_vm3, %v1249_v31 }
 0x4ae   :  { %4872 = vmatprep.mubr.msk.f32.mxu1 %vm455_vm3, %v1251_v57 }
 0x4af   :  { %v5266_v59 = vpack.c.bf16 %v5504_v24, %v5503_v54 }
 0x4b1   :  { %4873 = vmatmul.mubr.msk.f32.gmra.mrb[46].mxu1 %vm455_vm3, %v1253_v53  ;;  %5267 = vmatprep.subr.bf16.mxu0 %v5266_v59 }
 0x4b2   :  { %4875 = vmatprep.mubr.msk.f32.mxu1 %vm455_vm3, %v1255_v25  ;;  %5269 = vmatpush3.bf16.msra.mxu0 %v5266_v59 }
 0x4b5   :  { %4876 = vmatmul.mubr.msk.f32.gmra.mrb[48].mxu1 %vm455_vm3, %v1257_v16 }
 0x4b6   :  { %4878 = vmatprep.mubr.msk.f32.mxu1 %vm455_vm3, %v1259_v63 }
 0x4b9   :  { %4879 = vmatmul.mubr.msk.f32.gmra.mrb[50].mxu1 %vm455_vm3, %v1261_v49 }
 0x4c4   :  { %v6466_v14 = vpop.f32.mrb[28].mxu1 }
 0x4c5   :  { %7898 = vst [vmem:[#allocation12_spill] sm:$0xff] %v6466_v14  ;;  %v6468_v18 = vpop.f32.mrb[29].mxu1 }
 0x4c6   :  { %7899 = vst [vmem:[#allocation13_spill] sm:$0xff] %v6468_v18 }
 0x4c9   :  { %v6470_v52 = vpop.f32.mrb[30].mxu1 }
 0x4ca   :  { %7900 = vst [vmem:[#allocation14_spill] sm:$0xff] %v6470_v52  ;;  %v6472_v31 = vpop.f32.mrb[31].mxu1 }
 0x4cb   :  { %7901 = vst [vmem:[#allocation15_spill] sm:$0xff] %v6472_v31 }
 0x4cd   :  { %v6474_v53 = vpop.f32.mrb[32].mxu1 }
 0x4ce   :  { %7902 = vst [vmem:[#allocation16_spill] sm:$0xff] %v6474_v53  ;;  %v6476_v19 = vpop.f32.mrb[33].mxu1 }
 0x4cf   :  { %7903 = vst [vmem:[#allocation17_spill] sm:$0xff] %v6476_v19 }
 0x4d1   :  { %v6478_v57 = vpop.f32.mrb[34].mxu1 }
 0x4d2   :  { %7904 = vst [vmem:[#allocation18_spill] sm:$0xff] %v6478_v57  ;;  %v6480_v62 = vpop.f32.mrb[35].mxu1 }
 0x4d3   :  { %7905 = vst [vmem:[#allocation19_spill] sm:$0xff] %v6480_v62 }
 0x541   :  { %v6482_v16 = vpop.f32.mrb[36].mxu1 }
 0x542   :  { %7906 = vst [vmem:[#allocation20_spill] sm:$0xff] %v6482_v16  ;;  %v6484_v24 = vpop.f32.mrb[37].mxu1 }
 0x543   :  { %7907 = vst [vmem:[#allocation21_spill] sm:$0xff] %v6484_v24 }
 0x545   :  { %v6486_v49 = vpop.f32.mrb[38].mxu1 }
 0x546   :  { %7908 = vst [vmem:[#allocation22_spill] sm:$0xff] %v6486_v49  ;;  %v6488_v54 = vpop.f32.mrb[39].mxu1 }
 0x547   :  { %7909 = vst [vmem:[#allocation23_spill] sm:$0xff] %v6488_v54 }
 0x549   :  { %v6490_v25 = vpop.f32.mrb[40].mxu1 }
 0x54a   :  { %7910 = vst [vmem:[#allocation24_spill] sm:$0xff] %v6490_v25  ;;  %v6492_v59 = vpop.f32.mrb[41].mxu1 }
 0x54b   :  { %7911 = vst [vmem:[#allocation25_spill] sm:$0xff] %v6492_v59 }
 0x57c   :  { %v6494_v63 = vpop.f32.mrb[42].mxu1 }
 0x57d   :  { %7912 = vst [vmem:[#allocation26_spill] sm:$0xff] %v6494_v63  ;;  %v6496_v36 = vpop.f32.mrb[43].mxu1 }
 0x57e   :  { %7913 = vst [vmem:[#allocation27_spill] sm:$0xff] %v6496_v36 }
 0x580   :  { %v4871_v12 = vpop.f32.mrb[44].mxu1 }
 0x581   :  { %v1404_v9 = vmul.f32 0.25, %v4871_v12  ;;  %v1364_v5 = vpop.f32.mrb[45].mxu1 }
 0x582   :  { %v1403_v53 = vmul.f32 0.25, %v1364_v5 }
 0x583   :  { %v6499_v19 = vadd.f32 %v1404_v9, %v6254_v17 }
 0x584   :  { %v4874_v52 = vpop.f32.mrb[46].mxu1  ;;  %v1411_v31 = vadd.f32 %v1403_v53, %v6254_v17 }
 0x585   :  { %v1406_v18 = vmul.f32 0.25, %v4874_v52  ;;  %v1374_v14 = vpop.f32.mrb[47].mxu1  ;;  %v1422_v62 = vsel %vm608_vm6, %v6499_v19, -inf }
 0x586   :  { %v1405_v57 = vmul.f32 0.25, %v1374_v14  ;;  %1423 = vmax.xlane.f32.xlu1 %v1422_v62  ;;  %v1419_v63 = vsel %vm608_vm6, %v1411_v31, -inf }
 0x587   :  { %1420 = vmax.xlane.f32.xlu0 %v1419_v63  ;;  %v6506_v12 = vadd.f32 %v1406_v18, %v6254_v17 }
 0x588   :  { %v4877_v5 = vpop.f32.mrb[48].mxu1  ;;  %v6511_v52 = vadd.f32 %v1405_v57, %v6254_v17 }
 0x589   :  { %v1384_v36 = vpop.f32.mrb[49].mxu1  ;;  %v1428_v9 = vsel %vm608_vm6, %v6506_v12, -inf  ;;  %v1408_v25 = vmul.f32 0.25, %v4877_v5 }
 0x58a   :  { %v1407_v53 = vmul.f32 0.25, %v1384_v36  ;;  %v1425_v18 = vsel %vm608_vm6, %v6511_v52, -inf }
 0x58b   :  { %1429 = vmax.xlane.f32.xlu0 %v1428_v9  ;;  %v6521_v49 = vadd.f32 %v1408_v25, %v6254_v17 }
 0x58c   :  { %v4880_v59 = vpop.f32.mrb[50].mxu1  ;;  %v6514_v14 = vadd.f32 %v1407_v53, %v6254_v17 }
 0x58d   :  { %v1394_v62 = vpop.f32.mrb[51].mxu1  ;;  %v1410_v63 = vmul.f32 0.25, %v4880_v59  ;;  %v1434_v57 = vsel %vm608_vm6, %v6521_v49, -inf }
 0x58e   :  { %v1431_v54 = vsel %vm608_vm6, %v6514_v14, -inf  ;;  %v1409_v36 = vmul.f32 0.25, %v1394_v62 }
 0x58f   :  { %1426 = vmax.xlane.f32.xlu0 %v1425_v18  ;;  %1432 = vmax.xlane.f32.xlu1 %v1431_v54  ;;  %v6526_v5 = vadd.f32 %v1410_v63, %v6254_v17 }
 0x590   :  { %v6531_v9 = vadd.f32 %v1409_v36, %v6254_v17 }
 0x591   :  { %v1440_v59 = vsel %vm608_vm6, %v6526_v5, -inf }
 0x592   :  { %v1437_v25 = vsel %vm608_vm6, %v6531_v9, -inf }
 0x593   :  { %1435 = vmax.xlane.f32.xlu0 %v1434_v57 }
 0x597   :  { %1441 = vmax.xlane.f32.xlu0 %v1440_v59 }
 0x59b   :  { %1438 = vmax.xlane.f32.xlu0 %v1437_v25 }
 0x5a0   :  { %1499 = vrot.lane.b32.xlu1 %v6163_v6, %s5936_s10 }
 0x5a4   :  { %5511 = vrot.lane.b32.xlu1 %v6148_v61, %s5937_s11 }
 0x5a8   :  { %5516 = vrot.lane.b32.xlu1 %v6157_v3, %s5937_s11 }
 0x5ac   :  { %1675 = vrot.lane.b32.xlu1 %v6163_v6, %s5937_s11 }
 0x5b0   :  { %1653 = vrot.lane.b32.xlu1 %v6030_v26, %s5937_s11  ;;  %v7915_v26 = vpack.i.bf16 %v6244_v8, %v6242_v7 }
 0x5b1   :  { %5506 = vrot.lane.b32.xlu0 %v6157_v3, %s5936_s10 }
 0x5b4   :  { %1657 = vrot.lane.b32.xlu1 %v6040_v33, %s5937_s11  ;;  %v7917_v33 = vpack.i.bf16 %v6110_v35, %v6108_v34 }
 0x5b5   :  { %1651 = vrot.lane.b32.xlu0 %v6024_v23, %s5937_s11  ;;  %v7914_v23 = vpack.i.bf16 %v6238_v4, %v6236_v2 }
 0x5b8   :  { %1661 = vrot.lane.b32.xlu1 %v6052_v41, %s5937_s11  ;;  %v7919_v41 = vpack.i.bf16 %v6122_v43, %v6120_v42 }
 0x5b9   :  { %1655 = vrot.lane.b32.xlu0 %v6034_v29, %s5937_s11  ;;  %v7916_v29 = vpack.i.bf16 %v6250_v11, %v6248_v10 }
 0x5bc   :  { %1665 = vrot.lane.b32.xlu1 %v6063_v48, %s5937_s11 }
 0x5bd   :  { %1659 = vrot.lane.b32.xlu0 %v6046_v37, %s5937_s11  ;;  %v7918_v37 = vpack.i.bf16 %v6116_v39, %v6114_v38 }
 0x5c0   :  { %5521 = vrot.lane.b32.xlu1 %v6148_v61, %s5938_s12 }
 0x5c1   :  { %1663 = vrot.lane.b32.xlu0 %v6057_v45, %s5937_s11 }
 0x5c4   :  { %1904 = vrot.lane.b32.xlu1 %v6163_v6, %s5938_s12 }
 0x5c5   :  { %5526 = vrot.lane.b32.xlu0 %v6157_v3, %s5938_s12 }
 0x5c8   :  { %5531 = vrot.lane.b32.xlu1 %v7914_v23, %s5930_s1 }
 0x5c9   :  { %5536 = vrot.lane.b32.xlu0 %v7915_v26, %s5930_s1 }
 0x5cc   :  { %5541 = vrot.lane.b32.xlu1 %v7916_v29, %s5930_s1 }
 0x5cd   :  { %5546 = vrot.lane.b32.xlu0 %v7917_v33, %s5930_s1 }
 0x5d0   :  { %5551 = vrot.lane.b32.xlu1 %v7918_v37, %s5930_s1 }
 0x5d1   :  { %5556 = vrot.lane.b32.xlu0 %v7919_v41, %s5930_s1 }
 0x613   :  { %v1424_v3 = vpop.xlane.xlu1 %1423 }
 0x614   :  { %v1421_v45 = vpop.xlane.xlu0 %1420  ;;  %v1444_v39 = vsub.f32 %v6499_v19, %v1424_v3 }
 0x615   :  { %v1443_v48 = vsub.f32 %v1411_v31, %v1421_v45 }
 0x616   :  { %v1453_v31 = vmul.f32 1.442695, %v1444_v39 }
 0x617   :  { %v1451_v61 = vmul.f32 1.442695, %v1443_v48 }
 0x618   :  { %v1430_v6 = vpop.xlane.xlu0 %1429 }
 0x619   :  { %5672 = vpow2.f32 %v1451_v61  ;;  %v1446_v63 = vsub.f32 %v6506_v12, %v1430_v6 }
 0x61a   :  { %5674 = vpow2.f32 %v1453_v31 }
 0x61b   :  { %v1457_v25 = vmul.f32 1.442695, %v1446_v63 }
 0x61c   :  { %v1427_v4 = vpop.xlane.xlu0 %1426  ;;  %v1433_v8 = vpop.xlane.xlu1 %1432 }
 0x61d   :  { %v1445_v62 = vsub.f32 %v6511_v52, %v1427_v4  ;;  %v1447_v18 = vsub.f32 %v6514_v14, %v1433_v8 }
 0x61f   :  { %v1455_v59 = vmul.f32 1.442695, %v1445_v62  ;;  %v1459_v23 = vmul.f32 1.442695, %v1447_v18 }
 0x620   :  { %v1436_v35 = vpop.xlane.xlu0 %1435  ;;  %v1500_v11 = vpop.permute.xlu1 %1499 }
 0x621   :  { %v1448_v19 = vsub.f32 %v6521_v49, %v1436_v35  ;;  %5676 = vpow2.f32 %v1455_v59 }
 0x622   :  { %5678 = vpow2.f32 %v1457_v25 }
 0x623   :  { %v6591_v54 = vpop.eup %5672  ;;  %v1461_v12 = vmul.f32 1.442695, %v1448_v19  ;;  %5680 = vpow2.f32 %v1459_v23 }
 0x624   :  { %4891 = vmatprep.mubr.msk.f32.mxu0 %vm608_vm6, %v6591_v54  ;;  %v1442_v53 = vpop.xlane.xlu0 %1441  ;;  %v5512_v43 = vpop.permute.xlu1 %5511 }
 0x625   :  { %v1450_v14 = vsub.f32 %v6526_v5, %v1442_v53  ;;  %v5514_v61 = vunpack.i.h.bf16 %v5512_v43  ;;  %v5513_v3 = vunpack.i.l.bf16 %v5512_v43  ;;  %5682 = vpow2.f32 %v1461_v12  ;;  %v6604_v35 = vpop.eup %5674 }
 0x627   :  { %v1465_v49 = vmul.f32 1.442695, %v1450_v14  ;;  %v5274_v8 = vpack.c.bf16 %v5514_v61, %v5513_v3  ;;  %v7920_v61 = vmov 0.0|0.0  }
 0x628   :  { %v1439_v36 = vpop.xlane.xlu0 %1438  ;;  %v5517_v57 = vpop.permute.xlu1 %5516 }
 0x629   :  { %v1449_v33 = vsub.f32 %v6531_v9, %v1439_v36  ;;  %v5519_v5 = vunpack.i.h.bf16 %v5517_v57  ;;  %v5518_v53 = vunpack.i.l.bf16 %v5517_v57 }
 0x62b   :  { %v1463_v6 = vmul.f32 1.442695, %v1449_v33  ;;  %v6606_v39 = vpop.eup %5676 }
 0x62c   :  { %v5507_v26 = vpop.permute.xlu0 %5506  ;;  %v6600_v29 = vpop.permute.xlu1 %1675 }
 0x62d   :  { %v5509_v52 = vunpack.i.h.bf16 %v5507_v26  ;;  %v5508_v37 = vunpack.i.l.bf16 %v5507_v26  ;;  %5684 = vpow2.f32 %v1463_v6  ;;  %v6614_v31 = vpop.eup %5678 }
 0x62e   :  { %5686 = vpow2.f32 %v1465_v49  ;;  %v6616_v63 = vpop.eup %5680 }
 0x62f   :  { %v5270_v41 = vpack.c.bf16 %v5509_v52, %v5508_v37  ;;  %v6624_v57 = vpop.eup %5682 }
 0x630   :  { %v1652_v45 = vpop.permute.xlu0 %1651  ;;  %v1654_v48 = vpop.permute.xlu1 %1653 }
 0x631   :  { %5271 = vmatprep.subr.bf16.mxu0 %v5270_v41 }
 0x632   :  { %5273 = vmatpush3.bf16.msra.mxu0 %v5270_v41 }
 0x633   :  { %4889 = vmatprep.subr.mxu0 %v1500_v11 }
 0x634   :  { %v1656_v4 = vpop.permute.xlu0 %1655  ;;  %v1658_v9 = vpop.permute.xlu1 %1657 }
 0x636   :  { %4890 = vmatpush3.msra.mxu0 %v1500_v11  ;;  %v5280_v11 = vpack.c.bf16 %v5519_v5, %v5518_v53 }
 0x637   :  { %4892 = vmatmul.mubr.msk.f32.vlgmr.msra.gmra.mrb[30].mxu0 %vm608_vm6, %v6604_v35  ;;  %5276 = vmatprep.subr.msk.bf16.mxu0 %vm6144_vm4, %v5274_v8  ;;  %v6628_v59 = vpop.eup %5684 }
 0x638   :  { %v1660_v43 = vpop.permute.xlu0 %1659  ;;  %v1662_v62 = vpop.permute.xlu1 %1661  ;;  %4894 = vmatprep.mubr.msk.f32.mxu0 %vm608_vm6, %v6606_v39 }
 0x639   :  { %v6634_v37 = vpop.eup %5686 }
 0x63b   :  { %4895 = vmatmul.mubr.msk.f32.gmra.mrb[32].mxu0 %vm608_vm6, %v6614_v31 }
 0x63c   :  { %v1664_v18 = vpop.permute.xlu0 %1663  ;;  %v1666_v36 = vpop.permute.xlu1 %1665  ;;  %4897 = vmatprep.mubr.msk.f32.mxu0 %vm608_vm6, %v6616_v63 }
 0x63d   :  { %5279 = vmatpush3.bf16.xpose.msk.msra.mxu0 %vm6144_vm4, %v5274_v8 }
 0x63e   :  { %5282 = vmatprep.subr.msk.bf16.mxu0 %vm6144_vm4, %v5280_v11 }
 0x63f   :  { %4898 = vmatmul.mubr.msk.f32.gmra.mrb[34].mxu0 %vm608_vm6, %v6624_v57 }
 0x640   :  { %v5527_v25 = vpop.permute.xlu0 %5526  ;;  %v5522_v23 = vpop.permute.xlu1 %5521  ;;  %4900 = vmatprep.mubr.msk.f32.mxu0 %vm608_vm6, %v6628_v59 }
 0x641   :  { %v5529_v19 = vunpack.i.h.bf16 %v5527_v25  ;;  %v5528_v26 = vunpack.i.l.bf16 %v5527_v25  ;;  %v5524_v33 = vunpack.i.h.bf16 %v5522_v23  ;;  %v5523_v52 = vunpack.i.l.bf16 %v5522_v23 }
 0x643   :  { %4901 = vmatmul.mubr.msk.f32.gmra.mrb[36].mxu0 %vm608_vm6, %v6634_v37  ;;  %v5286_v41 = vpack.c.bf16 %v5524_v33, %v5523_v52  ;;  %v5290_v12 = vpack.c.bf16 %v5529_v19, %v5528_v26 }
 0x644   :  { %4913 = vmatprep.mubr.msk.f32.mxu0 %vm455_vm3, %v1652_v45  ;;  %v1905_v14 = vpop.permute.xlu1 %1904 }
 0x645   :  { %5285 = vmatpush3.bf16.xpose.msk.msra.mxu0 %vm6144_vm4, %v5280_v11  ;;  %5287 = vmatprep.subr.bf16.mxu1 %v5286_v41 }
 0x646   :  { %4911 = vmatprep.subr.msk.mxu0 %vm455_vm3, %v6600_v29  ;;  %5289 = vmatpush3.bf16.msra.mxu1 %v5286_v41 }
 0x647   :  { %5291 = vmatprep.subr.bf16.mxu1 %v5290_v12 }
 0x64a   :  { %5293 = vmatpush3.bf16.msra.mxu1 %v5290_v12 }
 0x64b   :  { %4933 = vmatprep.subr.mxu1 %v1905_v14 }
 0x64d   :  { %4912 = vmatpush3.xpose.msk.msra.mxu0 %vm455_vm3, %v6600_v29 }
 0x64e   :  { %4934 = vmatpush3.msra.mxu1 %v1905_v14 }
 0x64f   :  { %5294 = vmatprep.subr.bf16.mxu1 %v7920_v61 }
 0x650   :  { %4914 = vmatmul.mubr.msk.f32.vlgmr.msra.gmra.mrb[38].mxu0 %vm455_vm3, %v1654_v48 }
 0x651   :  { %4916 = vmatprep.mubr.msk.f32.mxu0 %vm455_vm3, %v1656_v4 }
 0x654   :  { %4917 = vmatmul.mubr.msk.f32.gmra.mrb[40].mxu0 %vm455_vm3, %v1658_v9 }
 0x655   :  { %4919 = vmatprep.mubr.msk.f32.mxu0 %vm455_vm3, %v1660_v43 }
 0x658   :  { %4920 = vmatmul.mubr.msk.f32.gmra.mrb[42].mxu0 %vm455_vm3, %v1662_v62 }
 0x659   :  { %4922 = vmatprep.mubr.msk.f32.mxu0 %vm455_vm3, %v1664_v18 }
 0x65c   :  { %4923 = vmatmul.mubr.msk.f32.gmra.mrb[44].mxu0 %vm455_vm3, %v1666_v36 }
 0x65d   :  { %4988 = vmatprep.mubr.msk.f32.mxu0 %vm455_vm3, %v6236_v2 }
 0x70a   :  { %v6655_v29 = vpop.f32.mrb[30].mxu0 }
 0x70b   :  { %7921 = vst [vmem:[#allocation28_spill] sm:$0xff] %v6655_v29  ;;  %v6657_v45 = vpop.f32.mrb[31].mxu0 }
 0x70c   :  { %7922 = vst [vmem:[#allocation29_spill] sm:$0xff] %v6657_v45 }
 0x70e   :  { %v6659_v48 = vpop.f32.mrb[32].mxu0 }
 0x70f   :  { %7923 = vst [vmem:[#allocation30_spill] sm:$0xff] %v6659_v48  ;;  %v6661_v3 = vpop.f32.mrb[33].mxu0 }
 0x710   :  { %7924 = vst [vmem:[#allocation31_spill] sm:$0xff] %v6661_v3 }
 0x712   :  { %v6663_v6 = vpop.f32.mrb[34].mxu0 }
 0x713   :  { %7925 = vst [vmem:[#allocation32_spill] sm:$0xff] %v6663_v6  ;;  %v6665_v49 = vpop.f32.mrb[35].mxu0 }
 0x714   :  { %7926 = vst [vmem:[#allocation33_spill] sm:$0xff] %v6665_v49 }
 0x716   :  { %v6667_v4 = vpop.f32.mrb[36].mxu0 }
 0x717   :  { %7927 = vst [vmem:[#allocation34_spill] sm:$0xff] %v6667_v4  ;;  %v6669_v9 = vpop.f32.mrb[37].mxu0 }
 0x718   :  { %7928 = vst [vmem:[#allocation35_spill] sm:$0xff] %v6669_v9 }
 0x723   :  { %v4915_v8 = vpop.f32.mrb[38].mxu0 }
 0x724   :  { %v1809_v5 = vmul.f32 0.25, %v4915_v8  ;;  %v1769_v53 = vpop.f32.mrb[39].mxu0 }
 0x725   :  { %v1808_v43 = vmul.f32 0.25, %v1769_v53 }
 0x726   :  { %v1817_v62 = vadd.f32 %v1809_v5, %v6254_v17 }
 0x727   :  { %v4918_v11 = vpop.f32.mrb[40].mxu0  ;;  %v1816_v18 = vadd.f32 %v1808_v43, %v6254_v17 }
 0x728   :  { %v1811_v36 = vmul.f32 0.25, %v4918_v11  ;;  %v1779_v25 = vpop.f32.mrb[41].mxu0  ;;  %v1827_v23 = vsel %vm608_vm6, %v1817_v62, -inf }
 0x729   :  { %v1810_v19 = vmul.f32 0.25, %v1779_v25  ;;  %1828 = vmax.xlane.f32.xlu1 %v1827_v23  ;;  %v1824_v26 = vsel %vm608_vm6, %v1816_v18, -inf }
 0x72a   :  { %1825 = vmax.xlane.f32.xlu0 %v1824_v26  ;;  %v1819_v33 = vadd.f32 %v1811_v36, %v6254_v17 }
 0x72b   :  { %v4921_v52 = vpop.f32.mrb[42].mxu0  ;;  %v1818_v14 = vadd.f32 %v1810_v19, %v6254_v17 }
 0x72c   :  { %v1789_v41 = vpop.f32.mrb[43].mxu0  ;;  %v1833_v12 = vsel %vm608_vm6, %v1819_v33, -inf  ;;  %v1813_v8 = vmul.f32 0.25, %v4921_v52 }
 0x72d   :  { %v1812_v5 = vmul.f32 0.25, %v1789_v41  ;;  %v1830_v25 = vsel %vm608_vm6, %v1818_v14, -inf }
 0x72e   :  { %1834 = vmax.xlane.f32.xlu0 %v1833_v12  ;;  %v1821_v36 = vadd.f32 %v1813_v8, %v6254_v17  ;;  %v7929_v8 = vpack.i.bf16 %v6128_v47, %v6126_v46 }
 0x72f   :  { %v4924_v53 = vpop.f32.mrb[44].mxu0  ;;  %v1820_v43 = vadd.f32 %v1812_v5, %v6254_v17  ;;  %v5532_v5 = vpop.permute.xlu1 %5531 }
 0x730   :  { %v1799_v11 = vpop.f32.mrb[45].mxu0  ;;  %v1815_v23 = vmul.f32 0.25, %v4924_v53  ;;  %v1839_v19 = vsel %vm608_vm6, %v1821_v36, -inf  ;;  %v5537_v53 = vpop.permute.xlu0 %5536  ;;  %v5533_v29 = vunpack.i.l.bf16 %v5532_v5 }
 0x731   :  { %v1814_v9 = vmul.f32 0.25, %v1799_v11  ;;  %v1836_v26 = vsel %vm608_vm6, %v1820_v43, -inf  ;;  %v5539_v22 = vunpack.i.h.bf16 %v5537_v53  ;;  %v5538_v32 = vunpack.i.l.bf16 %v5537_v53 }
 0x732   :  { %1831 = vmax.xlane.f32.xlu0 %v1830_v25  ;;  %1837 = vmax.xlane.f32.xlu1 %v1836_v26  ;;  %v6686_v41 = vadd.f32 %v1815_v23, %v6254_v17 }
 0x733   :  { %v1822_v4 = vadd.f32 %v1814_v9, %v6254_v17  ;;  %v7930_v9 = vpack.i.bf16 %v6134_v51, %v6132_v50  ;;  %v5542_v11 = vpop.permute.xlu1 %5541 }
 0x734   :  { %v1845_v12 = vsel %vm608_vm6, %v6686_v41, -inf  ;;  %v5547_v25 = vpop.permute.xlu0 %5546 }
 0x735   :  { %v1842_v52 = vsel %vm608_vm6, %v1822_v4, -inf }
 0x736   :  { %1840 = vmax.xlane.f32.xlu0 %v1839_v19  ;;  %1843 = vmax.xlane.f32.xlu1 %v1842_v52 }
 0x737   :  { %v5552_v23 = vpop.permute.xlu1 %5551 }
 0x738   :  { %v6698_v26 = vpop.permute.xlu0 %5556 }
 0x73a   :  { %1846 = vmax.xlane.f32.xlu0 %v1845_v12 }
 0x747   :  { %5561 = vrot.lane.b32.xlu1 %v7929_v8, %s5930_s1 }
 0x750   :  { %5566 = vrot.lane.b32.xlu0 %v7930_v9, %s5930_s1  ;;  %v5534_v9 = vunpack.i.h.bf16 %v5532_v5 }
 0x7b6   :  { %v1829_v19 = vpop.xlane.xlu1 %1828 }
 0x7b7   :  { %v1849_v52 = vsub.f32 %v1817_v62, %v1829_v19  ;;  %v1826_v12 = vpop.xlane.xlu0 %1825  ;;  %v5544_v62 = vunpack.i.h.bf16 %v5542_v11  ;;  %v5543_v19 = vunpack.i.l.bf16 %v5542_v11 }
 0x7b8   :  { %v1848_v6 = vsub.f32 %v1816_v18, %v1826_v12  ;;  %v5548_v12 = vunpack.i.l.bf16 %v5547_v25 }
 0x7b9   :  { %v1858_v49 = vmul.f32 1.442695, %v1849_v52 }
 0x7ba   :  { %v1856_v48 = vmul.f32 1.442695, %v1848_v6  ;;  %v2225_v6 = vsel %vm333_vm2, %v5533_v29, %v5534_v9 }
 0x7bb   :  { %v1835_v47 = vpop.xlane.xlu0 %1834 }
 0x7bc   :  { %5688 = vpow2.f32 %v1856_v48  ;;  %v1851_v8 = vsub.f32 %v1819_v33, %v1835_v47  ;;  %v5549_v33 = vunpack.i.h.bf16 %v5547_v25 }
 0x7bd   :  { %5690 = vpow2.f32 %v1858_v49 }
 0x7be   :  { %v1862_v24 = vmul.f32 1.442695, %v1851_v8 }
 0x7bf   :  { %v1832_v3 = vpop.xlane.xlu0 %1831  ;;  %v1838_v51 = vpop.xlane.xlu1 %1837 }
 0x7c0   :  { %v1850_v45 = vsub.f32 %v1818_v14, %v1832_v3  ;;  %v1852_v16 = vsub.f32 %v1820_v43, %v1838_v51  ;;  %v2226_v3 = vsel %vm333_vm2, %v5538_v32, %v5539_v22  ;;  %v2227_v43 = vsel %vm333_vm2, %v5543_v19, %v5544_v62 }
 0x7c1   :  { %v5295_v29 = vpack.c.bf16 %v2226_v3, %v2225_v6  ;;  %v5559_v32 = vunpack.i.h.bf16 %v6698_v26  ;;  %v5558_v22 = vunpack.i.l.bf16 %v6698_v26 }
 0x7c2   :  { %v1860_v1 = vmul.f32 1.442695, %v1850_v45  ;;  %v1864_v27 = vmul.f32 1.442695, %v1852_v16 }
 0x7c3   :  { %v1841_v18 = vpop.xlane.xlu0 %1840  ;;  %v1844_v52 = vpop.xlane.xlu1 %1843  ;;  %v2230_v9 = vsel %vm333_vm2, %v5558_v22, %v5559_v32 }
 0x7c4   :  { %5692 = vpow2.f32 %v1860_v1  ;;  %v1853_v48 = vsub.f32 %v1821_v36, %v1841_v18  ;;  %v1854_v49 = vsub.f32 %v1822_v4, %v1844_v52  ;;  %v5554_v4 = vunpack.i.h.bf16 %v5552_v23 }
 0x7c5   :  { %5694 = vpow2.f32 %v1862_v24  ;;  %v5553_v36 = vunpack.i.l.bf16 %v5552_v23 }
 0x7c6   :  { %v6701_v5 = vpop.eup %5688  ;;  %5696 = vpow2.f32 %v1864_v27  ;;  %v1866_v14 = vmul.f32 1.442695, %v1853_v48  ;;  %v1868_v45 = vmul.f32 1.442695, %v1854_v49  ;;  %v2228_v27 = vsel %vm333_vm2, %v5548_v12, %v5549_v33 }
 0x7c7   :  { %v6704_v16 = vpop.eup %5690  ;;  %4935 = vmatprep.mubr.msk.f32.mxu1 %vm608_vm6, %v6701_v5  ;;  %v1847_v1 = vpop.xlane.xlu0 %1846  ;;  %v5298_v23 = vpack.c.bf16 %v2228_v27, %v2227_v43  ;;  %v2229_v47 = vsel %vm333_vm2, %v5553_v36, %v5554_v4  ;;  %v5898_v43 = vld [vmem:[%s7865_s2 + $0x10] sm:$0xff] }
 0x7c8   :  { %5698 = vpow2.f32 %v1866_v14  ;;  %v1855_v24 = vsub.f32 %v6686_v41, %v1847_v1  ;;  %4936 = vmatmul.mubr.msk.f32.vlgmr.msra.gmra.mrb[52].mxu1 %vm608_vm6, %v6704_v16  ;;  %v5562_v11 = vpop.permute.xlu1 %5561  ;;  %v5301_v18 = vpack.c.bf16 %v2230_v9, %v2229_v47  ;;  %v7931_v14 = vmov 0.0   ;;  %v5899_v1 = vld [vmem:[%s7865_s2 + $0x18] sm:$0xff] }
 0x7c9   :  { %5296 = vmatpush3.bf16.msra.mxu1 %v5295_v29  ;;  %5700 = vpow2.f32 %v1868_v45  ;;  %v5564_v62 = vunpack.i.h.bf16 %v5562_v11  ;;  %v5563_v19 = vunpack.i.l.bf16 %v5562_v11  ;;  %v5897_v45 = vld [vmem:[%s7865_s2 + $0x8] sm:$0xff]  ;;  %v5900_v29 = vld [vmem:[%s7865_s2 + $0x20] sm:$0xff] }
 0x7ca   :  { %v1870_v53 = vmul.f32 1.442695, %v1855_v24  ;;  %5297 = vmatprep.subr.bf16.mxu1 %v7920_v61 }
 0x7cb   :  { %v5567_v25 = vpop.permute.xlu0 %5566  ;;  %v2231_v49 = vsel %vm333_vm2, %v5563_v19, %v5564_v62 }
 0x7cc   :  { %5702 = vpow2.f32 %v1870_v53  ;;  %v5569_v41 = vunpack.i.h.bf16 %v5567_v25  ;;  %v5568_v8 = vunpack.i.l.bf16 %v5567_v25 }
 0x7cd   :  { %5299 = vmatpush3.bf16.msra.mxu1 %v5298_v23 }
 0x7ce   :  { %v6717_v51 = vpop.eup %5692  ;;  %5300 = vmatprep.subr.bf16.mxu1 %v7920_v61  ;;  %v2232_v6 = vsel %vm333_vm2, %v5568_v8, %v5569_v41 }
 0x7cf   :  { %v6721_v26 = vpop.eup %5694  ;;  %4938 = vmatprep.mubr.msk.f32.mxu1 %vm608_vm6, %v6717_v51  ;;  %v5304_v33 = vpack.c.bf16 %v2232_v6, %v2231_v49 }
 0x7d0   :  { %v6725_v52 = vpop.eup %5696  ;;  %4939 = vmatmul.mubr.msk.f32.gmra.mrb[54].mxu1 %vm608_vm6, %v6721_v26 }
 0x7d1   :  { %5302 = vmatpush3.bf16.msra.mxu1 %v5301_v18  ;;  %4941 = vmatprep.mubr.msk.f32.mxu1 %vm608_vm6, %v6725_v52 }
 0x7d2   :  { %v6732_v48 = vpop.eup %5698  ;;  %5303 = vmatprep.subr.bf16.mxu1 %v7920_v61  ;;  %v5896_v61 = vld [vmem:[%s7865_s2] sm:$0xff] }
 0x7d3   :  { %v6736_v12 = vpop.eup %5700 }
 0x7d4   :  { %4942 = vmatmul.mubr.msk.f32.gmra.mrb[56].mxu1 %vm608_vm6, %v6732_v48 }
 0x7d5   :  { %5305 = vmatpush3.bf16.msra.mxu1 %v5304_v33  ;;  %4944 = vmatprep.mubr.msk.f32.mxu1 %vm608_vm6, %v6736_v12 }
 0x7d6   :  { %v6742_v3 = vpop.eup %5702 }
 0x7d8   :  { %4945 = vmatmul.mubr.msk.f32.gmra.mrb[58].mxu1 %vm608_vm6, %v6742_v3 }
 0x7d9   :  { %4963 = vmatprep.mubr.msk.f32.mxu1 %vm5931_vm1, %v7931_v14 }
 0x7dc   :  { %4964 = vmatmul.mubr.msk.f32.vlgmr.msra.gmra.mrb[60].mxu1 %vm333_vm2, %v5896_v61 }
 0x7dd   :  { %4966 = vmatprep.mubr.msk.f32.mxu1 %vm5931_vm1, %v7931_v14 }
 0x7e0   :  { %4967 = vmatmul.mubr.msk.f32.gmra.mrb[62].mxu1 %vm333_vm2, %v5897_v45 }
 0x7e1   :  { %4969 = vmatprep.mubr.msk.f32.mxu1 %vm5931_vm1, %v7931_v14 }
 0x7e4   :  { %4970 = vmatmul.mubr.msk.f32.gmra.mrb[64].mxu1 %vm333_vm2, %v5898_v43 }
 0x7e5   :  { %4972 = vmatprep.mubr.msk.f32.mxu1 %vm5931_vm1, %v7931_v14 }
 0x7e8   :  { %4973 = vmatmul.mubr.msk.f32.gmra.mrb[66].mxu1 %vm333_vm2, %v5899_v1 }
 0x7e9   :  { %4975 = vmatprep.mubr.msk.f32.mxu1 %vm5931_vm1, %v7931_v14 }
 0x7ec   :  { %4976 = vmatmul.mubr.msk.f32.gmra.mrb[68].mxu1 %vm333_vm2, %v5900_v29 }
 0x89b   :  { %v6776_v4 = vpop.f32.mrb[52].mxu1 }
 0x89c   :  { %7932 = vst [vmem:[#allocation36_spill] sm:$0xff] %v6776_v4  ;;  %v6778_v36 = vpop.f32.mrb[53].mxu1 }
 0x89d   :  { %7933 = vst [vmem:[#allocation37_spill] sm:$0xff] %v6778_v36 }
 0x8a3   :  { %v6780_v24 = vpop.f32.mrb[54].mxu1 }
 0x8a4   :  { %7934 = vst [vmem:[#allocation38_spill] sm:$0xff] %v6780_v24  ;;  %v6782_v27 = vpop.f32.mrb[55].mxu1 }
 0x8a5   :  { %7935 = vst [vmem:[#allocation39_spill] sm:$0xff] %v6782_v27 }
 0x8a7   :  { %v6784_v32 = vpop.f32.mrb[56].mxu1 }
 0x8a8   :  { %7936 = vst [vmem:[#allocation40_spill] sm:$0xff] %v6784_v32  ;;  %v6786_v22 = vpop.f32.mrb[57].mxu1 }
 0x8a9   :  { %7937 = vst [vmem:[#allocation41_spill] sm:$0xff] %v6786_v22 }
 0x8ab   :  { %v6788_v53 = vpop.f32.mrb[58].mxu1 }
 0x8ac   :  { %7938 = vst [vmem:[#allocation42_spill] sm:$0xff] %v6788_v53  ;;  %v6790_v11 = vpop.f32.mrb[59].mxu1 }
 0x8ad   :  { %7939 = vst [vmem:[#allocation43_spill] sm:$0xff] %v6790_v11 }
 0x8af   :  { %v2307_v25 = vpop.f32.mrb[60].mxu1 }
 0x8b0   :  { %v4965_v23 = vpop.f32.mrb[61].mxu1 }
 0x8b3   :  { %v2312_v47 = vpop.f32.mrb[62].mxu1 }
 0x8b4   :  { %v6792_v41 = vpack.i.bf16 %v2312_v47, %v2307_v25  ;;  %v5306_v8 = vpack.c.bf16 %v2312_v47, %v2307_v25  ;;  %v4968_v9 = vpop.f32.mrb[63].mxu1 }
 0x8b6   :  { %5571 = vrot.lane.b32.xlu1 %v6792_v41, %s5932_s7  ;;  %5308 = vmatprep.subr.msk.bf16.mxu0 %vm6144_vm4, %v5306_v8 }
 0x8b7   :  { %5311 = vmatpush3.bf16.xpose.msk.msra.mxu0 %vm6144_vm4, %v5306_v8  ;;  %v2317_v62 = vpop.f32.mrb[64].mxu1 }
 0x8b8   :  { %v4971_v19 = vpop.f32.mrb[65].mxu1 }
 0x8ba   :  { %2715 = vrot.lane.b32.xlu1 %v6236_v2, %s5932_s7 }
 0x8bb   :  { %v2322_v18 = vpop.f32.mrb[66].mxu1 }
 0x8bc   :  { %v6802_v6 = vpack.i.bf16 %v2322_v18, %v2317_v62  ;;  %v4974_v49 = vpop.f32.mrb[67].mxu1  ;;  %v5312_v33 = vpack.c.bf16 %v2322_v18, %v2317_v62 }
 0x8be   :  { %5576 = vrot.lane.b32.xlu0 %v6802_v6, %s5932_s7  ;;  %5314 = vmatprep.subr.msk.bf16.mxu0 %vm6144_vm4, %v5312_v33 }
 0x8bf   :  { %v6808_v14 = vpop.f32.mrb[68].mxu1  ;;  %5317 = vmatpush3.bf16.xpose.msk.msra.mxu0 %vm6144_vm4, %v5312_v33 }
 0x8c0   :  { %2739 = vrot.lane.b32.xlu1 %v6808_v14, %s5932_s7  ;;  %4986 = vmatprep.subr.msk.mxu0 %vm455_vm3, %v6808_v14  ;;  %v4977_v61 = vpop.f32.mrb[69].mxu1 }
 0x8c2   :  { %5581 = vrot.lane.b32.xlu0 %v6792_v41, %s5935_s9 }
 0x8c4   :  { %5586 = vrot.lane.b32.xlu1 %v6802_v6, %s5935_s9 }
 0x8c6   :  { %2717 = vrot.lane.b32.xlu0 %v6242_v7, %s5932_s7 }
 0x8c7   :  { %4987 = vmatpush3.xpose.msk.msra.mxu0 %vm455_vm3, %v6808_v14 }
 0x8c8   :  { %2721 = vrot.lane.b32.xlu1 %v6108_v34, %s5932_s7 }
 0x8ca   :  { %2719 = vrot.lane.b32.xlu0 %v6248_v10, %s5932_s7  ;;  %4989 = vmatmul.mubr.msk.f32.vlgmr.msra.gmra.mrb[46].mxu0 %vm455_vm3, %v6242_v7 }
 0x8cb   :  { %4991 = vmatprep.mubr.msk.f32.mxu0 %vm455_vm3, %v6248_v10 }
 0x8cc   :  { %2725 = vrot.lane.b32.xlu1 %v6120_v42, %s5932_s7 }
 0x8ce   :  { %2723 = vrot.lane.b32.xlu0 %v6114_v38, %s5932_s7  ;;  %4992 = vmatmul.mubr.msk.f32.gmra.mrb[48].mxu0 %vm455_vm3, %v6108_v34 }
 0x8cf   :  { %4994 = vmatprep.mubr.msk.f32.mxu0 %vm455_vm3, %v6114_v38 }
 0x8d0   :  { %5591 = vrot.lane.b32.xlu1 %v6792_v41, %s5937_s11 }
 0x8d2   :  { %2727 = vrot.lane.b32.xlu0 %v6126_v46, %s5932_s7  ;;  %4995 = vmatmul.mubr.msk.f32.gmra.mrb[50].mxu0 %vm455_vm3, %v6120_v42 }
 0x8d3   :  { %4997 = vmatprep.mubr.msk.f32.mxu0 %vm455_vm3, %v6126_v46 }
 0x8d4   :  { %3144 = vrot.lane.b32.xlu1 %v6808_v14, %s5935_s9 }
 0x8d6   :  { %2729 = vrot.lane.b32.xlu0 %v6132_v50, %s5932_s7  ;;  %4998 = vmatmul.mubr.msk.f32.gmra.mrb[52].mxu0 %vm455_vm3, %v6132_v50 }
 0x8d8   :  { %3122 = vrot.lane.b32.xlu1 %v6242_v7, %s5935_s9 }
 0x8da   :  { %3120 = vrot.lane.b32.xlu0 %v6236_v2, %s5935_s9 }
 0x8dc   :  { %3124 = vrot.lane.b32.xlu1 %v6248_v10, %s5935_s9 }
 0x8de   :  { %5596 = vrot.lane.b32.xlu0 %v6802_v6, %s5937_s11 }
 0x8e0   :  { %3128 = vrot.lane.b32.xlu1 %v6114_v38, %s5935_s9 }
 0x8e2   :  { %3126 = vrot.lane.b32.xlu0 %v6108_v34, %s5935_s9 }
 0x8e4   :  { %3132 = vrot.lane.b32.xlu1 %v6126_v46, %s5935_s9 }
 0x8e6   :  { %3130 = vrot.lane.b32.xlu0 %v6120_v42, %s5935_s9 }
 0x8e8   :  { %3549 = vrot.lane.b32.xlu1 %v6808_v14, %s5937_s11 }
 0x8ea   :  { %3134 = vrot.lane.b32.xlu0 %v6132_v50, %s5935_s9 }
 0x8ec   :  { %3527 = vrot.lane.b32.xlu1 %v6242_v7, %s5937_s11 }
 0x8ee   :  { %3525 = vrot.lane.b32.xlu0 %v6236_v2, %s5937_s11 }
 0x8f0   :  { %3531 = vrot.lane.b32.xlu1 %v6108_v34, %s5937_s11 }
 0x8f2   :  { %3529 = vrot.lane.b32.xlu0 %v6248_v10, %s5937_s11 }
 0x8f4   :  { %3535 = vrot.lane.b32.xlu1 %v6120_v42, %s5937_s11 }
 0x8f6   :  { %3533 = vrot.lane.b32.xlu0 %v6114_v38, %s5937_s11 }
 0x8f8   :  { %3539 = vrot.lane.b32.xlu1 %v6132_v50, %s5937_s11 }
 0x8fa   :  { %3537 = vrot.lane.b32.xlu0 %v6126_v46, %s5937_s11 }
 0x8fc   :  { %5601 = vrot.lane.b32.xlu1 %v6792_v41, %s5930_s1 }
 0x8fe   :  { %5606 = vrot.lane.b32.xlu0 %v6802_v6, %s5930_s1 }
 0x900   :  { %5616 = vrot.lane.b32.xlu1 %v6802_v6, %s5933_s8 }
 0x902   :  { %5611 = vrot.lane.b32.xlu0 %v6792_v41, %s5933_s8 }
 0x904   :  { %5621 = vrot.lane.b32.xlu1 %v6792_v41, %s5936_s10 }
 0x906   :  { %2968 = vrot.lane.b32.xlu0 %v6808_v14, %s5933_s8 }
 0x908   :  { %5626 = vrot.lane.b32.xlu1 %v6802_v6, %s5936_s10 }
 0x90a   :  { %3373 = vrot.lane.b32.xlu0 %v6808_v14, %s5936_s10 }
 0x90c   :  { %5631 = vrot.lane.b32.xlu1 %v6792_v41, %s5938_s12 }
 0x910   :  { %2563 = vrot.lane.b32.xlu1 %v6808_v14, %s5930_s1 }
 0x928   :  { %v5572_v34 = vpop.permute.xlu1 %5571 }
 0x929   :  { %v5574_v38 = vunpack.i.h.bf16 %v5572_v34  ;;  %v5573_v42 = vunpack.i.l.bf16 %v5572_v34 }
 0x92b   :  { %v5326_v46 = vpack.c.bf16 %v5574_v38, %v5573_v42 }
 0x92c   :  { %v2716_v50 = vpop.permute.xlu1 %2715 }
 0x92d   :  { %5328 = vmatprep.subr.msk.bf16.mxu0 %vm6144_vm4, %v5326_v46  ;;  %5032 = vmatprep.mubr.msk.f32.mxu0 %vm455_vm3, %v2716_v50 }
 0x92e   :  { %5331 = vmatpush3.bf16.xpose.msk.msra.mxu0 %vm6144_vm4, %v5326_v46 }
 0x930   :  { %v5577_v2 = vpop.permute.xlu0 %5576 }
 0x931   :  { %v5579_v7 = vunpack.i.h.bf16 %v5577_v2  ;;  %v5578_v10 = vunpack.i.l.bf16 %v5577_v2 }
 0x932   :  { %v2740_v45 = vpop.permute.xlu1 %2739 }
 0x933   :  { %v5332_v43 = vpack.c.bf16 %v5579_v7, %v5578_v10 }
 0x934   :  { %v5582_v1 = vpop.permute.xlu0 %5581 }
 0x935   :  { %5334 = vmatprep.subr.msk.bf16.mxu0 %vm6144_vm4, %v5332_v43  ;;  %v5584_v23 = vunpack.i.h.bf16 %v5582_v1  ;;  %v5583_v47 = vunpack.i.l.bf16 %v5582_v1 }
 0x936   :  { %v5587_v29 = vpop.permute.xlu1 %5586  ;;  %5337 = vmatpush3.bf16.xpose.msk.msra.mxu0 %vm6144_vm4, %v5332_v43 }
 0x937   :  { %5030 = vmatprep.subr.msk.mxu0 %vm455_vm3, %v2740_v45  ;;  %v5346_v9 = vpack.c.bf16 %v5584_v23, %v5583_v47  ;;  %v5589_v62 = vunpack.i.h.bf16 %v5587_v29  ;;  %v5588_v19 = vunpack.i.l.bf16 %v5587_v29 }
 0x938   :  { %v2718_v25 = vpop.permute.xlu0 %2717 }
 0x939   :  { %v5352_v33 = vpack.c.bf16 %v5589_v62, %v5588_v19 }
 0x93a   :  { %v2722_v41 = vpop.permute.xlu1 %2721 }
 0x93c   :  { %v2720_v8 = vpop.permute.xlu0 %2719 }
 0x93e   :  { %v2726_v18 = vpop.permute.xlu1 %2725  ;;  %5031 = vmatpush3.xpose.msk.msra.mxu0 %vm455_vm3, %v2740_v45 }
 0x93f   :  { %5348 = vmatprep.subr.msk.bf16.mxu0 %vm6144_vm4, %v5346_v9 }
 0x940   :  { %v2724_v49 = vpop.permute.xlu0 %2723 }
 0x941   :  { %5033 = vmatmul.mubr.msk.f32.vlgmr.msra.gmra.mrb[54].mxu0 %vm455_vm3, %v2718_v25 }
 0x942   :  { %v5592_v61 = vpop.permute.xlu1 %5591  ;;  %5035 = vmatprep.mubr.msk.f32.mxu0 %vm455_vm3, %v2720_v8  ;;  %5351 = vmatpush3.bf16.xpose.msk.msra.mxu0 %vm6144_vm4, %v5346_v9 }
 0x943   :  { %5354 = vmatprep.subr.msk.bf16.mxu0 %vm6144_vm4, %v5352_v33  ;;  %v5594_v2 = vunpack.i.h.bf16 %v5592_v61  ;;  %v5593_v7 = vunpack.i.l.bf16 %v5592_v61 }
 0x944   :  { %v2728_v34 = vpop.permute.xlu0 %2727 }
 0x945   :  { %5036 = vmatmul.mubr.msk.f32.gmra.mrb[56].mxu0 %vm455_vm3, %v2722_v41  ;;  %v5366_v43 = vpack.c.bf16 %v5594_v2, %v5593_v7 }
 0x946   :  { %v3145_v38 = vpop.permute.xlu1 %3144  ;;  %5038 = vmatprep.mubr.msk.f32.mxu0 %vm455_vm3, %v2724_v49 }
 0x948   :  { %v2730_v42 = vpop.permute.xlu0 %2729 }
 0x949   :  { %5039 = vmatmul.mubr.msk.f32.gmra.mrb[58].mxu0 %vm455_vm3, %v2726_v18 }
 0x94a   :  { %v3123_v46 = vpop.permute.xlu1 %3122  ;;  %5041 = vmatprep.mubr.msk.f32.mxu0 %vm455_vm3, %v2728_v34  ;;  %5357 = vmatpush3.bf16.xpose.msk.msra.mxu0 %vm6144_vm4, %v5352_v33 }
 0x94b   :  { %5074 = vmatprep.subr.msk.mxu0 %vm455_vm3, %v3145_v38 }
 0x94c   :  { %v3121_v50 = vpop.permute.xlu0 %3120 }
 0x94d   :  { %5042 = vmatmul.mubr.msk.f32.gmra.mrb[60].mxu0 %vm455_vm3, %v2730_v42 }
 0x94e   :  { %v3125_v10 = vpop.permute.xlu1 %3124  ;;  %5076 = vmatprep.mubr.msk.f32.mxu0 %vm455_vm3, %v3121_v50 }
 0x950   :  { %v5597_v45 = vpop.permute.xlu0 %5596 }
 0x951   :  { %v5599_v1 = vunpack.i.h.bf16 %v5597_v45  ;;  %v5598_v29 = vunpack.i.l.bf16 %v5597_v45 }
 0x952   :  { %v3129_v25 = vpop.permute.xlu1 %3128  ;;  %5075 = vmatpush3.xpose.msk.msra.mxu0 %vm455_vm3, %v3145_v38 }
 0x953   :  { %5368 = vmatprep.subr.msk.bf16.mxu0 %vm6144_vm4, %v5366_v43  ;;  %v5372_v47 = vpack.c.bf16 %v5599_v1, %v5598_v29 }
 0x954   :  { %v3127_v23 = vpop.permute.xlu0 %3126 }
 0x955   :  { %5077 = vmatmul.mubr.msk.f32.vlgmr.msra.gmra.mrb[62].mxu0 %vm455_vm3, %v3123_v46 }
 0x956   :  { %v3133_v41 = vpop.permute.xlu1 %3132  ;;  %5079 = vmatprep.mubr.msk.f32.mxu0 %vm455_vm3, %v3125_v10  ;;  %5371 = vmatpush3.bf16.xpose.msk.msra.mxu0 %vm6144_vm4, %v5366_v43 }
 0x957   :  { %5374 = vmatprep.subr.msk.bf16.mxu0 %vm6144_vm4, %v5372_v47 }
 0x958   :  { %v3131_v8 = vpop.permute.xlu0 %3130 }
 0x959   :  { %5080 = vmatmul.mubr.msk.f32.gmra.mrb[64].mxu0 %vm455_vm3, %v3127_v23 }
 0x95a   :  { %v3550_v9 = vpop.permute.xlu1 %3549  ;;  %5082 = vmatprep.mubr.msk.f32.mxu0 %vm455_vm3, %v3129_v25 }
 0x95c   :  { %v3135_v62 = vpop.permute.xlu0 %3134 }
 0x95d   :  { %5083 = vmatmul.mubr.msk.f32.gmra.mrb[66].mxu0 %vm455_vm3, %v3131_v8 }
 0x95e   :  { %v3528_v19 = vpop.permute.xlu1 %3527  ;;  %5085 = vmatprep.mubr.msk.f32.mxu0 %vm455_vm3, %v3133_v41  ;;  %5377 = vmatpush3.bf16.xpose.msk.msra.mxu0 %vm6144_vm4, %v5372_v47 }
 0x95f   :  { %5118 = vmatprep.subr.msk.mxu0 %vm455_vm3, %v3550_v9 }
 0x960   :  { %v3526_v18 = vpop.permute.xlu0 %3525 }
 0x961   :  { %5086 = vmatmul.mubr.msk.f32.gmra.mrb[68].mxu0 %vm455_vm3, %v3135_v62 }
 0x962   :  { %v3532_v49 = vpop.permute.xlu1 %3531  ;;  %5120 = vmatprep.mubr.msk.f32.mxu0 %vm455_vm3, %v3526_v18 }
 0x964   :  { %v3530_v33 = vpop.permute.xlu0 %3529 }
 0x966   :  { %v3536_v61 = vpop.permute.xlu1 %3535  ;;  %5119 = vmatpush3.xpose.msk.msra.mxu0 %vm455_vm3, %v3550_v9 }
 0x968   :  { %v3534_v34 = vpop.permute.xlu0 %3533 }
 0x969   :  { %5121 = vmatmul.mubr.msk.f32.vlgmr.msra.gmra.mrb[70].mxu0 %vm455_vm3, %v3528_v19 }
 0x96a   :  { %v3540_v38 = vpop.permute.xlu1 %3539  ;;  %5123 = vmatprep.mubr.msk.f32.mxu0 %vm455_vm3, %v3530_v33 }
 0x96c   :  { %v3538_v58 = vpop.permute.xlu0 %3537 }
 0x96d   :  { %5124 = vmatmul.mubr.msk.f32.gmra.mrb[72].mxu0 %vm455_vm3, %v3532_v49 }
 0x96e   :  { %v5602_v42 = vpop.permute.xlu1 %5601  ;;  %5126 = vmatprep.mubr.msk.f32.mxu0 %vm455_vm3, %v3534_v34 }
 0x96f   :  { %v5604_v46 = vunpack.i.h.bf16 %v5602_v42  ;;  %v5603_v50 = vunpack.i.l.bf16 %v5602_v42 }
 0x970   :  { %v5607_v2 = vpop.permute.xlu0 %5606 }
 0x971   :  { %v5609_v7 = vunpack.i.h.bf16 %v5607_v2  ;;  %v5608_v10 = vunpack.i.l.bf16 %v5607_v2  ;;  %5127 = vmatmul.mubr.msk.f32.gmra.mrb[74].mxu0 %vm455_vm3, %v3536_v61  ;;  %v5318_v45 = vpack.c.bf16 %v5604_v46, %v5603_v50 }
 0x972   :  { %v6962_v43 = vpop.permute.xlu1 %5616  ;;  %5129 = vmatprep.mubr.msk.f32.mxu0 %vm455_vm3, %v3538_v58 }
 0x973   :  { %5319 = vmatprep.subr.bf16.mxu1 %v5318_v45  ;;  %v5322_v1 = vpack.c.bf16 %v5609_v7, %v5608_v10 }
 0x974   :  { %5321 = vmatpush3.bf16.msra.mxu1 %v5318_v45  ;;  %v5612_v23 = vpop.permute.xlu0 %5611 }
 0x975   :  { %5323 = vmatprep.subr.bf16.mxu1 %v5322_v1  ;;  %5130 = vmatmul.mubr.msk.f32.gmra.mrb[76].mxu0 %vm455_vm3, %v3540_v38  ;;  %v5614_v41 = vunpack.i.h.bf16 %v5612_v23  ;;  %v5613_v8 = vunpack.i.l.bf16 %v5612_v23 }
 0x976   :  { %v6966_v29 = vpop.permute.xlu1 %5621 }
 0x977   :  { %v6972_v62 = vpack.c.bf16 %v5614_v41, %v5613_v8 }
 0x978   :  { %5325 = vmatpush3.bf16.msra.mxu1 %v5322_v1 }
 0x97a   :  { %v6968_v25 = vpop.permute.xlu1 %5626 }
 0x97e   :  { %v6970_v47 = vpop.permute.xlu1 %5631 }
 0x97f   :  { %7940 = vst [vmem:[#allocation44_spill] sm:$0xff] %v6970_v47 }
 0x982   :  { %v2564_v9 = vpop.permute.xlu1 %2563 }
 0x983   :  { %5008 = vmatprep.subr.mxu1 %v2564_v9 }
 0x984   :  { %5009 = vmatpush3.msra.mxu1 %v2564_v9 }
 0x985   :  { %5339 = vmatprep.subr.bf16.mxu1 %v6972_v62 }
 0x99d   :  { %v4990_v19 = vpop.f32.mrb[46].mxu0 }
 0x99e   :  { %v2468_v18 = vmul.f32 0.25, %v4990_v19  ;;  %v2428_v49 = vpop.f32.mrb[47].mxu0 }
 0x99f   :  { %v2467_v33 = vmul.f32 0.25, %v2428_v49 }
 0x9a0   :  { %v6976_v61 = vadd.f32 %v2468_v18, %v6254_v17 }
 0x9a1   :  { %v6979_v34 = vadd.f32 %v2467_v33, %v6254_v17  ;;  %v4993_v38 = vpop.f32.mrb[48].mxu0 }
 0x9a2   :  { %v2470_v58 = vmul.f32 0.25, %v4993_v38  ;;  %v2438_v42 = vpop.f32.mrb[49].mxu0  ;;  %v2486_v46 = vsel %vm608_vm6, %v6976_v61, -inf }
 0x9a3   :  { %v2469_v50 = vmul.f32 0.25, %v2438_v42  ;;  %2487 = vmax.xlane.f32.xlu1 %v2486_v46  ;;  %v2483_v2 = vsel %vm608_vm6, %v6979_v34, -inf }
 0x9a4   :  { %v6986_v7 = vadd.f32 %v2470_v58, %v6254_v17  ;;  %2484 = vmax.xlane.f32.xlu0 %v2483_v2 }
 0x9a5   :  { %v4996_v10 = vpop.f32.mrb[50].mxu0  ;;  %v6989_v45 = vadd.f32 %v2469_v50, %v6254_v17 }
 0x9a6   :  { %v2448_v1 = vpop.f32.mrb[51].mxu0  ;;  %v2492_v23 = vsel %vm608_vm6, %v6986_v7, -inf  ;;  %v2472_v41 = vmul.f32 0.25, %v4996_v10 }
 0x9a7   :  { %v2471_v8 = vmul.f32 0.25, %v2448_v1  ;;  %v2489_v49 = vsel %vm608_vm6, %v6989_v45, -inf }
 0x9a8   :  { %2493 = vmax.xlane.f32.xlu0 %v2492_v23  ;;  %v6999_v33 = vadd.f32 %v2472_v41, %v6254_v17 }
 0x9a9   :  { %v6994_v9 = vadd.f32 %v2471_v8, %v6254_v17  ;;  %v4999_v19 = vpop.f32.mrb[52].mxu0 }
 0x9aa   :  { %v2458_v18 = vpop.f32.mrb[53].mxu0  ;;  %v2474_v38 = vmul.f32 0.25, %v4999_v19  ;;  %v2498_v2 = vsel %vm608_vm6, %v6999_v33, -inf }
 0x9ab   :  { %v2473_v58 = vmul.f32 0.25, %v2458_v18  ;;  %v2495_v42 = vsel %vm608_vm6, %v6994_v9, -inf }
 0x9ac   :  { %2490 = vmax.xlane.f32.xlu0 %v2489_v49  ;;  %2496 = vmax.xlane.f32.xlu1 %v2495_v42  ;;  %v7007_v50 = vadd.f32 %v2474_v38, %v6254_v17 }
 0x9ad   :  { %v7004_v46 = vadd.f32 %v2473_v58, %v6254_v17 }
 0x9ae   :  { %v2504_v1 = vsel %vm608_vm6, %v7007_v50, -inf }
 0x9af   :  { %v2501_v10 = vsel %vm608_vm6, %v7004_v46, -inf }
 0x9b0   :  { %2499 = vmax.xlane.f32.xlu0 %v2498_v2  ;;  %2502 = vmax.xlane.f32.xlu1 %v2501_v10 }
 0x9b4   :  { %2505 = vmax.xlane.f32.xlu0 %v2504_v1 }
 0xa14   :  { %v5034_v23 = vpop.f32.mrb[54].mxu0 }
 0xa15   :  { %v2873_v41 = vmul.f32 0.25, %v5034_v23  ;;  %v2833_v8 = vpop.f32.mrb[55].mxu0 }
 0xa16   :  { %v2872_v19 = vmul.f32 0.25, %v2833_v8 }
 0xa17   :  { %v7016_v18 = vadd.f32 %v2873_v41, %v6254_v17 }
 0xa18   :  { %v7019_v49 = vadd.f32 %v2872_v19, %v6254_v17  ;;  %v5037_v38 = vpop.f32.mrb[56].mxu0 }
 0xa19   :  { %v2875_v58 = vmul.f32 0.25, %v5037_v38  ;;  %v2843_v42 = vpop.f32.mrb[57].mxu0  ;;  %v2891_v2 = vsel %vm608_vm6, %v7016_v18, -inf }
 0xa1a   :  { %v2874_v10 = vmul.f32 0.25, %v2843_v42  ;;  %2892 = vmax.xlane.f32.xlu0 %v2891_v2  ;;  %v2888_v1 = vsel %vm608_vm6, %v7019_v49, -inf }
 0xa1b   :  { %v7026_v23 = vadd.f32 %v2875_v58, %v6254_v17  ;;  %2889 = vmax.xlane.f32.xlu1 %v2888_v1 }
 0xa1c   :  { %v5040_v41 = vpop.f32.mrb[58].mxu0  ;;  %v7029_v8 = vadd.f32 %v2874_v10, %v6254_v17 }
 0xa1d   :  { %v2877_v19 = vmul.f32 0.25, %v5040_v41  ;;  %v2853_v11 = vpop.f32.mrb[59].mxu0  ;;  %v2897_v38 = vsel %vm608_vm6, %v7026_v23, -inf }
 0xa1e   :  { %v2876_v53 = vmul.f32 0.25, %v2853_v11  ;;  %2898 = vmax.xlane.f32.xlu0 %v2897_v38  ;;  %v2894_v10 = vsel %vm608_vm6, %v7029_v8, -inf }
 0xa1f   :  { %v7037_v32 = vadd.f32 %v2877_v19, %v6254_v17  ;;  %v7048_v19 = vpop.permute.xlu0 %2968 }
 0xa20   :  { %v7034_v42 = vadd.f32 %v2876_v53, %v6254_v17  ;;  %v5043_v2 = vpop.f32.mrb[60].mxu0 }
 0xa21   :  { %v2879_v58 = vmul.f32 0.25, %v5043_v2  ;;  %v2863_v1 = vpop.f32.mrb[61].mxu0  ;;  %v2903_v53 = vsel %vm608_vm6, %v7037_v32, -inf }
 0xa22   :  { %2895 = vmax.xlane.f32.xlu0 %v2894_v10  ;;  %v2900_v41 = vsel %vm608_vm6, %v7034_v42, -inf  ;;  %v2878_v38 = vmul.f32 0.25, %v2863_v1 }
 0xa23   :  { %2901 = vmax.xlane.f32.xlu1 %v2900_v41  ;;  %v7044_v11 = vadd.f32 %v2879_v58, %v6254_v17  ;;  %v7061_v36 = vpop.permute.xlu0 %3373 }
 0xa24   :  { %v7051_v22 = vadd.f32 %v2878_v38, %v6254_v17  ;;  %7945 = vst [vmem:[#allocation49_spill] sm:$0xff] %v7061_v36 }
 0xa25   :  { %7941 = vst [vmem:[#allocation45_spill] sm:$0xff] %v7044_v11  ;;  %v2909_v27 = vsel %vm608_vm6, %v7044_v11, -inf }
 0xa26   :  { %2904 = vmax.xlane.f32.xlu0 %v2903_v53  ;;  %7942 = vst [vmem:[#allocation46_spill] sm:$0xff] %v7051_v22  ;;  %v2906_v38 = vsel %vm608_vm6, %v7051_v22, -inf }
 0xa28   :  { %v5078_v2 = vpop.f32.mrb[62].mxu0 }
 0xa29   :  { %v3278_v24 = vmul.f32 0.25, %v5078_v2  ;;  %v3238_v10 = vpop.f32.mrb[63].mxu0 }
 0xa2a   :  { %v3277_v41 = vmul.f32 0.25, %v3238_v10  ;;  %2910 = vmax.xlane.f32.xlu0 %v2909_v27 }
 0xa2b   :  { %v7056_v58 = vadd.f32 %v3278_v24, %v6254_v17 }
 0xa2c   :  { %v7059_v1 = vadd.f32 %v3277_v41, %v6254_v17  ;;  %v5081_v53 = vpop.f32.mrb[64].mxu0 }
 0xa2d   :  { %7943 = vst [vmem:[#allocation47_spill] sm:$0xff] %v7056_v58  ;;  %v3280_v4 = vmul.f32 0.25, %v5081_v53  ;;  %v3248_v47 = vpop.f32.mrb[65].mxu0  ;;  %v3296_v28 = vsel %vm608_vm6, %v7056_v58, -inf }
 0xa2e   :  { %7944 = vst [vmem:[#allocation48_spill] sm:$0xff] %v7059_v1  ;;  %v3279_v2 = vmul.f32 0.25, %v3248_v47  ;;  %2907 = vmax.xlane.f32.xlu0 %v2906_v38  ;;  %v3293_v10 = vsel %vm608_vm6, %v7059_v1, -inf }
 0xa2f   :  { %v7068_v27 = vadd.f32 %v3280_v4, %v6254_v17  ;;  %3294 = vmax.xlane.f32.xlu1 %v3293_v10 }
 0xa30   :  { %v2488_v24 = vpop.xlane.xlu1 %2487  ;;  %v5084_v41 = vpop.f32.mrb[66].mxu0  ;;  %v7073_v53 = vadd.f32 %v3279_v2, %v6254_v17 }
 0xa31   :  { %7946 = vst [vmem:[#allocation50_spill] sm:$0xff] %v7068_v27  ;;  %v2508_v36 = vsub.f32 %v6976_v61, %v2488_v24  ;;  %v3282_v22 = vmul.f32 0.25, %v5084_v41  ;;  %v2485_v47 = vpop.xlane.xlu0 %2484  ;;  %v3258_v38 = vpop.f32.mrb[67].mxu0  ;;  %v3302_v1 = vsel %vm608_vm6, %v7068_v27, -inf }
 0xa32   :  { %v2507_v4 = vsub.f32 %v6979_v34, %v2485_v47  ;;  %v3281_v11 = vmul.f32 0.25, %v3258_v38  ;;  %3297 = vmax.xlane.f32.xlu0 %v3296_v28  ;;  %v3299_v27 = vsel %vm608_vm6, %v7073_v53, -inf }
 0xa33   :  { %v2517_v10 = vmul.f32 1.442695, %v2508_v36  ;;  %3303 = vmax.xlane.f32.xlu1 %v3302_v1  ;;  %v7083_v56 = vadd.f32 %v3282_v22, %v6254_v17 }
 0xa34   :  { %v2515_v21 = vmul.f32 1.442695, %v2507_v4  ;;  %v7080_v58 = vadd.f32 %v3281_v11, %v6254_v17  ;;  %v5087_v2 = vpop.f32.mrb[68].mxu0 }
 0xa35   :  { %7947 = vst [vmem:[#allocation51_spill] sm:$0xff] %v7083_v56  ;;  %v3284_v61 = vmul.f32 0.25, %v5087_v2  ;;  %v2494_v24 = vpop.xlane.xlu0 %2493  ;;  %v3268_v41 = vpop.f32.mrb[69].mxu0 }
 0xa36   :  { %5704 = vpow2.f32 %v2515_v21  ;;  %v3283_v34 = vmul.f32 0.25, %v3268_v41  ;;  %3300 = vmax.xlane.f32.xlu0 %v3299_v27  ;;  %v3305_v28 = vsel %vm608_vm6, %v7080_v58, -inf  ;;  %v2510_v11 = vsub.f32 %v6986_v7, %v2494_v24 }
 0xa37   :  { %5706 = vpow2.f32 %v2517_v10  ;;  %v7090_v36 = vadd.f32 %v3284_v61, %v6254_v17  ;;  %3306 = vmax.xlane.f32.xlu1 %v3305_v28  ;;  %v3308_v21 = vsel %vm608_vm6, %v7083_v56, -inf  ;;  %v5619_v24 = vunpack.i.h.bf16 %v6962_v43 }
 0xa38   :  { %v7094_v22 = vadd.f32 %v3283_v34, %v6254_v17  ;;  %v2521_v10 = vmul.f32 1.442695, %v2510_v11 }
 0xa39   :  { %7948 = vst [vmem:[#allocation52_spill] sm:$0xff] %v7090_v36  ;;  %v2491_v1 = vpop.xlane.xlu0 %2490  ;;  %v2497_v47 = vpop.xlane.xlu1 %2496  ;;  %v3314_v27 = vsel %vm608_vm6, %v7090_v36, -inf  ;;  %v5618_v36 = vunpack.i.l.bf16 %v6962_v43 }
 0xa3a   :  { %v2509_v38 = vsub.f32 %v6989_v45, %v2491_v1  ;;  %v2511_v4 = vsub.f32 %v6994_v9, %v2497_v47  ;;  %3309 = vmax.xlane.f32.xlu0 %v3308_v21  ;;  %v3311_v56 = vsel %vm608_vm6, %v7094_v22, -inf }
 0xa3b   :  { %3315 = vmax.xlane.f32.xlu1 %v3314_v27 }
 0xa3c   :  { %v2519_v7 = vmul.f32 1.442695, %v2509_v38  ;;  %v2523_v2 = vmul.f32 1.442695, %v2511_v4  ;;  %v5122_v61 = vpop.f32.mrb[70].mxu0 }
 0xa3d   :  { %v3683_v41 = vmul.f32 0.25, %v5122_v61  ;;  %v2500_v34 = vpop.xlane.xlu0 %2499  ;;  %v3643_v28 = vpop.f32.mrb[71].mxu0 }
 0xa3e   :  { %5708 = vpow2.f32 %v2519_v7  ;;  %v2512_v45 = vsub.f32 %v6999_v33, %v2500_v34  ;;  %v3682_v9 = vmul.f32 0.25, %v3643_v28  ;;  %v2503_v1 = vpop.xlane.xlu1 %2502  ;;  %3312 = vmax.xlane.f32.xlu0 %v3311_v56 }
 0xa3f   :  { %5710 = vpow2.f32 %v2521_v10  ;;  %v7108_v11 = vadd.f32 %v3683_v41, %v6254_v17  ;;  %v2513_v47 = vsub.f32 %v7004_v46, %v2503_v1  ;;  %v5342_v41 = vpack.c.bf16 %v5619_v24, %v5618_v36 }
 0xa40   :  { %v7111_v21 = vpop.eup %5704  ;;  %5712 = vpow2.f32 %v2523_v2  ;;  %v2525_v27 = vmul.f32 1.442695, %v2512_v45  ;;  %v5125_v38 = vpop.f32.mrb[72].mxu0  ;;  %v7116_v43 = vadd.f32 %v3682_v9, %v6254_v17  ;;  %v5624_v24 = vunpack.i.h.bf16 %v6966_v29 }
 0xa41   :  { %v7113_v4 = vpop.eup %5706  ;;  %v2527_v33 = vmul.f32 1.442695, %v2513_v47  ;;  %v3685_v7 = vmul.f32 0.25, %v5125_v38  ;;  %5010 = vmatprep.mubr.msk.f32.mxu1 %vm608_vm6, %v7111_v21  ;;  %v2506_v56 = vpop.xlane.xlu0 %2505  ;;  %v3701_v46 = vsel %vm608_vm6, %v7108_v11, -inf }
 0xa42   :  { %v3653_v10 = vpop.f32.mrb[73].mxu0  ;;  %5714 = vpow2.f32 %v2525_v27  ;;  %v2514_v2 = vsub.f32 %v7007_v50, %v2506_v56  ;;  %5011 = vmatmul.mubr.msk.f32.vlgmr.msra.gmra.mrb[70].mxu1 %vm608_vm6, %v7113_v4  ;;  %3702 = vmax.xlane.f32.xlu1 %v3701_v46  ;;  %v3698_v36 = vsel %vm608_vm6, %v7116_v43, -inf  ;;  %v5623_v27 = vunpack.i.l.bf16 %v6966_v29 }
 0xa43   :  { %v3684_v61 = vmul.f32 0.25, %v3653_v10  ;;  %v7126_v34 = vadd.f32 %v3685_v7, %v6254_v17  ;;  %5341 = vmatpush3.bf16.msra.mxu1 %v6972_v62  ;;  %5716 = vpow2.f32 %v2527_v33 }
 0xa44   :  { %v2529_v28 = vmul.f32 1.442695, %v2514_v2  ;;  %5343 = vmatprep.subr.bf16.mxu1 %v5342_v41  ;;  %v5128_v45 = vpop.f32.mrb[74].mxu0 }
 0xa45   :  { %v7130_v9 = vadd.f32 %v3684_v61, %v6254_v17  ;;  %v3687_v1 = vmul.f32 0.25, %v5128_v45  ;;  %v3663_v50 = vpop.f32.mrb[75].mxu0  ;;  %v3707_v47 = vsel %vm608_vm6, %v7126_v34, -inf  ;;  %v7159_v45 = vpack.c.bf16 %v5624_v24, %v5623_v27 }
 0xa46   :  { %5718 = vpow2.f32 %v2529_v28  ;;  %v3686_v62 = vmul.f32 0.25, %v3663_v50  ;;  %3708 = vmax.xlane.f32.xlu0 %v3707_v47  ;;  %3699 = vmax.xlane.f32.xlu1 %v3698_v36 }
 0xa47   :  { %v7139_v38 = vadd.f32 %v3687_v1, %v6254_v17  ;;  %5345 = vmatpush3.bf16.msra.mxu1 %v5342_v41  ;;  %v3704_v2 = vsel %vm608_vm6, %v7130_v9, -inf }
 0xa48   :  { %v7141_v33 = vpop.eup %5708  ;;  %5052 = vmatprep.subr.mxu1 %v7048_v19  ;;  %v5131_v7 = vpop.f32.mrb[76].mxu0  ;;  %v7147_v10 = vadd.f32 %v3686_v62, %v6254_v17  ;;  %v1062_v62 = vsel %vm608_vm6, %v6414_v60, 0.0  ;;  %v1071_v60 = vsel %vm608_vm6, %v6428_v20, 0.0  ;;  %v1473_v20 = vsel %vm608_vm6, %v6606_v39, 0.0 }
 0xa49   :  { %v7144_v56 = vpop.eup %5710  ;;  %v3689_v46 = vmul.f32 0.25, %v5131_v7  ;;  %5013 = vmatprep.mubr.msk.f32.mxu1 %vm608_vm6, %v7141_v33  ;;  %v3673_v29 = vpop.f32.mrb[77].mxu0  ;;  %v3713_v61 = vsel %vm608_vm6, %v7139_v38, -inf  ;;  %v1065_v7 = vsel %vm608_vm6, %v6418_v0, 0.0  ;;  %v1872_v0 = vsel %vm608_vm6, %v6701_v5, 0.0 }
 0xa4a   :  { %v7155_v41 = vpop.eup %5712  ;;  %v3688_v28 = vmul.f32 0.25, %v3673_v29  ;;  %5014 = vmatmul.mubr.msk.f32.gmra.mrb[72].mxu1 %vm608_vm6, %v7144_v56  ;;  %3705 = vmax.xlane.f32.xlu0 %v3704_v2  ;;  %v3710_v36 = vsel %vm608_vm6, %v7147_v10, -inf  ;;  %v1875_v29 = vsel %vm608_vm6, %v6704_v16, 0.0  ;;  %v1068_v16 = vsel %vm608_vm6, %v6420_v40, 0.0 }
 0xa4b   :  { %v7162_v1 = vadd.f32 %v3689_v46, %v6254_v17  ;;  %5053 = vmatpush3.msra.mxu1 %v7048_v19  ;;  %3714 = vmax.xlane.f32.xlu1 %v3713_v61  ;;  %v1467_v46 = vsel %vm608_vm6, %v6591_v54, 0.0  ;;  %v1476_v54 = vsel %vm608_vm6, %v6614_v31, 0.0  ;;  %v1077_v5 = vsel %vm608_vm6, %v6438_v44, 0.0 }
 0xa4c   :  { %v7165_v50 = vpop.eup %5714  ;;  %5016 = vmatprep.mubr.msk.f32.mxu1 %vm608_vm6, %v7155_v41  ;;  %5359 = vmatprep.subr.bf16.mxu1 %v7159_v45  ;;  %v7171_v47 = vadd.f32 %v3688_v28, %v6254_v17  ;;  %v1878_v31 = vsel %vm608_vm6, %v6717_v51, 0.0  ;;  %v1482_v40 = vsel %vm608_vm6, %v6624_v57, 0.0  ;;  %v1887_v39 = vsel %vm608_vm6, %v6732_v48, 0.0 }
 0xa4d   :  { %v3719_v24 = vsel %vm608_vm6, %v7162_v1, -inf  ;;  %v7177_v27 = vpop.eup %5716  ;;  %v1479_v44 = vsel %vm608_vm6, %v6616_v63, 0.0  ;;  %v1083_v51 = vsel %vm608_vm6, %v6452_v30, 0.0  ;;  %v1884_v57 = vsel %vm608_vm6, %v6725_v52, 0.0 }
 0xa4e   :  { %5017 = vmatmul.mubr.msk.f32.gmra.mrb[74].mxu1 %vm608_vm6, %v7165_v50  ;;  %3711 = vmax.xlane.f32.xlu0 %v3710_v36  ;;  %v3716_v17 = vsel %vm608_vm6, %v7171_v47, -inf  ;;  %v1488_v28 = vsel %vm608_vm6, %v6634_v37, 0.0  ;;  %v1080_v30 = vsel %vm608_vm6, %v6450_v55, 0.0 }
 0xa4f   :  { %3720 = vmax.xlane.f32.xlu1 %v3719_v24  ;;  %5019 = vmatprep.mubr.msk.f32.mxu1 %vm608_vm6, %v7177_v27 }
 0xa50   :  { %v7183_v19 = vpop.eup %5718 }
 0xa52   :  { %3717 = vmax.xlane.f32.xlu0 %v3716_v17  ;;  %5020 = vmatmul.mubr.msk.f32.gmra.mrb[76].mxu1 %vm608_vm6, %v7183_v19 }
 0xa60   :  { %3778 = vrot.lane.b32.xlu1 %v6808_v14, %s5938_s12  ;;  %v1470_v14 = vsel %vm608_vm6, %v6604_v35, 0.0  ;;  %v1881_v35 = vsel %vm608_vm6, %v6721_v26, 0.0  ;;  %v1074_v26 = vsel %vm608_vm6, %v6430_v13, 0.0 }
 0xa68   :  { %5636 = vrot.lane.b32.xlu0 %v6802_v6, %s5938_s12 }
 0xa84   :  { %1063 = vadd.xlane.f32.xlu1 %v1062_v62 }
 0xa87   :  { %1066 = vadd.xlane.f32.xlu0 %v1065_v7 }
 0xa88   :  { %1468 = vadd.xlane.f32.xlu1 %v1467_v46  ;;  %v660_v46 = vsel %vm608_vm6, %v6351_v15, 0.0 }
 0xa8b   :  { %1876 = vadd.xlane.f32.xlu0 %v1875_v29 }
 0xa8c   :  { %1471 = vadd.xlane.f32.xlu1 %v1470_v14  ;;  %v5628_v14 = vunpack.i.l.bf16 %v6968_v25 }
 0xa8f   :  { %1072 = vadd.xlane.f32.xlu0 %v1071_v60  ;;  %v7949_v60 = vld [vmem:[#allocation6_spill] sm:$0xff] }
 0xa90   :  { %1873 = vadd.xlane.f32.xlu1 %v1872_v0  ;;  %v666_v15 = vsel %vm608_vm6, %v7949_v60, 0.0 }
 0xa93   :  { %1477 = vadd.xlane.f32.xlu0 %v1476_v54 }
 0xa94   :  { %1069 = vadd.xlane.f32.xlu1 %v1068_v16  ;;  %v7950_v16 = vld [vmem:[#allocation5_spill] sm:$0xff] }
 0xa97   :  { %1882 = vadd.xlane.f32.xlu0 %v1881_v35 }
 0xa98   :  { %1474 = vadd.xlane.f32.xlu1 %v1473_v20 }
 0xa9b   :  { %1078 = vadd.xlane.f32.xlu0 %v1077_v5  ;;  %v7952_v5 = vld [vmem:[#allocation8_spill] sm:$0xff] }
 0xa9c   :  { %1879 = vadd.xlane.f32.xlu1 %v1878_v31  ;;  %v672_v31 = vsel %vm608_vm6, %v7952_v5, 0.0 }
 0xa9f   :  { %1483 = vadd.xlane.f32.xlu0 %v1482_v40 }
 0xaa0   :  { %1075 = vadd.xlane.f32.xlu1 %v1074_v26 }
 0xaa3   :  { %1888 = vadd.xlane.f32.xlu0 %v1887_v39  ;;  %v7953_v39 = vld [vmem:[#allocation7_spill] sm:$0xff] }
 0xaa4   :  { %1480 = vadd.xlane.f32.xlu1 %v1479_v44  ;;  %v663_v44 = vsel %vm608_vm6, %v7953_v39, 0.0 }
 0xaa7   :  { %v2893_v6 = vpop.xlane.xlu0 %2892  ;;  %1084 = vadd.xlane.f32.xlu0 %v1083_v51  ;;  %v7954_v51 = vld [vmem:[#allocation46_spill] sm:$0xff] }
 0xaa8   :  { %v2913_v2 = vsub.f32 %v7016_v18, %v2893_v6  ;;  %1885 = vadd.xlane.f32.xlu1 %v1884_v57  ;;  %v2890_v13 = vpop.xlane.xlu1 %2889  ;;  %v1893_v18 = vsel %vm608_vm6, %v6742_v3, 0.0  ;;  %v1890_v3 = vsel %vm608_vm6, %v6736_v12, 0.0  ;;  %v657_v12 = vsel %vm608_vm6, %v7950_v16, 0.0 }
 0xaa9   :  { %v2912_v61 = vsub.f32 %v7019_v49, %v2890_v13  ;;  %v1485_v49 = vsel %vm608_vm6, %v6628_v59, 0.0 }
 0xaaa   :  { %v2922_v48 = vmul.f32 1.442695, %v2913_v2  ;;  %v7955_v2 = vld [vmem:[#allocation44_spill] sm:$0xff] }
 0xaab   :  { %v2920_v63 = vmul.f32 1.442695, %v2912_v61  ;;  %v2899_v36 = vpop.xlane.xlu0 %2898  ;;  %1489 = vadd.xlane.f32.xlu0 %v1488_v28  ;;  %v5634_v13 = vunpack.i.h.bf16 %v7955_v2  ;;  %v5633_v61 = vunpack.i.l.bf16 %v7955_v2  ;;  %v2537_v2 = vsel %vm608_vm6, %v7141_v33, 0.0 }
 0xaac   :  { %1081 = vadd.xlane.f32.xlu1 %v1080_v30  ;;  %v2915_v52 = vsub.f32 %v7026_v23, %v2899_v36  ;;  %v7957_v36 = vld [vmem:[#allocation10_spill] sm:$0xff]  ;;  %v2543_v33 = vsel %vm608_vm6, %v7155_v41, 0.0 }
 0xaad   :  { %5720 = vpow2.f32 %v2920_v63  ;;  %v678_v30 = vsel %vm608_vm6, %v7957_v36, 0.0 }
 0xaae   :  { %5722 = vpow2.f32 %v2922_v48  ;;  %v2926_v55 = vmul.f32 1.442695, %v2915_v52  ;;  %v7956_v48 = vld [vmem:[#allocation48_spill] sm:$0xff] }
 0xaaf   :  { %v2896_v24 = vpop.xlane.xlu0 %2895  ;;  %1894 = vadd.xlane.f32.xlu0 %v1893_v18 }
 0xab0   :  { %v2914_v37 = vsub.f32 %v7029_v8, %v2896_v24  ;;  %1486 = vadd.xlane.f32.xlu1 %v1485_v49  ;;  %v2902_v17 = vpop.xlane.xlu1 %2901  ;;  %v5629_v8 = vunpack.i.h.bf16 %v6968_v25  ;;  %v7958_v24 = vld [vmem:[#allocation49_spill] sm:$0xff] }
 0xab1   :  { %v2916_v62 = vsub.f32 %v7034_v42, %v2902_v17 }
 0xab2   :  { %v2924_v7 = vmul.f32 1.442695, %v2914_v37  ;;  %v5362_v25 = vpack.c.bf16 %v5629_v8, %v5628_v14  ;;  %v7959_v37 = vld [vmem:[#allocation9_spill] sm:$0xff]  ;;  %v2534_v14 = vsel %vm608_vm6, %v7113_v4, 0.0  ;;  %v2540_v4 = vsel %vm608_vm6, %v7144_v56, 0.0 }
 0xab3   :  { %v2928_v23 = vmul.f32 1.442695, %v2916_v62  ;;  %v2905_v29 = vpop.xlane.xlu0 %2904  ;;  %661 = vadd.xlane.f32.xlu0 %v660_v46  ;;  %v669_v17 = vsel %vm608_vm6, %v7959_v37, 0.0 }
 0xab4   :  { %5724 = vpow2.f32 %v2924_v7  ;;  %v2917_v59 = vsub.f32 %v7037_v32, %v2905_v29  ;;  %1891 = vadd.xlane.f32.xlu1 %v1890_v3  ;;  %v7951_v32 = vld [vmem:[#allocation45_spill] sm:$0xff]  ;;  %v5378_v3 = vpack.c.bf16 %v5634_v13, %v5633_v61 }
 0xab5   :  { %5726 = vpow2.f32 %v2928_v23  ;;  %v7961_v23 = vld [vmem:[#allocation50_spill] sm:$0xff] }
 0xab6   :  { %5728 = vpow2.f32 %v2926_v55  ;;  %v2930_v42 = vmul.f32 1.442695, %v2917_v59  ;;  %v7960_v55 = vld [vmem:[#allocation47_spill] sm:$0xff] }
 0xab7   :  { %v7253_v0 = vpop.eup %5720  ;;  %v2911_v54 = vpop.xlane.xlu0 %2910  ;;  %667 = vadd.xlane.f32.xlu0 %v666_v15  ;;  %v7962_v15 = vld [vmem:[#allocation11_spill] sm:$0xff] }
 0xab8   :  { %v7257_v35 = vpop.eup %5722  ;;  %5730 = vpow2.f32 %v2930_v42  ;;  %v2919_v20 = vsub.f32 %v7951_v32, %v2911_v54  ;;  %658 = vadd.xlane.f32.xlu1 %v657_v12  ;;  %5054 = vmatprep.mubr.msk.f32.mxu1 %vm608_vm6, %v7253_v0  ;;  %v675_v54 = vsel %vm608_vm6, %v7962_v15, 0.0 }
 0xab9   :  { %5055 = vmatmul.mubr.msk.f32.vlgmr.msra.gmra.mrb[78].mxu1 %vm608_vm6, %v7257_v35 }
 0xaba   :  { %5361 = vmatpush3.bf16.msra.mxu1 %v7159_v45  ;;  %v2934_v40 = vmul.f32 1.442695, %v2919_v20 }
 0xabb   :  { %5363 = vmatprep.subr.bf16.mxu1 %v5362_v25  ;;  %673 = vadd.xlane.f32.xlu0 %v672_v31  ;;  %v2908_v26 = vpop.xlane.xlu0 %2907  ;;  %v2531_v31 = vsel %vm608_vm6, %v7111_v21, 0.0 }
 0xabc   :  { %v2918_v6 = vsub.f32 %v7954_v51, %v2908_v26  ;;  %664 = vadd.xlane.f32.xlu1 %v663_v44  ;;  %v3295_v57 = vpop.xlane.xlu1 %3294  ;;  %5732 = vpow2.f32 %v2934_v40 }
 0xabd   :  { %v3317_v45 = vsub.f32 %v7956_v48, %v3295_v57 }
 0xabe   :  { %v7273_v28 = vpop.eup %5724  ;;  %v2932_v63 = vmul.f32 1.442695, %v2918_v6  ;;  %5365 = vmatpush3.bf16.msra.mxu1 %v5362_v25  ;;  %v2546_v6 = vsel %vm608_vm6, %v7165_v50, 0.0 }
 0xabf   :  { %v7277_v52 = vpop.eup %5726  ;;  %v3325_v18 = vmul.f32 1.442695, %v3317_v45  ;;  %5096 = vmatprep.subr.mxu1 %v7958_v24  ;;  %679 = vadd.xlane.f32.xlu0 %v678_v30  ;;  %v3298_v49 = vpop.xlane.xlu0 %3297 }
 0xac0   :  { %v7282_v62 = vpop.eup %5728  ;;  %5734 = vpow2.f32 %v2932_v63  ;;  %v3318_v7 = vsub.f32 %v7960_v55, %v3298_v49  ;;  %670 = vadd.xlane.f32.xlu1 %v669_v17  ;;  %5057 = vmatprep.mubr.msk.f32.mxu1 %vm608_vm6, %v7273_v28  ;;  %v3304_v46 = vpop.xlane.xlu1 %3303 }
 0xac1   :  { %5736 = vpow2.f32 %v3325_v18  ;;  %5058 = vmatmul.mubr.msk.f32.gmra.mrb[80].mxu1 %vm608_vm6, %v7282_v62  ;;  %v3320_v29 = vsub.f32 %v7961_v23, %v3304_v46 }
 0xac2   :  { %v7290_v59 = vpop.eup %5730  ;;  %v3327_v8 = vmul.f32 1.442695, %v3318_v7  ;;  %5060 = vmatprep.mubr.msk.f32.mxu1 %vm608_vm6, %v7277_v52  ;;  %5097 = vmatpush3.msra.mxu1 %v7958_v24 }
 0xac3   :  { %v3331_v42 = vmul.f32 1.442695, %v3320_v29  ;;  %5379 = vmatprep.subr.bf16.mxu1 %v5378_v3  ;;  %2535 = vadd.xlane.f32.xlu0 %v2534_v14  ;;  %v3301_v60 = vpop.xlane.xlu0 %3300 }
 0xac4   :  { %5738 = vpow2.f32 %v3327_v8  ;;  %v3319_v16 = vsub.f32 %v7073_v53, %v3301_v60  ;;  %676 = vadd.xlane.f32.xlu1 %v675_v54  ;;  %v3307_v12 = vpop.xlane.xlu1 %3306  ;;  %v7963_v53 = vld [vmem:[#allocation51_spill] sm:$0xff] }
 0xac5   :  { %5061 = vmatmul.mubr.msk.f32.gmra.mrb[82].mxu1 %vm608_vm6, %v7290_v59  ;;  %v3321_v32 = vsub.f32 %v7080_v58, %v3307_v12  ;;  %5740 = vpow2.f32 %v3331_v42  ;;  %v7964_v58 = vld [vmem:[#allocation52_spill] sm:$0xff] }
 0xac6   :  { %v3329_v20 = vmul.f32 1.442695, %v3319_v16  ;;  %v7308_v39 = vpop.eup %5732 }
 0xac7   :  { %v3333_v25 = vmul.f32 1.442695, %v3321_v32  ;;  %2541 = vadd.xlane.f32.xlu0 %v2540_v4  ;;  %v3310_v5 = vpop.xlane.xlu0 %3309 }
 0xac8   :  { %5742 = vpow2.f32 %v3329_v20  ;;  %v3322_v40 = vsub.f32 %v7963_v53, %v3310_v5  ;;  %2532 = vadd.xlane.f32.xlu1 %v2531_v31  ;;  %v3316_v26 = vpop.xlane.xlu1 %3315 }
 0xac9   :  { %5744 = vpow2.f32 %v3333_v25  ;;  %v3324_v44 = vsub.f32 %v7964_v58, %v3316_v26 }
 0xaca   :  { %v7311_v51 = vpop.eup %5734  ;;  %v3335_v56 = vmul.f32 1.442695, %v3322_v40 }
 0xacb   :  { %v7315_v57 = vpop.eup %5736  ;;  %2547 = vadd.xlane.f32.xlu0 %v2546_v6  ;;  %v3313_v21 = vpop.xlane.xlu0 %3312  ;;  %5063 = vmatprep.mubr.msk.f32.mxu1 %vm608_vm6, %v7311_v51  ;;  %v3339_v61 = vmul.f32 1.442695, %v3324_v44  ;;  %v273_v44 = vld [vmem:[%s7866_s3] sm:$0xff] }
 0xacc   :  { %5746 = vpow2.f32 %v3335_v56  ;;  %v3323_v13 = vsub.f32 %v7094_v22, %v3313_v21  ;;  %2538 = vadd.xlane.f32.xlu1 %v2537_v2  ;;  %5064 = vmatmul.mubr.msk.f32.gmra.mrb[84].mxu1 %vm608_vm6, %v7308_v39  ;;  %v274_v56 = vld [vmem:[%s7866_s3 + $0x8] sm:$0xff]  ;;  %v275_v2 = vld [vmem:[%s7866_s3 + $0x10] sm:$0xff] }
 0xacd   :  { %5098 = vmatprep.mubr.msk.f32.mxu1 %vm608_vm6, %v7315_v57  ;;  %v5386_v6 = vpack.c.bf16 %v274_v56, %v273_v44  ;;  %v7968_v56 = vld [vmem:[#allocation36_spill] sm:$0xff] }
 0xace   :  { %v7326_v50 = vpop.eup %5738  ;;  %v3337_v48 = vmul.f32 1.442695, %v3323_v13  ;;  %v276_v13 = vld [vmem:[%s7866_s3 + $0x18] sm:$0xff] }
 0xacf   :  { %v3703_v45 = vpop.xlane.xlu1 %3702  ;;  %v7332_v22 = vpop.eup %5740  ;;  %5387 = vmatprep.subr.bf16.mxu0 %v5386_v6 }
 0xad0   :  { %5748 = vpow2.f32 %v3337_v48  ;;  %2544 = vadd.xlane.f32.xlu1 %v2543_v33  ;;  %5099 = vmatmul.mubr.msk.f32.vlgmr.msra.gmra.mrb[86].mxu1 %vm608_vm6, %v7326_v50  ;;  %v3723_v55 = vsub.f32 %v7108_v11, %v3703_v45 }
 0xad1   :  { %5750 = vpow2.f32 %v3339_v61  ;;  %5381 = vmatpush3.bf16.msra.mxu1 %v5378_v3  ;;  %5389 = vmatpush3.bf16.msra.mxu0 %v5386_v6  ;;  %v5390_v61 = vpack.c.bf16 %v276_v13, %v275_v2  ;;  %v7969_v13 = vld [vmem:[#allocation28_spill] sm:$0xff] }
 0xad2   :  { %v7334_v63 = vpop.eup %5742  ;;  %v3732_v29 = vmul.f32 1.442695, %v3723_v55 }
 0xad3   :  { %v7336_v36 = vpop.eup %5744  ;;  %v3709_v30 = vpop.xlane.xlu0 %3708  ;;  %5101 = vmatprep.mubr.msk.f32.mxu1 %vm608_vm6, %v7334_v63  ;;  %5391 = vmatprep.subr.bf16.mxu0 %v5390_v61 }
 0xad4   :  { %v3700_v18 = vpop.xlane.xlu1 %3699  ;;  %5102 = vmatmul.mubr.msk.f32.gmra.mrb[88].mxu1 %vm608_vm6, %v7332_v22  ;;  %v3725_v3 = vsub.f32 %v7126_v34, %v3709_v30 }
 0xad5   :  { %v3722_v41 = vsub.f32 %v7116_v43, %v3700_v18  ;;  %5104 = vmatprep.mubr.msk.f32.mxu1 %vm608_vm6, %v7336_v36  ;;  %5393 = vmatpush3.bf16.msra.mxu0 %v5390_v61  ;;  %v277_v18 = vld [vmem:[%s7866_s3 + $0x20] sm:$0xff] }
 0xad6   :  { %v7345_v24 = vpop.eup %5746  ;;  %v3736_v60 = vmul.f32 1.442695, %v3725_v3 }
 0xad7   :  { %v3730_v49 = vmul.f32 1.442695, %v3722_v41  ;;  %v3706_v37 = vpop.xlane.xlu0 %3705  ;;  %v278_v41 = vld [vmem:[%s7866_s3 + $0x28] sm:$0xff] }
 0xad8   :  { %5105 = vmatmul.mubr.msk.f32.gmra.mrb[90].mxu1 %vm608_vm6, %v7345_v24  ;;  %v3724_v43 = vsub.f32 %v7130_v9, %v3706_v37  ;;  %v3715_v23 = vpop.xlane.xlu1 %3714 }
 0xad9   :  { %5752 = vpow2.f32 %v3730_v49  ;;  %v3727_v9 = vsub.f32 %v7139_v38, %v3715_v23  ;;  %v5394_v49 = vpack.c.bf16 %v278_v41, %v277_v18 }
 0xada   :  { %v7349_v17 = vpop.eup %5748  ;;  %v3734_v8 = vmul.f32 1.442695, %v3724_v43  ;;  %5754 = vpow2.f32 %v3732_v29  ;;  %v279_v43 = vld [vmem:[%s7866_s3 + $0x30] sm:$0xff] }
 0xadb   :  { %v7352_v7 = vpop.eup %5750  ;;  %v3712_v46 = vpop.xlane.xlu0 %3711  ;;  %5107 = vmatprep.mubr.msk.f32.mxu1 %vm608_vm6, %v7349_v17  ;;  %5395 = vmatprep.subr.bf16.mxu0 %v5394_v49 }
 0xadc   :  { %5108 = vmatmul.mubr.msk.f32.gmra.mrb[92].mxu1 %vm608_vm6, %v7352_v7  ;;  %v3726_v42 = vsub.f32 %v7147_v10, %v3712_v46  ;;  %5756 = vpow2.f32 %v3734_v8  ;;  %v3721_v15 = vpop.xlane.xlu1 %3720  ;;  %v3740_v10 = vmul.f32 1.442695, %v3727_v9  ;;  %5397 = vmatpush3.bf16.msra.mxu0 %v5394_v49  ;;  %v280_v46 = vld [vmem:[%s7866_s3 + $0x38] sm:$0xff]  ;;  %v7970_v49 = vld [vmem:[#allocation22_spill] sm:$0xff] }
 0xadd   :  { %5758 = vpow2.f32 %v3736_v60  ;;  %v3729_v4 = vsub.f32 %v7162_v1, %v3721_v15  ;;  %v5398_v23 = vpack.c.bf16 %v280_v46, %v279_v43  ;;  %v7971_v43 = vld [vmem:[#allocation37_spill] sm:$0xff] }
 0xade   :  { %v3738_v16 = vmul.f32 1.442695, %v3726_v42  ;;  %v7965_v42 = vld [vmem:[#allocation21_spill] sm:$0xff] }
 0xadf   :  { %v3718_v14 = vpop.xlane.xlu0 %3717  ;;  %v3744_v38 = vmul.f32 1.442695, %v3729_v4  ;;  %5399 = vmatprep.subr.bf16.mxu0 %v5398_v23 }
 0xae0   :  { %v3728_v12 = vsub.f32 %v7171_v47, %v3718_v14  ;;  %5760 = vpow2.f32 %v3738_v16  ;;  %v3779_v5 = vpop.permute.xlu1 %3778  ;;  %5401 = vmatpush3.bf16.msra.mxu0 %v5398_v23 }
 0xae1   :  { %5762 = vpow2.f32 %v3740_v10  ;;  %v7967_v10 = vld [vmem:[#allocation29_spill] sm:$0xff] }
 0xae2   :  { %v3742_v25 = vmul.f32 1.442695, %v3728_v12  ;;  %v7966_v12 = vld [vmem:[#allocation20_spill] sm:$0xff] }
 0xae3   :  { %v7361_v11 = vpop.eup %5752  ;;  %v5637_v54 = vpop.permute.xlu0 %5636 }
 0xae4   :  { %v5639_v32 = vunpack.i.h.bf16 %v5637_v54  ;;  %v5638_v20 = vunpack.i.l.bf16 %v5637_v54  ;;  %5142 = vmatprep.mubr.msk.f32.mxu1 %vm608_vm6, %v7361_v11  ;;  %v7368_v31 = vpop.eup %5754  ;;  %5764 = vpow2.f32 %v3742_v25 }
 0xae5   :  { %5766 = vpow2.f32 %v3744_v38 }
 0xae6   :  { %v5382_v34 = vpack.c.bf16 %v5639_v32, %v5638_v20  ;;  %v7370_v47 = vpop.eup %5756 }
 0xae7   :  { %v7376_v1 = vpop.eup %5758 }
 0xae8   :  { %5383 = vmatprep.subr.bf16.mxu1 %v5382_v34 }
 0xae9   :  { %5385 = vmatpush3.bf16.msra.mxu1 %v5382_v34 }
 0xaea   :  { %5140 = vmatprep.subr.mxu1 %v3779_v5  ;;  %v7378_v53 = vpop.eup %5760 }
 0xaeb   :  { %v7384_v40 = vpop.eup %5762 }
 0xaed   :  { %5141 = vmatpush3.msra.mxu1 %v3779_v5 }
 0xaee   :  { %5143 = vmatmul.mubr.msk.f32.vlgmr.msra.gmra.mrb[94].mxu1 %vm608_vm6, %v7368_v31  ;;  %v7386_v26 = vpop.eup %5764 }
 0xaef   :  { %5145 = vmatprep.mubr.msk.f32.mxu1 %vm608_vm6, %v7370_v47  ;;  %v7392_v58 = vpop.eup %5766 }
 0xaf2   :  { %5146 = vmatmul.mubr.msk.f32.gmra.mrb[96].mxu1 %vm608_vm6, %v7376_v1 }
 0xaf3   :  { %5148 = vmatprep.mubr.msk.f32.mxu1 %vm608_vm6, %v7378_v53 }
 0xaf6   :  { %5149 = vmatmul.mubr.msk.f32.gmra.mrb[98].mxu1 %vm608_vm6, %v7384_v40 }
 0xaf7   :  { %5151 = vmatprep.mubr.msk.f32.mxu1 %vm608_vm6, %v7386_v26 }
 0xafa   :  { %5152 = vmatmul.mubr.msk.f32.gmra.mrb[100].mxu1 %vm608_vm6, %v7392_v58 }
 0xb11   :  { %v1064_v21 = vpop.xlane.xlu1 %1063 }
 0xb12   :  { %5768 = vrcp.f32 %v1064_v21 }
 0xb14   :  { %v1067_v48 = vpop.xlane.xlu0 %1066 }
 0xb15   :  { %5770 = vrcp.f32 %v1067_v48  ;;  %v1469_v33 = vpop.xlane.xlu1 %1468  ;;  %v7408_v45 = vpop.f32.mrb[70].mxu1 }
 0xb16   :  { %5772 = vrcp.f32 %v1469_v33  ;;  %v7410_v30 = vpop.f32.mrb[71].mxu1 }
 0xb18   :  { %v1877_v37 = vpop.xlane.xlu0 %1876 }
 0xb19   :  { %5774 = vrcp.f32 %v1877_v37  ;;  %v1472_v55 = vpop.xlane.xlu1 %1471 }
 0xb1a   :  { %5776 = vrcp.f32 %v1472_v55 }
 0xb1c   :  { %v5769_v29 = vpop.eup %5768  ;;  %v1073_v3 = vpop.xlane.xlu0 %1072 }
 0xb1d   :  { %5778 = vrcp.f32 %v1073_v3  ;;  %v1874_v8 = vpop.xlane.xlu1 %1873  ;;  %v7424_v14 = vpop.f32.mrb[72].mxu1  ;;  %v1238_v60 = vmul.f32 %v5769_v29, %v7965_v42 }
 0xb1e   :  { %5780 = vrcp.f32 %v1874_v8  ;;  %v7427_v9 = vpop.f32.mrb[73].mxu1  ;;  %v7972_v8 = vld [vmem:[#allocation23_spill] sm:$0xff] }
 0xb1f   :  { %v5771_v15 = vpop.eup %5770  ;;  %2064 = vrot.lane.b32.xlu1 %v1238_v60, %s5938_s12 }
 0xb20   :  { %v5773_v54 = vpop.eup %5772  ;;  %v1478_v16 = vpop.xlane.xlu0 %1477  ;;  %v1239_v32 = vmul.f32 %v5771_v15, %v7966_v12 }
 0xb21   :  { %v1070_v20 = vpop.xlane.xlu1 %1069  ;;  %v7431_v34 = vpop.f32.mrb[74].mxu1  ;;  %v1643_v4 = vmul.f32 %v5773_v54, %v7967_v10 }
 0xb22   :  { %5782 = vrcp.f32 %v1070_v20  ;;  %2066 = vrot.lane.b32.xlu0 %v1239_v32, %s5938_s12  ;;  %v7435_v25 = vpop.f32.mrb[75].mxu1 }
 0xb23   :  { %v5775_v5 = vpop.eup %5774  ;;  %2096 = vrot.lane.b32.xlu1 %v1643_v4, %s5936_s10 }
 0xb24   :  { %v5777_v38 = vpop.eup %5776  ;;  %v1883_v44 = vpop.xlane.xlu0 %1882  ;;  %v2049_v6 = vmul.f32 %v5775_v5, %v7968_v56  ;;  %v7974_v5 = vld [vmem:[#allocation30_spill] sm:$0xff] }
 0xb25   :  { %v1475_v21 = vpop.xlane.xlu1 %1474  ;;  %v7439_v2 = vpop.f32.mrb[76].mxu1  ;;  %v1644_v61 = vmul.f32 %v5777_v38, %v7969_v13 }
 0xb26   :  { %5784 = vrcp.f32 %v1475_v21  ;;  %v7442_v48 = vpop.f32.mrb[77].mxu1 }
 0xb27   :  { %v5779_v33 = vpop.eup %5778  ;;  %2130 = vrot.lane.b32.xlu1 %v2049_v6, %s5933_s8  ;;  %2098 = vrot.lane.b32.xlu0 %v1644_v61, %s5936_s10  ;;  %5786 = vrcp.f32 %v1478_v16  ;;  %v7973_v16 = vld [vmem:[#allocation31_spill] sm:$0xff] }
 0xb28   :  { %v5781_v18 = vpop.eup %5780  ;;  %v1079_v41 = vpop.xlane.xlu0 %1078  ;;  %v1241_v37 = vmul.f32 %v5779_v33, %v7970_v49  ;;  %v7976_v33 = vld [vmem:[#allocation38_spill] sm:$0xff] }
 0xb29   :  { %v1880_v55 = vpop.xlane.xlu1 %1879  ;;  %v2048_v46 = vmul.f32 %v5781_v18, %v7971_v43 }
 0xb2a   :  { %5788 = vrcp.f32 %v1880_v55 }
 0xb2b   :  { %2070 = vrot.lane.b32.xlu1 %v1241_v37, %s5938_s12  ;;  %2128 = vrot.lane.b32.xlu0 %v2048_v46, %s5933_s8  ;;  %5790 = vrcp.f32 %v1883_v44  ;;  %v7975_v44 = vld [vmem:[#allocation39_spill] sm:$0xff] }
 0xb2c   :  { %v5783_v23 = vpop.eup %5782  ;;  %v1484_v29 = vpop.xlane.xlu0 %1483 }
 0xb2d   :  { %v1076_v3 = vpop.xlane.xlu1 %1075  ;;  %v1240_v42 = vmul.f32 %v5783_v23, %v7972_v8  ;;  %v7978_v23 = vld [vmem:[#allocation24_spill] sm:$0xff] }
 0xb2e   :  { %5792 = vrcp.f32 %v1076_v3  ;;  %v7979_v3 = vld [vmem:[#allocation33_spill] sm:$0xff] }
 0xb2f   :  { %2068 = vrot.lane.b32.xlu0 %v1240_v42, %s5938_s12  ;;  %5794 = vrcp.f32 %v1079_v41  ;;  %v7977_v41 = vld [vmem:[#allocation25_spill] sm:$0xff] }
 0xb30   :  { %v5785_v60 = vpop.eup %5784  ;;  %v1889_v15 = vpop.xlane.xlu0 %1888 }
 0xb31   :  { %v1481_v54 = vpop.xlane.xlu1 %1480  ;;  %v1645_v12 = vmul.f32 %v5785_v60, %v7973_v16  ;;  %v5787_v32 = vpop.eup %5786  ;;  %v7980_v16 = vld [vmem:[#allocation32_spill] sm:$0xff] }
 0xb32   :  { %5796 = vrcp.f32 %v1481_v54  ;;  %v1646_v38 = vmul.f32 %v5787_v32, %v7974_v5  ;;  %v7981_v32 = vld [vmem:[#allocation41_spill] sm:$0xff] }
 0xb33   :  { %2100 = vrot.lane.b32.xlu1 %v1645_v12, %s5936_s10  ;;  %5798 = vrcp.f32 %v1484_v29 }
 0xb34   :  { %v5789_v20 = vpop.eup %5788  ;;  %v7454_v10 = vpop.xlane.xlu0 %1084 }
 0xb35   :  { %v1886_v4 = vpop.xlane.xlu1 %1885  ;;  %v2050_v56 = vmul.f32 %v5789_v20, %v7975_v44  ;;  %v5791_v6 = vpop.eup %5790  ;;  %v7982_v44 = vld [vmem:[#allocation34_spill] sm:$0xff] }
 0xb36   :  { %5800 = vrcp.f32 %v1886_v4  ;;  %v2051_v18 = vmul.f32 %v5791_v6, %v7976_v33 }
 0xb37   :  { %2102 = vrot.lane.b32.xlu1 %v1646_v38, %s5936_s10  ;;  %2132 = vrot.lane.b32.xlu0 %v2050_v56, %s5933_s8  ;;  %5802 = vrcp.f32 %v1889_v15 }
 0xb38   :  { %v5793_v21 = vpop.eup %5792  ;;  %v1490_v13 = vpop.xlane.xlu0 %1489 }
 0xb39   :  { %5804 = vrcp.f32 %v1490_v13  ;;  %v7460_v61 = vpop.xlane.xlu1 %1081  ;;  %v1242_v49 = vmul.f32 %v5793_v21, %v7977_v41  ;;  %v5795_v37 = vpop.eup %5794  ;;  %v7983_v21 = vld [vmem:[#allocation40_spill] sm:$0xff]  ;;  %v7984_v41 = vld [vmem:[#allocation42_spill] sm:$0xff] }
 0xb3a   :  { %v1243_v29 = vmul.f32 %v5795_v37, %v7978_v23 }
 0xb3b   :  { %2134 = vrot.lane.b32.xlu1 %v2051_v18, %s5933_s8  ;;  %2072 = vrot.lane.b32.xlu0 %v1242_v49, %s5938_s12 }
 0xb3c   :  { %v5797_v55 = vpop.eup %5796  ;;  %v1895_v43 = vpop.xlane.xlu0 %1894 }
 0xb3d   :  { %5806 = vrcp.f32 %v1895_v43  ;;  %v7466_v46 = vpop.xlane.xlu1 %1486  ;;  %v1647_v8 = vmul.f32 %v5797_v55, %v7979_v3  ;;  %v5799_v42 = vpop.eup %5798 }
 0xb3e   :  { %v1648_v12 = vmul.f32 %v5799_v42, %v7980_v16  ;;  %v7985_v16 = vld [vmem:[#allocation18_spill] sm:$0xff] }
 0xb3f   :  { %2074 = vrot.lane.b32.xlu1 %v1243_v29, %s5938_s12  ;;  %2104 = vrot.lane.b32.xlu0 %v1647_v8, %s5936_s10 }
 0xb40   :  { %v5801_v60 = vpop.eup %5800  ;;  %v7472_v15 = vpop.xlane.xlu0 %661 }
 0xb41   :  { %v7474_v54 = vpop.xlane.xlu1 %1891  ;;  %v2052_v20 = vmul.f32 %v5801_v60, %v7981_v32  ;;  %v5803_v4 = vpop.eup %5802 }
 0xb42   :  { %v2053_v13 = vmul.f32 %v5803_v4, %v7983_v21  ;;  %v7986_v21 = vld [vmem:[#allocation19_spill] sm:$0xff] }
 0xb43   :  { %v5805_v5 = vpop.eup %5804  ;;  %2106 = vrot.lane.b32.xlu1 %v1648_v12, %s5936_s10  ;;  %2136 = vrot.lane.b32.xlu0 %v2052_v20, %s5933_s8 }
 0xb44   :  { %v7480_v38 = vpop.xlane.xlu0 %667  ;;  %v7483_v56 = vmul.f32 %v5805_v5, %v7982_v44 }
 0xb45   :  { %v7485_v6 = vpop.xlane.xlu1 %658 }
 0xb47   :  { %v5807_v33 = vpop.eup %5806  ;;  %2138 = vrot.lane.b32.xlu1 %v2053_v13, %s5933_s8 }
 0xb48   :  { %v7489_v18 = vpop.xlane.xlu0 %673  ;;  %v7492_v49 = vmul.f32 %v5807_v33, %v7984_v41 }
 0xb49   :  { %v7494_v37 = vpop.xlane.xlu1 %664 }
 0xb4c   :  { %v680_v55 = vpop.xlane.xlu0 %679 }
 0xb4d   :  { %5808 = vrcp.f32 %v680_v55  ;;  %v7496_v43 = vpop.xlane.xlu1 %670 }
 0xb50   :  { %v2536_v23 = vpop.xlane.xlu0 %2535 }
 0xb51   :  { %5810 = vrcp.f32 %v2536_v23  ;;  %v677_v29 = vpop.xlane.xlu1 %676  ;;  %v2552_v23 = vsel %vm608_vm6, %v7183_v19, 0.0  ;;  %v2945_v19 = vsel %vm608_vm6, %v7282_v62, 0.0  ;;  %v2942_v62 = vsel %vm608_vm6, %v7273_v28, 0.0 }
 0xb52   :  { %5812 = vrcp.f32 %v677_v29  ;;  %v3356_v28 = vsel %vm608_vm6, %v7345_v24, 0.0  ;;  %v3353_v24 = vsel %vm608_vm6, %v7336_v36, 0.0  ;;  %v3746_v36 = vsel %vm608_vm6, %v7361_v11, 0.0 }
 0xb53   :  { %v3758_v11 = vsel %vm608_vm6, %v7378_v53, 0.0 }
 0xb54   :  { %v2542_v3 = vpop.xlane.xlu0 %2541 }
 0xb55   :  { %5814 = vrcp.f32 %v2542_v3  ;;  %v2533_v8 = vpop.xlane.xlu1 %2532 }
 0xb56   :  { %5816 = vrcp.f32 %v2533_v8 }
 0xb57   :  { %v5809_v42 = vpop.eup %5808 }
 0xb58   :  { %v2548_v60 = vpop.xlane.xlu0 %2547  ;;  %v7499_v12 = vmul.f32 %v5809_v42, %v7985_v16  ;;  %v2939_v42 = vsel %vm608_vm6, %v7257_v35, 0.0  ;;  %v2549_v16 = vsel %vm608_vm6, %v7177_v27, 0.0  ;;  %v2936_v35 = vsel %vm608_vm6, %v7253_v0, 0.0 }
 0xb59   :  { %5818 = vrcp.f32 %v2548_v60  ;;  %v2539_v32 = vpop.xlane.xlu1 %2538  ;;  %v3344_v27 = vsel %vm608_vm6, %v7326_v50, 0.0  ;;  %v3350_v0 = vsel %vm608_vm6, %v7332_v22, 0.0  ;;  %v3341_v50 = vsel %vm608_vm6, %v7315_v57, 0.0 }
 0xb5a   :  { %5820 = vrcp.f32 %v2539_v32  ;;  %v3347_v22 = vsel %vm608_vm6, %v7334_v63, 0.0  ;;  %v3755_v57 = vsel %vm608_vm6, %v7376_v1, 0.0 }
 0xb5b   :  { %v5811_v20 = vpop.eup %5810 }
 0xb5c   :  { %v5813_v4 = vpop.eup %5812  ;;  %v7502_v5 = vmul.f32 %v5811_v20, %v7408_v45 }
 0xb5d   :  { %v2545_v44 = vpop.xlane.xlu1 %2544  ;;  %v7505_v13 = vmul.f32 %v5813_v4, %v7986_v21 }
 0xb5e   :  { %5822 = vrcp.f32 %v2545_v44 }
 0xb5f   :  { %v5815_v33 = vpop.eup %5814  ;;  %5824 = vrcp.f32 %v7472_v15  ;;  %v3752_v15 = vsel %vm608_vm6, %v7370_v47, 0.0  ;;  %v7987_v47 = vld [vmem:[#allocation12_spill] sm:$0xff] }
 0xb60   :  { %v5817_v41 = vpop.eup %5816  ;;  %v7508_v55 = vmul.f32 %v5815_v33, %v7424_v14  ;;  %5826 = vrcp.f32 %v7485_v6 }
 0xb61   :  { %v7513_v29 = vmul.f32 %v5817_v41, %v7410_v30  ;;  %5828 = vrcp.f32 %v7454_v10  ;;  %v7988_v41 = vld [vmem:[#allocation13_spill] sm:$0xff] }
 0xb62   :  { %2553 = vadd.xlane.f32.xlu0 %v2552_v23  ;;  %5830 = vrcp.f32 %v7460_v61 }
 0xb63   :  { %v5819_v3 = vpop.eup %5818  ;;  %5832 = vrcp.f32 %v7494_v37 }
 0xb64   :  { %v5821_v45 = vpop.eup %5820  ;;  %v7516_v8 = vmul.f32 %v5819_v3, %v7431_v34  ;;  %v2951_v34 = vsel %vm608_vm6, %v7290_v59, 0.0  ;;  %v2948_v59 = vsel %vm608_vm6, %v7277_v52, 0.0  ;;  %v3362_v52 = vsel %vm608_vm6, %v7352_v7, 0.0 }
 0xb65   :  { %v7521_v60 = vmul.f32 %v5821_v45, %v7427_v9  ;;  %v2957_v9 = vsel %vm608_vm6, %v7308_v39, 0.0  ;;  %v2954_v39 = vsel %vm608_vm6, %v7311_v51, 0.0  ;;  %v3749_v51 = vsel %vm608_vm6, %v7368_v31, 0.0 }
 0xb66   :  { %2940 = vadd.xlane.f32.xlu0 %v2939_v42  ;;  %v3359_v7 = vsel %vm608_vm6, %v7349_v17, 0.0  ;;  %v3761_v31 = vsel %vm608_vm6, %v7384_v40, 0.0  ;;  %v3767_v17 = vsel %vm608_vm6, %v7392_v58, 0.0  ;;  %5834 = vrcp.f32 %v7466_v46 }
 0xb67   :  { %5836 = vrcp.f32 %v7480_v38 }
 0xb68   :  { %v5823_v14 = vpop.eup %5822  ;;  %5838 = vrcp.f32 %v7474_v54 }
 0xb69   :  { %v7526_v30 = vmul.f32 %v5823_v14, %v7435_v25  ;;  %v5825_v4 = vpop.eup %5824  ;;  %5840 = vrcp.f32 %v7496_v43 }
 0xb6a   :  { %2946 = vadd.xlane.f32.xlu0 %v2945_v19  ;;  %v5827_v44 = vpop.eup %5826  ;;  %v834_v21 = vmul.f32 %v5825_v4, %v7987_v47  ;;  %5842 = vrcp.f32 %v7489_v18 }
 0xb6b   :  { %2550 = vadd.xlane.f32.xlu1 %v2549_v16  ;;  %v833_v23 = vmul.f32 %v5827_v44, %v7988_v41 }
 0xb6e   :  { %2952 = vadd.xlane.f32.xlu0 %v2951_v34  ;;  %v5829_v34 = vpop.eup %5828 }
 0xb6f   :  { %2937 = vadd.xlane.f32.xlu1 %v2936_v35  ;;  %v5831_v38 = vpop.eup %5830 }
 0xb72   :  { %2958 = vadd.xlane.f32.xlu0 %v2957_v9  ;;  %v5833_v9 = vpop.eup %5832 }
 0xb73   :  { %2943 = vadd.xlane.f32.xlu1 %v2942_v62 }
 0xb76   :  { %3345 = vadd.xlane.f32.xlu0 %v3344_v27 }
 0xb77   :  { %2949 = vadd.xlane.f32.xlu1 %v2948_v59 }
 0xb7a   :  { %3351 = vadd.xlane.f32.xlu0 %v3350_v0 }
 0xb7b   :  { %2955 = vadd.xlane.f32.xlu1 %v2954_v39  ;;  %v5835_v39 = vpop.eup %5834 }
 0xb7e   :  { %3357 = vadd.xlane.f32.xlu0 %v3356_v28  ;;  %v7989_v28 = vld [vmem:[#allocation15_spill] sm:$0xff] }
 0xb7f   :  { %3342 = vadd.xlane.f32.xlu1 %v3341_v50  ;;  %v835_v50 = vmul.f32 %v5833_v9, %v7989_v28 }
 0xb82   :  { %3363 = vadd.xlane.f32.xlu0 %v3362_v52  ;;  %v7990_v52 = vld [vmem:[#allocation26_spill] sm:$0xff] }
 0xb83   :  { %3348 = vadd.xlane.f32.xlu1 %v3347_v22  ;;  %v1245_v22 = vmul.f32 %v5829_v34, %v7990_v52 }
 0xb86   :  { %3750 = vadd.xlane.f32.xlu0 %v3749_v51  ;;  %v7991_v51 = vld [vmem:[#allocation27_spill] sm:$0xff] }
 0xb87   :  { %3354 = vadd.xlane.f32.xlu1 %v3353_v24  ;;  %v1244_v24 = vmul.f32 %v5831_v38, %v7991_v51 }
 0xb8a   :  { %3756 = vadd.xlane.f32.xlu0 %v3755_v57  ;;  %v5837_v57 = vpop.eup %5836 }
 0xb8b   :  { %3360 = vadd.xlane.f32.xlu1 %v3359_v7 }
 0xb8c   :  { %v7563_v63 = vpop.f32.mrb[78].mxu1 }
 0xb8d   :  { %v7568_v25 = vpop.f32.mrb[79].mxu1 }
 0xb8e   :  { %3762 = vadd.xlane.f32.xlu0 %v3761_v31 }
 0xb8f   :  { %3747 = vadd.xlane.f32.xlu1 %v3746_v36 }
 0xb91   :  { %v2065_v1 = vpop.permute.xlu1 %2064 }
 0xb92   :  { %3768 = vadd.xlane.f32.xlu0 %v3767_v17  ;;  %v2152_v10 = vsel %vm455_vm3, %v833_v23, %v2065_v1  ;;  %v7992_v17 = vld [vmem:[#allocation14_spill] sm:$0xff] }
 0xb93   :  { %3753 = vadd.xlane.f32.xlu1 %v3752_v15  ;;  %v836_v15 = vmul.f32 %v5837_v57, %v7992_v17 }
 0xb94   :  { %v7576_v6 = vpop.f32.mrb[80].mxu1  ;;  %v2067_v32 = vpop.permute.xlu0 %2066 }
 0xb95   :  { %v2097_v40 = vpop.permute.xlu1 %2096  ;;  %v7578_v20 = vpop.f32.mrb[81].mxu1  ;;  %v2153_v45 = vsel %vm455_vm3, %v834_v21, %v2067_v32 }
 0xb96   :  { %v2160_v37 = vsel %vm58_vm0, %v2152_v10, %v2097_v40  ;;  %v7993_v40 = vld [vmem:[#allocation35_spill] sm:$0xff] }
 0xb97   :  { %3759 = vadd.xlane.f32.xlu1 %v3758_v11  ;;  %v1649_v4 = vmul.f32 %v5835_v39, %v7993_v40  ;;  %v5839_v11 = vpop.eup %5838  ;;  %v7996_v39 = vld [vmem:[#allocation16_spill] sm:$0xff] }
 0xb98   :  { %v7584_v58 = vpop.f32.mrb[82].mxu1  ;;  %v5841_v10 = vpop.eup %5840 }
 0xb99   :  { %v2099_v33 = vpop.permute.xlu0 %2098  ;;  %v7589_v3 = vpop.f32.mrb[83].mxu1 }
 0xb9a   :  { %v2131_v53 = vpop.permute.xlu1 %2130  ;;  %v2161_v61 = vsel %vm58_vm0, %v2153_v45, %v2099_v33  ;;  %v7994_v45 = vld [vmem:[#allocation43_spill] sm:$0xff] }
 0xb9b   :  { %v2170_v19 = vsel %vm2168_vm7, %v2161_v61, %v2131_v53  ;;  %v2054_v53 = vmul.f32 %v5839_v11, %v7994_v45 }
 0xb9d   :  { %v2129_v42 = vpop.permute.xlu0 %2128 }
 0xb9e   :  { %v2169_v14 = vsel %vm2168_vm7, %v2160_v37, %v2129_v42  ;;  %v2071_v35 = vpop.permute.xlu1 %2070 }
 0xb9f   :  { %5170 = vmatprep.mubr.msk.f32.mxu0 %vm333_vm2, %v2169_v14  ;;  %v7600_v16 = vpop.f32.mrb[84].mxu1  ;;  %v2155_v47 = vsel %vm455_vm3, %v836_v15, %v2071_v35  ;;  %v5843_v35 = vpop.eup %5842  ;;  %v3764_v15 = vsel %vm608_vm6, %v7386_v26, 0.0 }
 0xba0   :  { %5171 = vmatmul.mubr.msk.f32.vlgmr.msra.gmra.mrb[78].mxu0 %vm333_vm2, %v2170_v19  ;;  %v7603_v46 = vpop.f32.mrb[85].mxu1  ;;  %v7995_v19 = vld [vmem:[#allocation17_spill] sm:$0xff]  ;;  %v838_v28 = vmul.f32 %v5843_v35, %v7996_v39 }
 0xba1   :  { %v2069_v59 = vpop.permute.xlu0 %2068  ;;  %v837_v34 = vmul.f32 %v5841_v10, %v7995_v19 }
 0xba2   :  { %v2154_v7 = vsel %vm455_vm3, %v835_v50, %v2069_v59 }
 0xba3   :  { %v7606_v62 = vpop.f32.mrb[86].mxu1 }
 0xba4   :  { %v7608_v27 = vpop.f32.mrb[87].mxu1 }
 0xba5   :  { %v2101_v0 = vpop.permute.xlu1 %2100 }
 0xba6   :  { %v2162_v43 = vsel %vm58_vm0, %v2154_v7, %v2101_v0 }
 0xba7   :  { %v7614_v54 = vpop.f32.mrb[88].mxu1 }
 0xba8   :  { %2078 = vrot.lane.b32.xlu1 %v1245_v22, %s5938_s12  ;;  %2076 = vrot.lane.b32.xlu0 %v1244_v24, %s5938_s12  ;;  %v7619_v31 = vpop.f32.mrb[89].mxu1 }
 0xba9   :  { %v2133_v36 = vpop.permute.xlu0 %2132  ;;  %v2103_v1 = vpop.permute.xlu1 %2102 }
 0xbaa   :  { %v2171_v32 = vsel %vm2168_vm7, %v2162_v43, %v2133_v36  ;;  %v2163_v21 = vsel %vm58_vm0, %v2155_v47, %v2103_v1 }
 0xbab   :  { %5173 = vmatprep.mubr.msk.f32.mxu0 %vm333_vm2, %v2171_v32  ;;  %v7627_v44 = vpop.f32.mrb[90].mxu1 }
 0xbac   :  { %2108 = vrot.lane.b32.xlu0 %v1649_v4, %s5936_s10  ;;  %v7631_v18 = vpop.f32.mrb[91].mxu1 }
 0xbad   :  { %v2073_v33 = vpop.permute.xlu0 %2072  ;;  %v2135_v41 = vpop.permute.xlu1 %2134 }
 0xbae   :  { %v2172_v23 = vsel %vm2168_vm7, %v2163_v21, %v2135_v41  ;;  %v2156_v38 = vsel %vm455_vm3, %v837_v34, %v2073_v33 }
 0xbaf   :  { %5174 = vmatmul.mubr.msk.f32.gmra.mrb[80].mxu0 %vm333_vm2, %v2172_v23  ;;  %v7637_v61 = vpop.f32.mrb[92].mxu1 }
 0xbb0   :  { %2140 = vrot.lane.b32.xlu0 %v2054_v53, %s5933_s8  ;;  %v7640_v37 = vpop.f32.mrb[93].mxu1 }
 0xbb1   :  { %v2105_v42 = vpop.permute.xlu0 %2104  ;;  %v2075_v14 = vpop.permute.xlu1 %2074 }
 0xbb2   :  { %v2164_v9 = vsel %vm58_vm0, %v2156_v38, %v2105_v42  ;;  %v2157_v52 = vsel %vm455_vm3, %v838_v28, %v2075_v14 }
 0xbb5   :  { %v2137_v59 = vpop.permute.xlu0 %2136  ;;  %v2107_v0 = vpop.permute.xlu1 %2106 }
 0xbb6   :  { %v2173_v50 = vsel %vm2168_vm7, %v2164_v9, %v2137_v59  ;;  %v2165_v22 = vsel %vm58_vm0, %v2157_v52, %v2107_v0 }
 0xbb7   :  { %5176 = vmatprep.mubr.msk.f32.mxu0 %vm333_vm2, %v2173_v50 }
 0xbb9   :  { %v2139_v51 = vpop.permute.xlu1 %2138 }
 0xbba   :  { %v2174_v24 = vsel %vm2168_vm7, %v2165_v22, %v2139_v51 }
 0xbbb   :  { %5177 = vmatmul.mubr.msk.f32.gmra.mrb[82].mxu0 %vm333_vm2, %v2174_v24 }
 0xbc1   :  { %v7652_v57 = vpop.f32.mrb[94].mxu1 }
 0xbc2   :  { %v7654_v7 = vpop.f32.mrb[95].mxu1 }
 0xbc5   :  { %v7656_v43 = vpop.f32.mrb[96].mxu1 }
 0xbc6   :  { %v7658_v36 = vpop.f32.mrb[97].mxu1 }
 0xbc9   :  { %v7660_v1 = vpop.f32.mrb[98].mxu1 }
 0xbca   :  { %v7662_v17 = vpop.f32.mrb[99].mxu1 }
 0xbcc   :  { %3765 = vadd.xlane.f32.xlu1 %v3764_v15 }
 0xbcd   :  { %v7666_v32 = vpop.f32.mrb[100].mxu1 }
 0xbce   :  { %v7668_v40 = vpop.f32.mrb[101].mxu1 }
 0xbdd   :  { %2110 = vrot.lane.b32.xlu1 %v7483_v56, %s5936_s10 }
 0xbe1   :  { %2142 = vrot.lane.b32.xlu1 %v7492_v49, %s5933_s8 }
 0xbef   :  { %v2554_v4 = vpop.xlane.xlu0 %2553 }
 0xbf0   :  { %5844 = vrcp.f32 %v2554_v4 }
 0xbf3   :  { %v2941_v11 = vpop.xlane.xlu0 %2940 }
 0xbf4   :  { %5846 = vrcp.f32 %v2941_v11 }
 0xbf7   :  { %v2947_v47 = vpop.xlane.xlu0 %2946 }
 0xbf8   :  { %5848 = vrcp.f32 %v2947_v47  ;;  %v2551_v21 = vpop.xlane.xlu1 %2550 }
 0xbf9   :  { %5850 = vrcp.f32 %v2551_v21 }
 0xbfa   :  { %v5845_v26 = vpop.eup %5844 }
 0xbfb   :  { %v2953_v33 = vpop.xlane.xlu0 %2952  ;;  %v7675_v41 = vmul.f32 %v5845_v26, %v7439_v2 }
 0xbfc   :  { %5852 = vrcp.f32 %v2953_v33  ;;  %v2938_v23 = vpop.xlane.xlu1 %2937 }
 0xbfd   :  { %5854 = vrcp.f32 %v2938_v23 }
 0xbfe   :  { %v5847_v56 = vpop.eup %5846 }
 0xbff   :  { %v2959_v45 = vpop.xlane.xlu0 %2958  ;;  %v3113_v49 = vmul.f32 %v5847_v56, %v7563_v63 }
 0xc00   :  { %5856 = vrcp.f32 %v2959_v45  ;;  %v2944_v53 = vpop.xlane.xlu1 %2943 }
 0xc01   :  { %5858 = vrcp.f32 %v2944_v53  ;;  %3940 = vrot.lane.b32.xlu1 %v3113_v49, %s5938_s12 }
 0xc02   :  { %v5849_v10 = vpop.eup %5848 }
 0xc03   :  { %v5851_v42 = vpop.eup %5850  ;;  %v3346_v14 = vpop.xlane.xlu0 %3345  ;;  %v3115_v19 = vmul.f32 %v5849_v10, %v7576_v6 }
 0xc04   :  { %5860 = vrcp.f32 %v3346_v14  ;;  %v2950_v2 = vpop.xlane.xlu1 %2949  ;;  %v7681_v34 = vmul.f32 %v5851_v42, %v7442_v48 }
 0xc05   :  { %5862 = vrcp.f32 %v2950_v2  ;;  %3944 = vrot.lane.b32.xlu1 %v3115_v19, %s5938_s12 }
 0xc06   :  { %v5853_v35 = vpop.eup %5852 }
 0xc07   :  { %v5855_v63 = vpop.eup %5854  ;;  %v3352_v38 = vpop.xlane.xlu0 %3351  ;;  %v3117_v9 = vmul.f32 %v5853_v35, %v7584_v58 }
 0xc08   :  { %5864 = vrcp.f32 %v3352_v38  ;;  %v2956_v59 = vpop.xlane.xlu1 %2955  ;;  %v3112_v0 = vmul.f32 %v5855_v63, %v7568_v25 }
 0xc09   :  { %5866 = vrcp.f32 %v2956_v59  ;;  %3948 = vrot.lane.b32.xlu1 %v3117_v9, %s5938_s12 }
 0xc0a   :  { %v5857_v6 = vpop.eup %5856  ;;  %3938 = vrot.lane.b32.xlu0 %v3112_v0, %s5938_s12 }
 0xc0b   :  { %v5859_v48 = vpop.eup %5858  ;;  %v3358_v39 = vpop.xlane.xlu0 %3357  ;;  %v3119_v28 = vmul.f32 %v5857_v6, %v7600_v16 }
 0xc0c   :  { %5868 = vrcp.f32 %v3358_v39  ;;  %v3343_v50 = vpop.xlane.xlu1 %3342  ;;  %v3114_v52 = vmul.f32 %v5859_v48, %v7578_v20 }
 0xc0d   :  { %5870 = vrcp.f32 %v3343_v50  ;;  %3952 = vrot.lane.b32.xlu1 %v3119_v28, %s5938_s12 }
 0xc0e   :  { %v5861_v58 = vpop.eup %5860  ;;  %3942 = vrot.lane.b32.xlu0 %v3114_v52, %s5938_s12 }
 0xc0f   :  { %v5863_v25 = vpop.eup %5862  ;;  %v3364_v22 = vpop.xlane.xlu0 %3363  ;;  %v3518_v51 = vmul.f32 %v5861_v58, %v7606_v62 }
 0xc10   :  { %5872 = vrcp.f32 %v3364_v22  ;;  %v3349_v24 = vpop.xlane.xlu1 %3348  ;;  %v3116_v15 = vmul.f32 %v5863_v25, %v7589_v3 }
 0xc11   :  { %5874 = vrcp.f32 %v3349_v24  ;;  %3972 = vrot.lane.b32.xlu1 %v3518_v51, %s5936_s10 }
 0xc12   :  { %v5865_v16 = vpop.eup %5864  ;;  %3946 = vrot.lane.b32.xlu0 %v3116_v15, %s5938_s12 }
 0xc13   :  { %v5867_v20 = vpop.eup %5866  ;;  %v3751_v4 = vpop.xlane.xlu0 %3750  ;;  %v3520_v11 = vmul.f32 %v5865_v16, %v7614_v54 }
 0xc14   :  { %5876 = vrcp.f32 %v3751_v4  ;;  %v3355_v47 = vpop.xlane.xlu1 %3354  ;;  %v3118_v21 = vmul.f32 %v5867_v20, %v7603_v46 }
 0xc15   :  { %5878 = vrcp.f32 %v3355_v47  ;;  %3976 = vrot.lane.b32.xlu1 %v3520_v11, %s5936_s10 }
 0xc16   :  { %v5869_v62 = vpop.eup %5868  ;;  %3950 = vrot.lane.b32.xlu0 %v3118_v21, %s5938_s12 }
 0xc17   :  { %v5871_v3 = vpop.eup %5870  ;;  %v3757_v26 = vpop.xlane.xlu0 %3756  ;;  %v3522_v33 = vmul.f32 %v5869_v62, %v7627_v44 }
 0xc18   :  { %5880 = vrcp.f32 %v3757_v26  ;;  %v3361_v23 = vpop.xlane.xlu1 %3360  ;;  %v3517_v56 = vmul.f32 %v5871_v3, %v7608_v27 }
 0xc19   :  { %5882 = vrcp.f32 %v3361_v23  ;;  %3980 = vrot.lane.b32.xlu1 %v3522_v33, %s5936_s10 }
 0xc1a   :  { %v5873_v54 = vpop.eup %5872  ;;  %3970 = vrot.lane.b32.xlu0 %v3517_v56, %s5936_s10 }
 0xc1b   :  { %v5875_v46 = vpop.eup %5874  ;;  %v3763_v45 = vpop.xlane.xlu0 %3762  ;;  %v3524_v49 = vmul.f32 %v5873_v54, %v7637_v61 }
 0xc1c   :  { %5884 = vrcp.f32 %v3763_v45  ;;  %v3748_v53 = vpop.xlane.xlu1 %3747  ;;  %v3519_v10 = vmul.f32 %v5875_v46, %v7619_v31 }
 0xc1d   :  { %5886 = vrcp.f32 %v3748_v53  ;;  %3984 = vrot.lane.b32.xlu1 %v3524_v49, %s5936_s10 }
 0xc1e   :  { %v5877_v44 = vpop.eup %5876  ;;  %3974 = vrot.lane.b32.xlu0 %v3519_v10, %s5936_s10 }
 0xc1f   :  { %v5879_v27 = vpop.eup %5878  ;;  %v3769_v42 = vpop.xlane.xlu0 %3768  ;;  %v3923_v14 = vmul.f32 %v5877_v44, %v7652_v57 }
 0xc20   :  { %5888 = vrcp.f32 %v3769_v42  ;;  %v3754_v19 = vpop.xlane.xlu1 %3753  ;;  %v3521_v2 = vmul.f32 %v5879_v27, %v7631_v18 }
 0xc21   :  { %5890 = vrcp.f32 %v3754_v19  ;;  %4004 = vrot.lane.b32.xlu1 %v3923_v14, %s5933_s8 }
 0xc22   :  { %v5881_v61 = vpop.eup %5880  ;;  %3978 = vrot.lane.b32.xlu0 %v3521_v2, %s5936_s10 }
 0xc23   :  { %v5883_v31 = vpop.eup %5882  ;;  %v2077_v35 = vpop.permute.xlu0 %2076  ;;  %v3925_v63 = vmul.f32 %v5881_v61, %v7656_v43 }
 0xc24   :  { %v3760_v38 = vpop.xlane.xlu1 %3759  ;;  %v3523_v9 = vmul.f32 %v5883_v31, %v7640_v37  ;;  %v2158_v43 = vsel %vm455_vm3, %v7505_v13, %v2077_v35 }
 0xc25   :  { %5892 = vrcp.f32 %v3760_v38  ;;  %4008 = vrot.lane.b32.xlu1 %v3925_v63, %s5933_s8 }
 0xc26   :  { %v5885_v57 = vpop.eup %5884  ;;  %3982 = vrot.lane.b32.xlu0 %v3523_v9, %s5936_s10 }
 0xc27   :  { %v5887_v18 = vpop.eup %5886  ;;  %v2109_v59 = vpop.permute.xlu0 %2108  ;;  %v3927_v0 = vmul.f32 %v5885_v57, %v7660_v1 }
 0xc28   :  { %v3922_v6 = vmul.f32 %v5887_v18, %v7654_v7  ;;  %v2166_v39 = vsel %vm58_vm0, %v2158_v43, %v2109_v59  ;;  %v2079_v58 = vpop.permute.xlu1 %2078 }
 0xc29   :  { %4012 = vrot.lane.b32.xlu1 %v3927_v0, %s5933_s8 }
 0xc2a   :  { %v5889_v48 = vpop.eup %5888  ;;  %4002 = vrot.lane.b32.xlu0 %v3922_v6, %s5933_s8 }
 0xc2b   :  { %v5891_v37 = vpop.eup %5890  ;;  %v2141_v28 = vpop.permute.xlu0 %2140  ;;  %v3929_v50 = vmul.f32 %v5889_v48, %v7666_v32  ;;  %v2159_v32 = vsel %vm455_vm3, %v7499_v12, %v2079_v58 }
 0xc2c   :  { %v2175_v52 = vsel %vm2168_vm7, %v2166_v39, %v2141_v28  ;;  %v3924_v1 = vmul.f32 %v5891_v37, %v7658_v36 }
 0xc2d   :  { %5179 = vmatprep.mubr.msk.f32.mxu0 %vm333_vm2, %v2175_v52  ;;  %4016 = vrot.lane.b32.xlu1 %v3929_v50, %s5933_s8 }
 0xc2e   :  { %4006 = vrot.lane.b32.xlu0 %v3924_v1, %s5933_s8 }
 0xc2f   :  { %v5893_v7 = vpop.eup %5892 }
 0xc30   :  { %v3926_v13 = vmul.f32 %v5893_v7, %v7662_v17  ;;  %v7741_v17 = vld [vmem:[%s7867_s4] ss:$0 sm:$0xff] }
 0xc32   :  { %4010 = vrot.lane.b32.xlu0 %v3926_v13, %s5933_s8 }
 0xc59   :  { %v3766_v25 = vpop.xlane.xlu1 %3765 }
 0xc5a   :  { %5894 = vrcp.f32 %v3766_v25 }
 0xc5d   :  { %v2111_v22 = vpop.permute.xlu1 %2110 }
 0xc5e   :  { %v2167_v36 = vsel %vm58_vm0, %v2159_v32, %v2111_v22 }
 0xc61   :  { %v2143_v51 = vpop.permute.xlu1 %2142 }
 0xc62   :  { %v2176_v24 = vsel %vm2168_vm7, %v2167_v36, %v2143_v51 }
 0xc63   :  { %5180 = vmatmul.mubr.msk.f32.gmra.mrb[84].mxu0 %vm333_vm2, %v2176_v24 }
 0xc64   :  { %v5895_v15 = vpop.eup %5894 }
 0xc65   :  { %v3928_v16 = vmul.f32 %v5895_v15, %v7668_v40 }
 0xc67   :  { %4014 = vrot.lane.b32.xlu0 %v3928_v16, %s5933_s8 }
 0xc73   :  { %v5172_v20 = vpop.f32.mrb[78].mxu0  ;;  %v3941_v4 = vpop.permute.xlu1 %3940 }
 0xc74   :  { %v4177_v12 = vadd.f32 %v5172_v20, %v7741_v17  ;;  %v4171_v11 = vpop.f32.mrb[79].mxu0  ;;  %v4027_v18 = vsel %vm455_vm3, %v7502_v5, %v3941_v4 }
 0xc75   :  { %v4172_v47 = vadd.f32 %v7741_v17, %v4171_v11 }
 0xc76   :  { %4251 = vst.msk [vmem:[%s7868_s5 + $0x8] sm:$0xff] %vm58_vm0, %v4177_v12 }
 0xc77   :  { %4250 = vst.msk [vmem:[%s7868_s5] sm:$0xff] %vm58_vm0, %v4172_v47  ;;  %v3945_v40 = vpop.permute.xlu1 %3944 }
 0xc78   :  { %v4029_v5 = vsel %vm455_vm3, %v7508_v55, %v3945_v40 }
 0xc7b   :  { %v3949_v21 = vpop.permute.xlu1 %3948 }
 0xc7c   :  { %v3939_v62 = vpop.permute.xlu0 %3938  ;;  %v4031_v55 = vsel %vm455_vm3, %v7516_v8, %v3949_v21 }
 0xc7d   :  { %v4026_v57 = vsel %vm455_vm3, %v7513_v29, %v3939_v62 }
 0xc7f   :  { %v3953_v3 = vpop.permute.xlu1 %3952 }
 0xc80   :  { %v4033_v26 = vsel %vm455_vm3, %v7675_v41, %v3953_v3  ;;  %v3943_v33 = vpop.permute.xlu0 %3942 }
 0xc81   :  { %v4028_v39 = vsel %vm455_vm3, %v7521_v60, %v3943_v33 }
 0xc82   :  { %v5175_v23 = vpop.f32.mrb[80].mxu0 }
 0xc83   :  { %v4187_v56 = vadd.f32 %v5175_v23, %v7741_v17  ;;  %v4181_v54 = vpop.f32.mrb[81].mxu0  ;;  %v3973_v46 = vpop.permute.xlu1 %3972 }
 0xc84   :  { %v4182_v45 = vadd.f32 %v7741_v17, %v4181_v54  ;;  %v3947_v49 = vpop.permute.xlu0 %3946  ;;  %v4035_v6 = vsel %vm58_vm0, %v4027_v18, %v3973_v46 }
 0xc85   :  { %4253 = vst.msk [vmem:[%s7868_s5 + $0x18] sm:$0xff] %vm58_vm0, %v4187_v56  ;;  %v4030_v7 = vsel %vm455_vm3, %v7526_v30, %v3947_v49 }
 0xc86   :  { %4252 = vst.msk [vmem:[%s7868_s5 + $0x10] sm:$0xff] %vm58_vm0, %v4182_v45 }
 0xc87   :  { %v3977_v41 = vpop.permute.xlu1 %3976 }
 0xc88   :  { %v3951_v53 = vpop.permute.xlu0 %3950  ;;  %v4037_v50 = vsel %vm58_vm0, %v4029_v5, %v3977_v41 }
 0xc89   :  { %v4032_v10 = vsel %vm455_vm3, %v7681_v34, %v3951_v53 }
 0xc8b   :  { %v3981_v44 = vpop.permute.xlu1 %3980 }
 0xc8c   :  { %v3971_v27 = vpop.permute.xlu0 %3970  ;;  %v4039_v25 = vsel %vm58_vm0, %v4031_v55, %v3981_v44 }
 0xc8d   :  { %v4034_v59 = vsel %vm58_vm0, %v4026_v57, %v3971_v27 }
 0xc8e   :  { %v5178_v42 = vpop.f32.mrb[82].mxu0 }
 0xc8f   :  { %v4197_v14 = vadd.f32 %v5178_v42, %v7741_v17  ;;  %v4191_v19 = vpop.f32.mrb[83].mxu0  ;;  %v3985_v2 = vpop.permute.xlu1 %3984 }
 0xc90   :  { %v4192_v61 = vadd.f32 %v7741_v17, %v4191_v19  ;;  %v4041_v31 = vsel %vm58_vm0, %v4033_v26, %v3985_v2  ;;  %v3975_v35 = vpop.permute.xlu0 %3974 }
 0xc91   :  { %4255 = vst.msk [vmem:[%s7868_s5 + $0x28] sm:$0xff] %vm58_vm0, %v4197_v14  ;;  %v4036_v29 = vsel %vm58_vm0, %v4028_v39, %v3975_v35 }
 0xc92   :  { %4254 = vst.msk [vmem:[%s7868_s5 + $0x20] sm:$0xff] %vm58_vm0, %v4192_v61 }
 0xc93   :  { %v4005_v63 = vpop.permute.xlu1 %4004 }
 0xc94   :  { %v3979_v34 = vpop.permute.xlu0 %3978  ;;  %v4043_v37 = vsel %vm2168_vm7, %v4035_v6, %v4005_v63 }
 0xc95   :  { %v4038_v13 = vsel %vm58_vm0, %v4030_v7, %v3979_v34 }
 0xc97   :  { %v4009_v48 = vpop.permute.xlu1 %4008 }
 0xc98   :  { %v3983_v38 = vpop.permute.xlu0 %3982  ;;  %v4045_v1 = vsel %vm2168_vm7, %v4037_v50, %v4009_v48 }
 0xc99   :  { %v4040_v9 = vsel %vm58_vm0, %v4032_v10, %v3983_v38 }
 0xc9b   :  { %v4013_v60 = vpop.permute.xlu1 %4012 }
 0xc9c   :  { %v4003_v0 = vpop.permute.xlu0 %4002  ;;  %v4047_v32 = vsel %vm2168_vm7, %v4039_v25, %v4013_v60 }
 0xc9d   :  { %v4042_v43 = vsel %vm2168_vm7, %v4034_v59, %v4003_v0 }
 0xc9e   :  { %5182 = vmatprep.mubr.msk.f32.mxu0 %vm333_vm2, %v4042_v43 }
 0xc9f   :  { %5183 = vmatmul.mubr.msk.f32.gmra.mrb[86].mxu0 %vm333_vm2, %v4043_v37  ;;  %v4017_v30 = vpop.permute.xlu1 %4016 }
 0xca0   :  { %v4007_v28 = vpop.permute.xlu0 %4006  ;;  %v4049_v24 = vsel %vm2168_vm7, %v4041_v31, %v4017_v30 }
 0xca1   :  { %v4044_v52 = vsel %vm2168_vm7, %v4036_v29, %v4007_v28 }
 0xca2   :  { %5185 = vmatprep.mubr.msk.f32.mxu0 %vm333_vm2, %v4044_v52 }
 0xca3   :  { %5186 = vmatmul.mubr.msk.f32.gmra.mrb[88].mxu0 %vm333_vm2, %v4045_v1 }
 0xca4   :  { %v4011_v58 = vpop.permute.xlu0 %4010 }
 0xca5   :  { %v4046_v22 = vsel %vm2168_vm7, %v4038_v13, %v4011_v58 }
 0xca6   :  { %5188 = vmatprep.mubr.msk.f32.mxu0 %vm333_vm2, %v4046_v22 }
 0xca7   :  { %5189 = vmatmul.mubr.msk.f32.gmra.mrb[90].mxu0 %vm333_vm2, %v4047_v32 }
 0xcd9   :  { %v4015_v36 = vpop.permute.xlu0 %4014 }
 0xcda   :  { %v4048_v51 = vsel %vm2168_vm7, %v4040_v9, %v4015_v36 }
 0xcdb   :  { %5191 = vmatprep.mubr.msk.f32.mxu0 %vm333_vm2, %v4048_v51 }
 0xcdc   :  { %5192 = vmatmul.mubr.msk.f32.gmra.mrb[92].mxu0 %vm333_vm2, %v4049_v24 }
 0xd36   :  { %v5181_v8 = vpop.f32.mrb[84].mxu0 }
 0xd37   :  { %v4207_v15 = vadd.f32 %v5181_v8, %v7741_v17  ;;  %v4201_v16 = vpop.f32.mrb[85].mxu0 }
 0xd38   :  { %v4202_v20 = vadd.f32 %v7741_v17, %v4201_v16 }
 0xd39   :  { %4257 = vst.msk [vmem:[%s7868_s5 + $0x38] sm:$0xff] %vm58_vm0, %v4207_v15 }
 0xd3a   :  { %4256 = vst.msk [vmem:[%s7868_s5 + $0x30] sm:$0xff] %vm58_vm0, %v4202_v20 }
 0xd72   :  { %v5184_v4 = vpop.f32.mrb[86].mxu0 }
 0xd73   :  { %v4217_v12 = vadd.f32 %v5184_v4, %v7741_v17  ;;  %v4211_v11 = vpop.f32.mrb[87].mxu0 }
 0xd74   :  { %v4212_v47 = vadd.f32 %v7741_v17, %v4211_v11 }
 0xd75   :  { %4259 = vst.msk [vmem:[%s7868_s5 + $0x48] sm:$0xff] %vm58_vm0, %v4217_v12 }
 0xd76   :  { %4258 = vst.msk [vmem:[%s7868_s5 + $0x40] sm:$0xff] %vm58_vm0, %v4212_v47  ;;  %v5187_v40 = vpop.f32.mrb[88].mxu0 }
 0xd77   :  { %v4227_v21 = vadd.f32 %v5187_v40, %v7741_v17  ;;  %v4221_v62 = vpop.f32.mrb[89].mxu0 }
 0xd78   :  { %v4222_v3 = vadd.f32 %v7741_v17, %v4221_v62 }
 0xd79   :  { %4261 = vst.msk [vmem:[%s7868_s5 + $0x58] sm:$0xff] %vm58_vm0, %v4227_v21 }
 0xd7a   :  { %4260 = vst.msk [vmem:[%s7868_s5 + $0x50] sm:$0xff] %vm58_vm0, %v4222_v3  ;;  %v5190_v26 = vpop.f32.mrb[90].mxu0 }
 0xd7b   :  { %v4237_v33 = vadd.f32 %v5190_v26, %v7741_v17  ;;  %v4231_v23 = vpop.f32.mrb[91].mxu0 }
 0xd7c   :  { %v4232_v56 = vadd.f32 %v7741_v17, %v4231_v23 }
 0xd7d   :  { %4263 = vst.msk [vmem:[%s7868_s5 + $0x68] sm:$0xff] %vm58_vm0, %v4237_v33 }
 0xd7e   :  { %4262 = vst.msk [vmem:[%s7868_s5 + $0x60] sm:$0xff] %vm58_vm0, %v4232_v56 }
 0xdaf   :  { %v5193_v54 = vpop.f32.mrb[92].mxu0 }
 0xdb0   :  { %v4247_v46 = vadd.f32 %v5193_v54, %v7741_v17  ;;  %v4241_v45 = vpop.f32.mrb[93].mxu0 }
 0xdb1   :  { %v4242_v49 = vadd.f32 %v7741_v17, %v4241_v45 }
 0xdb2   :  { %4265 = vst.msk [vmem:[%s7868_s5 + $0x78] sm:$0xff] %vm58_vm0, %v4247_v46 }
 0xdb3   :  { %4264 = vst.msk [vmem:[%s7868_s5 + $0x70] sm:$0xff] %vm58_vm0, %v4242_v49 }
 0xdb4   :  { %4270 = vsyncpa [#allocation3], 1 }

</bundles_post_ra>
